<compile_context>
chip_gen: v7x
topology: tpu7x:2x2x1
jax: 0.10.0
libtpu: 0.0.40
codegen_flags: <defaults>
</compile_context>

<pallas_src>
import functools

import jax
import jax.numpy as jnp
import numpy as np
from jax import lax
from jax.experimental import pallas as pl
from jax.experimental.pallas import tpu as pltpu


def _round_up(x, m):
    return (x + m - 1) // m * m


# ---------------------------------------------------------------------------
# Pallas kernel: correlation + running max / argmax over the key (ref) axis
# ---------------------------------------------------------------------------
def _corr_argmax_kernel(lr_ref, kn_ref, max_ref, arg_ref, *, n_keys):
    # lr_ref : (1, TQ, D)  raw query patches (lrsr), block resident across ki
    # kn_ref : (1, TK, D)  pre-normalized key patches (refsr)
    # max_ref: (1, TQ, 1) f32 accumulator (output block, resident across ki)
    # arg_ref: (1, TQ, 1) i32 accumulator (output block, resident across ki)
    ki = pl.program_id(2)
    nk = pl.num_programs(2)
    tk = kn_ref.shape[1]

    @pl.when(ki == 0)
    def _():
        max_ref[...] = jnp.full(max_ref.shape, -jnp.inf, max_ref.dtype)
        arg_ref[...] = jnp.zeros(arg_ref.shape, arg_ref.dtype)

    q = lr_ref[0]    # (TQ, D) -- NOT normalized (scale deferred to epilogue)
    kn = kn_ref[0]   # (TK, D) -- pre-normalized in the wrapper

    # (TQ, TK) correlation block on the MXU, f32 accumulation.
    s = jnp.dot(q, kn.T, preferred_element_type=jnp.float32)

    col_ids = lax.broadcasted_iota(jnp.int32, s.shape, 1)   # (TQ, TK)
    if n_keys % tk != 0:
        # key axis was zero-padded in the wrapper: mask padded columns out
        s = jnp.where(ki * tk + col_ids < n_keys, s, -jnp.inf)

    tile_max = jnp.max(s, axis=-1, keepdims=True)            # (TQ, 1)
    # first occurrence of the per-row max inside this tile
    tile_arg = jnp.min(jnp.where(s == tile_max, col_ids, tk),
                       axis=-1, keepdims=True) + ki * tk     # (TQ, 1)

    better = tile_max > max_ref[0]        # strict > keeps first occurrence
    max_ref[0] = jnp.where(better, tile_max, max_ref[0])
    arg_ref[0] = jnp.where(better, tile_arg, arg_ref[0])

    @pl.when(ki == nk - 1)
    def _():
        # Deferred F.normalize of the queries: a single positive per-row scale
        # applied to the winning score (argmax unaffected).
        qf = q.astype(jnp.float32)
        qn = jnp.sqrt(jnp.sum(qf * qf, axis=-1, keepdims=True))
        max_ref[0] = max_ref[0] / jnp.maximum(qn, 1e-12)


def corr_argmax(lr_pat, rf_pat, *, tq=256, tk=256,
                compute_dtype=None, key_buffers=None):
    """lr_pat, rf_pat: (B, N, D) f32 patch matrices.

    Returns (star (B, N) f32, arg (B, N) i32): max / argmax over ref positions
    of the normalized cross-correlation (F.normalize semantics, eps=1e-12).
    """
    B, N, D = lr_pat.shape

    # --- wrapper-side prep (single fused mem-bound pass) --------------------
    # key patches normalized once here, not once per query tile in-kernel
    kn = rf_pat / jnp.maximum(
        jnp.sqrt(jnp.sum(rf_pat * rf_pat, axis=-1, keepdims=True)), 1e-12)
    q = lr_pat
    if compute_dtype is not None:          # optional bf16 streaming (v6e/v7x)
        q = q.astype(compute_dtype)
        kn = kn.astype(compute_dtype)

    # pad feature axis to a lane multiple (zeros are free for dot / norm)
    D_pad = _round_up(max(D, 128), 128)
    # tile sizes: cap at what the (padded) problem actually needs
    tq = max(8, min(tq, _round_up(N, 8)))
    tk = max(128, min(tk, _round_up(N, 128)))
    Nq_pad = _round_up(N, tq)
    Nk_pad = _round_up(N, tk)

    def pad3(x, n_to, d_to):
        return jnp.pad(x, ((0, 0), (0, n_to - x.shape[1]),
                           (0, d_to - x.shape[2])))

    q = pad3(q, Nq_pad, D_pad)
    kn = pad3(kn, Nk_pad, D_pad)

    itemsize = jnp.dtype(q.dtype).itemsize
    cost = pl.CostEstimate(
        flops=2 * B * Nq_pad * Nk_pad * D_pad,
        transcendentals=B * Nq_pad,
        bytes_accessed=(B * Nq_pad * D_pad * itemsize             # queries once
                        + B * (Nq_pad // tq) * Nk_pad * D_pad * itemsize  # keys restreamed
                        + 2 * B * Nq_pad * 4),                    # outputs
    )

    key_spec_kwargs = {}
    if key_buffers is not None:            # e.g. 3 on v5e to hide DMA latency
        key_spec_kwargs["pipeline_mode"] = pl.Buffered(key_buffers)

    out_max, out_arg = pl.pallas_call(
        functools.partial(_corr_argmax_kernel, n_keys=N),
        out_shape=(jax.ShapeDtypeStruct((B, Nq_pad, 1), jnp.float32),
                   jax.ShapeDtypeStruct((B, Nq_pad, 1), jnp.int32)),
        grid_spec=pltpu.PrefetchScalarGridSpec(
            num_scalar_prefetch=0,
            grid=(B, Nq_pad // tq, Nk_pad // tk),
            in_specs=[
                pl.BlockSpec((1, tq, D_pad), lambda b, qi, ki: (b, qi, 0)),
                pl.BlockSpec((1, tk, D_pad), lambda b, qi, ki: (b, ki, 0),
                             **key_spec_kwargs),
            ],
            out_specs=[
                pl.BlockSpec((1, tq, 1), lambda b, qi, ki: (b, qi, 0)),
                pl.BlockSpec((1, tq, 1), lambda b, qi, ki: (b, qi, 0)),
            ],
        ),
        compiler_params=pltpu.CompilerParams(
            dimension_semantics=("parallel", "parallel", "arbitrary")),
        cost_estimate=cost,
    )(q, kn)
    # TODO(synk): lane-dense (B, N) output blocks would avoid masked (..,1)
    # writebacks, but output traffic is negligible vs. the O(N^2 D) matmul.
    return out_max[:, :N, 0], out_arg[:, :N, 0]


# ---------------------------------------------------------------------------
# Plain-JAX glue: unfold (im2col), fold (col2im overlap-add), bis (gather)
# ---------------------------------------------------------------------------
def unfold(x, k, p, s):
    """F.unfold(x, kernel_size=k, padding=p, stride=s) for NCHW x -> (B, C*k*k, L)."""
    B, C, H, W = x.shape
    xp = jnp.pad(x, ((0, 0), (0, 0), (p, p), (p, p)))
    Ho = (H + 2 * p - k) // s + 1
    Wo = (W + 2 * p - k) // s + 1
    cols = []
    for i in range(k):
        for j in range(k):
            cols.append(xp[:, :, i:i + s * Ho:s, j:j + s * Wo:s])  # (B,C,Ho,Wo)
    cols = jnp.stack(cols, axis=2)                                  # (B,C,k*k,Ho,Wo)
    return cols.reshape(B, C * k * k, Ho * Wo)


def unfold_patches_nld(x, k, p, s):
    """im2col emitting (B, L, k*k*C) patch rows directly (no big post-transpose).

    Feature ordering is (ki, kj, c); both correlation inputs use the same
    ordering, so dot products match F.unfold's (c, ki, kj) ordering exactly.
    """
    B, C, H, W = x.shape
    Ho = (H + 2 * p - k) // s + 1
    Wo = (W + 2 * p - k) // s + 1
    xp = jnp.pad(x, ((0, 0), (0, 0), (p, p), (p, p)))
    xh = jnp.transpose(xp, (0, 2, 3, 1))               # NHWC (small copy)
    cols = [xh[:, i:i + s * Ho:s, j:j + s * Wo:s, :]
            for i in range(k) for j in range(k)]        # each (B,Ho,Wo,C)
    pat = jnp.concatenate(cols, axis=-1)                # (B,Ho,Wo,k*k*C)
    return pat.reshape(B, Ho * Wo, k * k * C)


def fold(cols, output_size, k, p, s):
    """F.fold adjoint of unfold above."""
    B, CKK, L = cols.shape
    C = CKK // (k * k)
    H, W = output_size
    Ho = (H + 2 * p - k) // s + 1
    Wo = (W + 2 * p - k) // s + 1
    cols = cols.reshape(B, C, k, k, Ho, Wo)
    out = jnp.zeros((B, C, H + 2 * p, W + 2 * p), cols.dtype)
    for i in range(k):
        for j in range(k):
            out = out.at[:, :, i:i + s * Ho:s, j:j + s * Wo:s].add(cols[:, :, i, j])
    return out[:, :, p:p + H, p:p + W]


def bis(u, idx):
    """Batched index-select along dim=2: out[b, c, n] = u[b, c, idx[b, n]]."""
    full_idx = jnp.broadcast_to(idx[:, None, :],
                                (u.shape[0], u.shape[1], idx.shape[1]))
    return jnp.take_along_axis(u, full_idx, axis=2)


# ---------------------------------------------------------------------------
# Trans.forward
# ---------------------------------------------------------------------------
@jax.jit
def trans_forward(lrsr_lv3, refsr_lv3, ref_lv1, ref_lv2, ref_lv3):
    B, C, H, W = lrsr_lv3.shape

    lr_pat = unfold_patches_nld(lrsr_lv3, 3, 1, 1)     # (B, N, D) queries
    rf_pat = unfold_patches_nld(refsr_lv3, 3, 1, 1)    # (B, N, D) keys

    # hot path in Pallas: correlation bmm + max/argmax over ref positions
    refer_lv3_star, refer_lv3_star_arg = corr_argmax(lr_pat, rf_pat)

    ref_lv3_unfold = unfold(ref_lv3, 3, 1, 1)
    ref_lv2_unfold = unfold(ref_lv2, 6, 2, 2)
    ref_lv1_unfold = unfold(ref_lv1, 12, 4, 4)

    T_lv3_unfold = bis(ref_lv3_unfold, refer_lv3_star_arg)
    T_lv2_unfold = bis(ref_lv2_unfold, refer_lv3_star_arg)
    T_lv1_unfold = bis(ref_lv1_unfold, refer_lv3_star_arg)

    T_lv3 = fold(T_lv3_unfold, (H, W), 3, 1, 1) / (3.0 * 3.0)
    T_lv2 = fold(T_lv2_unfold, (2 * H, 2 * W), 6, 2, 2) / (3.0 * 3.0)
    T_lv1 = fold(T_lv1_unfold, (4 * H, 4 * W), 12, 4, 4) / (3.0 * 3.0)

    s = refer_lv3_star.reshape(B, 1, H, W)
    return s, T_lv3, T_lv2, T_lv1


if __name__ == "__main__":
    key = jax.random.PRNGKey(0)
    k1, k2, k3, k4, k5 = jax.random.split(key, 5)

    B, C, H, W = 2, 4, 16, 16
    lrsr_lv3 = jax.random.normal(k1, (B, C, H, W), jnp.float32)
    refsr_lv3 = jax.random.normal(k2, (B, C, H, W), jnp.float32)
    ref_lv3 = jax.random.normal(k3, (B, 5, H, W), jnp.float32)
    ref_lv2 = jax.random.normal(k4, (B, 3, 2 * H, 2 * W), jnp.float32)
    ref_lv1 = jax.random.normal(k5, (B, 2, 4 * H, 4 * W), jnp.float32)

    s, T_lv3, T_lv2, T_lv1 = trans_forward(lrsr_lv3, refsr_lv3,
                                           ref_lv1, ref_lv2, ref_lv3)
    jax.block_until_ready((s, T_lv3, T_lv2, T_lv1))

    assert s.shape == (B, 1, H, W)
    assert T_lv3.shape == (B, 5, H, W)
    assert T_lv2.shape == (B, 3, 2 * H, 2 * W)
    assert T_lv1.shape == (B, 2, 4 * H, 4 * W)

    # ---- light correctness check of the Pallas hot path vs pure-JAX --------
    lr_u = unfold(lrsr_lv3, 3, 1, 1)                                 # (B, D, N)
    rf_u = jnp.transpose(unfold(refsr_lv3, 3, 1, 1), (0, 2, 1))      # (B, N, D)
    rf_n = rf_u / jnp.maximum(
        jnp.sqrt(jnp.sum(rf_u * rf_u, axis=2, keepdims=True)), 1e-12)
    lr_n = lr_u / jnp.maximum(
        jnp.sqrt(jnp.sum(lr_u * lr_u, axis=1, keepdims=True)), 1e-12)
    corr = jnp.einsum("bnd,bdm->bnm", rf_n, lr_n,
                      precision=lax.Precision.HIGHEST)               # (B,Nref,Nlr)
    star_ref = jnp.max(corr, axis=1)
    star_ker = s.reshape(B, -1)
    np.testing.assert_allclose(np.asarray(star_ker), np.asarray(star_ref),
                               atol=1e-3, rtol=1e-3)
    # the index the kernel picked must attain the reference max (tie-robust)
    lr_pat = unfold_patches_nld(lrsr_lv3, 3, 1, 1)
    rf_pat = unfold_patches_nld(refsr_lv3, 3, 1, 1)
    _, arg_ker = corr_argmax(lr_pat, rf_pat)
    picked = jnp.take_along_axis(corr, arg_ker[:, None, :], axis=1)[:, 0, :]
    np.testing.assert_allclose(np.asarray(picked), np.asarray(star_ref),
                               atol=1e-3, rtol=1e-3)

    print("KERNEL_OK")
</pallas_src>

<mosaic_0001>
module attributes {stable_mosaic.version = 11 : i64} {
  func.func private @main(%arg0: i32) attributes {dimension_semantics = [#tpu.dimension_semantics<core_parallel>], iteration_bounds = array<i64: 2>, tpu.core_type = #tpu.core_type<sc_scalar_subcore>, window_params = []} {
    return
  }
}

module attributes {stable_mosaic.version = 11 : i64} {
  func.func private @main(%arg0: i32) attributes {dimension_semantics = [#tpu.dimension_semantics<core_parallel>], iteration_bounds = array<i64: 2>, tpu.core_type = #tpu.core_type<sc_scalar_subcore>, window_params = []} {
    return
  }
}

module attributes {stable_mosaic.version = 11 : i64} {
  func.func @_corr_argmax_kernel(%arg0: i32, %arg1: i32, %arg2: i32, %arg3: memref<1x256x128xf32, #tpu.memory_space<vmem>>, %arg4: memref<1x256x128xf32, #tpu.memory_space<vmem>>, %arg5: memref<1x256x1xf32, #tpu.memory_space<vmem>>, %arg6: memref<1x256x1xi32, #tpu.memory_space<vmem>>) attributes {dimension_semantics = [#tpu.dimension_semantics<parallel>, #tpu.dimension_semantics<parallel>, #tpu.dimension_semantics<arbitrary>], iteration_bounds = array<i64: 2, 1, 1>, scalar_prefetch = 0 : i64, scratch_operands = 0 : i64, tpu.core_type = #tpu.core_type<tc>, window_params = [{transform_indices = @transform_0, window_bounds = array<i64: 1, 256, 128>}, {transform_indices = @transform_1, window_bounds = array<i64: 1, 256, 128>}, {transform_indices = @transform_2, window_bounds = array<i64: 1, 256, 1>}, {transform_indices = @transform_3, window_bounds = array<i64: 1, 256, 1>}]} {
    %c0_i32 = arith.constant 0 : i32
    %0 = arith.cmpi eq, %arg2, %c0_i32 : i32
    %1 = arith.extui %0 : i1 to i32
    %c0_i32_0 = arith.constant 0 : i32
    %2 = arith.cmpi ne, %1, %c0_i32_0 : i32
    scf.if %2 {
      %cst_26 = arith.constant 0xFF800000 : f32
      %39 = vector.broadcast %cst_26 : f32 to vector<1x256x1xf32>
      %c0_27 = arith.constant 0 : index
      %c0_28 = arith.constant 0 : index
      %c0_29 = arith.constant 0 : index
      %40 = vector.load %arg5[%c0_27, %c0_28, %c0_29] : memref<1x256x1xf32, #tpu.memory_space<vmem>>, vector<1x256x1xf32>
      tpu.vector_store %arg5[%c0_27, %c0_28, %c0_29], %39 {strides = array<i32>} : memref<1x256x1xf32, #tpu.memory_space<vmem>>, vector<1x256x1xf32>,
      %c0_i32_30 = arith.constant 0 : i32
      %41 = vector.broadcast %c0_i32_30 : i32 to vector<1x256x1xi32>
      %c0_31 = arith.constant 0 : index
      %c0_32 = arith.constant 0 : index
      %c0_33 = arith.constant 0 : index
      %42 = vector.load %arg6[%c0_31, %c0_32, %c0_33] : memref<1x256x1xi32, #tpu.memory_space<vmem>>, vector<1x256x1xi32>
      tpu.vector_store %arg6[%c0_31, %c0_32, %c0_33], %41 {strides = array<i32>} : memref<1x256x1xi32, #tpu.memory_space<vmem>>, vector<1x256x1xi32>,
    } else {
    }
    %c0 = arith.constant 0 : index
    %c0_1 = arith.constant 0 : index
    %c0_2 = arith.constant 0 : index
    %3 = vector.load %arg3[%c0, %c0_1, %c0_2] : memref<1x256x128xf32, #tpu.memory_space<vmem>>, vector<1x256x128xf32>
    %4 = vector.shape_cast %3 : vector<1x256x128xf32> to vector<256x128xf32>
    %c0_3 = arith.constant 0 : index
    %c0_4 = arith.constant 0 : index
    %c0_5 = arith.constant 0 : index
    %5 = vector.load %arg4[%c0_3, %c0_4, %c0_5] : memref<1x256x128xf32, #tpu.memory_space<vmem>>, vector<1x256x128xf32>
    %6 = vector.shape_cast %5 : vector<1x256x128xf32> to vector<256x128xf32>
    %7 = tpu.transpose %6, [1, 0] : vector<256x128xf32> -> vector<128x256xf32>
    %cst = arith.constant dense<0.000000e+00> : vector<256x256xf32>
    %8 = tpu.matmul %4, %7, %cst {dimension_numbers = #tpu.dot_dimension_numbers<[1], [0], [0], [1], [0, 0, 1, 1], [], []>} : vector<256x128xf32>, vector<128x256xf32>, vector<256x256xf32> -> vector<256x256xf32>
    %9 = tpu.iota {dimensions = array<i32: 1>} : vector<256x256xi32>
    %cst_6 = arith.constant dense<0xFF800000> : vector<256xf32>
    %10 = vector.multi_reduction <maximumf>, %8, %cst_6 [1] : vector<256x256xf32> to vector<256xf32>
    %11 = vector.shape_cast %10 : vector<256xf32> to vector<256x1xf32>
    %12 = vector.broadcast %11 : vector<256x1xf32> to vector<256x256xf32>
    %13 = arith.cmpf oeq, %8, %12 : vector<256x256xf32>
    %c256_i32 = arith.constant 256 : i32
    %14 = vector.broadcast %c256_i32 : i32 to vector<256x256xi32>
    %15 = arith.select %13, %9, %14 : vector<256x256xi1>, vector<256x256xi32>
    %cst_7 = arith.constant dense<2147483647> : vector<256xi32>
    %16 = vector.multi_reduction <minsi>, %15, %cst_7 [1] : vector<256x256xi32> to vector<256xi32>
    %17 = vector.shape_cast %16 : vector<256xi32> to vector<256x1xi32>
    %c256_i32_8 = arith.constant 256 : i32
    %18 = arith.muli %arg2, %c256_i32_8 : i32
    %19 = vector.broadcast %18 : i32 to vector<256x1xi32>
    %20 = arith.addi %17, %19 : vector<256x1xi32>
    %c0_9 = arith.constant 0 : index
    %c0_10 = arith.constant 0 : index
    %c0_11 = arith.constant 0 : index
    %21 = vector.load %arg5[%c0_9, %c0_10, %c0_11] : memref<1x256x1xf32, #tpu.memory_space<vmem>>, vector<1x256x1xf32>
    %22 = vector.shape_cast %21 : vector<1x256x1xf32> to vector<256x1xf32>
    %23 = arith.cmpf ogt, %11, %22 : vector<256x1xf32>
    %c0_12 = arith.constant 0 : index
    %c0_13 = arith.constant 0 : index
    %c0_14 = arith.constant 0 : index
    %24 = vector.load %arg5[%c0_12, %c0_13, %c0_14] : memref<1x256x1xf32, #tpu.memory_space<vmem>>, vector<1x256x1xf32>
    %25 = vector.shape_cast %24 : vector<1x256x1xf32> to vector<256x1xf32>
    %26 = arith.select %23, %11, %25 : vector<256x1xi1>, vector<256x1xf32>
    %c0_15 = arith.constant 0 : index
    %c0_16 = arith.constant 0 : index
    %c0_17 = arith.constant 0 : index
    %27 = vector.load %arg5[%c0_15, %c0_16, %c0_17] : memref<1x256x1xf32, #tpu.memory_space<vmem>>, vector<1x256x1xf32>
    %28 = vector.shape_cast %27 : vector<1x256x1xf32> to vector<256x1xf32>
    %29 = vector.shape_cast %26 : vector<256x1xf32> to vector<1x256x1xf32>
    tpu.vector_store %arg5[%c0_15, %c0_16, %c0_17], %29 {strides = array<i32>} : memref<1x256x1xf32, #tpu.memory_space<vmem>>, vector<1x256x1xf32>,
    %c0_18 = arith.constant 0 : index
    %c0_19 = arith.constant 0 : index
    %c0_20 = arith.constant 0 : index
    %30 = vector.load %arg6[%c0_18, %c0_19, %c0_20] : memref<1x256x1xi32, #tpu.memory_space<vmem>>, vector<1x256x1xi32>
    %31 = vector.shape_cast %30 : vector<1x256x1xi32> to vector<256x1xi32>
    %32 = arith.select %23, %20, %31 : vector<256x1xi1>, vector<256x1xi32>
    %c0_21 = arith.constant 0 : index
    %c0_22 = arith.constant 0 : index
    %c0_23 = arith.constant 0 : index
    %33 = vector.load %arg6[%c0_21, %c0_22, %c0_23] : memref<1x256x1xi32, #tpu.memory_space<vmem>>, vector<1x256x1xi32>
    %34 = vector.shape_cast %33 : vector<1x256x1xi32> to vector<256x1xi32>
    %35 = vector.shape_cast %32 : vector<256x1xi32> to vector<1x256x1xi32>
    tpu.vector_store %arg6[%c0_21, %c0_22, %c0_23], %35 {strides = array<i32>} : memref<1x256x1xi32, #tpu.memory_space<vmem>>, vector<1x256x1xi32>,
    %c0_i32_24 = arith.constant 0 : i32
    %36 = arith.cmpi eq, %arg2, %c0_i32_24 : i32
    %37 = arith.extui %36 : i1 to i32
    %c0_i32_25 = arith.constant 0 : i32
    %38 = arith.cmpi ne, %37, %c0_i32_25 : i32
    scf.if %38 {
      %39 = arith.mulf %4, %4 : vector<256x128xf32>
      %cst_26 = arith.constant dense<0.000000e+00> : vector<256xf32>
      %40 = vector.multi_reduction <add>, %39, %cst_26 [1] : vector<256x128xf32> to vector<256xf32>
      %41 = vector.shape_cast %40 : vector<256xf32> to vector<256x1xf32>
      %42 = math.sqrt %41 : vector<256x1xf32>
      %c0_27 = arith.constant 0 : index
      %c0_28 = arith.constant 0 : index
      %c0_29 = arith.constant 0 : index
      %43 = vector.load %arg5[%c0_27, %c0_28, %c0_29] : memref<1x256x1xf32, #tpu.memory_space<vmem>>, vector<1x256x1xf32>
      %44 = vector.shape_cast %43 : vector<1x256x1xf32> to vector<256x1xf32>
      %cst_30 = arith.constant 9.99999996E-13 : f32
      %45 = vector.broadcast %cst_30 : f32 to vector<256x1xf32>
      %46 = arith.maximumf %42, %45 : vector<256x1xf32>
      %47 = arith.divf %44, %46 : vector<256x1xf32>
      %c0_31 = arith.constant 0 : index
      %c0_32 = arith.constant 0 : index
      %c0_33 = arith.constant 0 : index
      %48 = vector.load %arg5[%c0_31, %c0_32, %c0_33] : memref<1x256x1xf32, #tpu.memory_space<vmem>>, vector<1x256x1xf32>
      %49 = vector.shape_cast %48 : vector<1x256x1xf32> to vector<256x1xf32>
      %50 = vector.shape_cast %47 : vector<256x1xf32> to vector<1x256x1xf32>
      tpu.vector_store %arg5[%c0_31, %c0_32, %c0_33], %50 {strides = array<i32>} : memref<1x256x1xf32, #tpu.memory_space<vmem>>, vector<1x256x1xf32>,
    } else {
    }
    return
  }
  func.func @transform_0(%arg0: i32, %arg1: i32, %arg2: i32) -> (i32, i32, i32) {
    %c0_i32 = arith.constant 0 : i32
    %c0_i32_0 = arith.constant 0 : i32
    return %arg0, %arg1, %c0_i32 : i32, i32, i32
  }
  func.func @transform_1(%arg0: i32, %arg1: i32, %arg2: i32) -> (i32, i32, i32) {
    %c0_i32 = arith.constant 0 : i32
    %c0_i32_0 = arith.constant 0 : i32
    return %arg0, %arg2, %c0_i32 : i32, i32, i32
  }
  func.func @transform_2(%arg0: i32, %arg1: i32, %arg2: i32) -> (i32, i32, i32) {
    %c0_i32 = arith.constant 0 : i32
    %c0_i32_0 = arith.constant 0 : i32
    return %arg0, %arg1, %c0_i32 : i32, i32, i32
  }
  func.func @transform_3(%arg0: i32, %arg1: i32, %arg2: i32) -> (i32, i32, i32) {
    %c0_i32 = arith.constant 0 : i32
    %c0_i32_0 = arith.constant 0 : i32
    return %arg0, %arg1, %c0_i32 : i32, i32, i32
  }
}

</mosaic_0001>

<bundles_post_ra>
// kernel: trans_forward.1
= control target key start
LH: loop header
LB: loop body
LE: loop exit
PB: predicated region body
PF: predicated region fallthrough
CT: control target
= control target key end

     0   :  { %9 = vsyncpa [#allocation3], 0  ;;  %s5218_s0 = inlined_call_operand.vmem [shape: f32[2,256,128], index: 0, kind: input, shape index: {}]   ;;  %s5219_s1 = inlined_call_operand.vmem [shape: f32[2,256,128], index: 1, kind: input, shape index: {}]   ;;  %s5220_s2 = inlined_call_operand.hbm [shape: f32[2,256,1], index: 2, kind: output, shape index: {0}]   ;;  %s5221_s3 = inlined_call_operand.vmem [shape: s32[2,256,1], index: 3, kind: output, shape index: {1}]  }
   0x1   :  { %11 = vsyncpa [#allocation3 + $0x1], 0  ;;  %s2776_s12 = smov 0   ;;  %s2778_s13 = smov 0  }
   0x2   :  { %s2780_s14 = smov 0   ;;  %s2782_s15 = smov 0  }
   0x3   :  { %s2784_s16 = smov 0   ;;  %s2786_s17 = smov 0  }
   0x4 LB: > { %s2304_s18 = sadd.s32 4294967295, %s2749_s17   ;;  %s2305_s19 = sadd.s32 4294967294, %s2749_s17   ;;  %s2749_s17 = sphi %s2786_s17, %s17_s17   ;;  %s2745_s16 = sphi %s2784_s16, %s5659_s16   ;;  %s2741_s15 = sphi %s2782_s15, %s5658_s15   ;;  %s2737_s14 = sphi %s2780_s14, %s5657_s14   ;;  %s2733_s13 = sphi %s2778_s13, %s5656_s13   ;;  %s2729_s12 = sphi %s2776_s12, %s5655_s12  }
   0x5   : > { %s36_s20 = sadd.s32 1, %s2745_s16  ;;  %s101_s21 = sadd.s32 1, %s2737_s14 }
   0x6   : > { %p38_p0 = scmp.ge.s32.totalorder %s36_s20, 2  ;;  %p111_p1 = scmp.ne.s32.totalorder %s2737_s14, %s2733_s13 }
   0x7   : > { %p112_p2 = scmp.eq.s32.totalorder %s2304_s18, 1  ;;  %p117_p3 = scmp.ne.s32.totalorder %s2733_s13, %s2729_s12 }
   0x8   : > { %s5661_s20 = smov (%p38_p0, %s36_s20), 0  ;;  %p118_p5 = scmp.eq.s32.totalorder %s2305_s19, 1 }
   0x9   : > { %p2816_p4 = por %p112_p2, %p111_p1  ;;  %s96_s23 = ssub.s32 %s2745_s16, %s5661_s20 }
   0xa   : > { %p2308_p6 = scmp.ge.s32.totalorder %s2749_s17, 1  ;;  %p99_p7 = scmp.eq.s32.totalorder %s96_s23, 0 }
   0xb   : > { %p2823_p8 = por %p118_p5, %p117_p3  ;;  %p190_p9 = scmp.lt.s32.totalorder %s2749_s17, 3 }
   0xc   : > { %s2829_s25 = scalar_select %p99_p7, %s2737_s14, %s101_s21  }
   0xd   : > { %p191_p10 = pnand %p2308_p6, %p190_p9 }
   0xf   : > { %194 = sbr.rel (%p191_p10) target bundleno = 867 (0x363), region = 28 }
  0x16   : > { %p237_p11 = scmp.lt.s32.totalorder %s2741_s15, 1  ;;  %vm271_vm0 = vcmask 7168   ;;  %s222_s7 = sand.u32 1, %s2733_s13  }
  0x17   : > { %s2309_s8 = sshll.u32 %s222_s7, 8  ;;  %s2324_s19 = sshll.u32 %s2741_s15, 12 }
  0x18   : > { %s238_s26 = scalar_select %p237_p11, %s2741_s15, 1 }
  0x19   : > { %s3052_s9 = scalar_lea.vmem [#allocation2], %s2309_s8  ;;  %s4973_s15 = scalar_lea.sflag [#allocation3], %s222_s7 }
  0x1a   : > { %s2833_s27 = sshll.u32 %s238_s26, 8  ;;  %s2163_s21 = sshll.u32 %s3052_s9, 4  ;;  %s4960_s21 = int_to_ptr.vmem [resolvable:$true] %s2163_s21 }
  0x1b   : > { %s2839_s30 = scalar_lea.vmem %s5219_s1, %s2833_s27  ;;  %s2855_s6 = scalar_lea.vmem %s5218_s0, %s2833_s27 }
  0x1c   : > { %v384_v0 = vld [vmem:[%s2839_s30 + $0x80] sm:$0xff]  ;;  %v385_v1 = vld [vmem:[%s2839_s30 + $0x88] sm:$0xff]  ;;  %v386_v5 = vld [vmem:[%s2839_s30 + $0x90] sm:$0xff]  ;;  %s4627_s18 = scalar_lea.vmem %s5221_s3, %s2833_s27  ;;  %s4958_s27 = scalar_lea.hbm %s5220_s2, %s2324_s19 }
  0x1d   : > { %v368_v2 = vld [vmem:[%s2839_s30] sm:$0xff]  ;;  %v2421_v3 = vpack.c.bf16 %v385_v1, %v384_v0  ;;  %v369_v4 = vld [vmem:[%s2839_s30 + $0x8] sm:$0xff]  ;;  %v387_v6 = vld [vmem:[%s2839_s30 + $0x98] sm:$0xff]  ;;  %s2671_s28 = scalar_lea.vmem %s4960_s21, 4096  ;;  %s2753_s29 = smov [#allocation2]  }
  0x1e   : > { %v2423_v7 = vpack.c.bf16 %v369_v4, %v368_v2  ;;  %v2425_v8 = vpack.c.bf16 %v387_v6, %v386_v5  ;;  %v370_v9 = vld [vmem:[%s2839_s30 + $0x10] sm:$0xff]  ;;  %v371_v10 = vld [vmem:[%s2839_s30 + $0x18] sm:$0xff]  ;;  %v388_v11 = vld [vmem:[%s2839_s30 + $0xa0] sm:$0xff]  ;;  %p2672_p12 = scmp.ne.s32.totalorder %s4960_s21, %s2671_s28 }
  0x1f   : > { %2422 = vmatprep.subr.bf16.mxu0 %v2421_v3  ;;  %2453 = vmatprep.subr.bf16.mxu1 %v2421_v3  ;;  %v389_v12 = vld [vmem:[%s2839_s30 + $0xa8] sm:$0xff]  ;;  %v2427_v13 = vpack.c.bf16 %v371_v10, %v370_v9  ;;  %v2858_v15 = vld [vmem:[%s2855_s6] sm:$0xff]  ;;  %v2874_v22 = vld [vmem:[%s2855_s6 + $0x10] sm:$0xff] }
  0x20   : > { %2424 = vmatpush3.bf16.xpose.msra.mxu0 %v2423_v7  ;;  %2461 = vmatpush3.bf16.xpose.msra.mxu1 %v2423_v7  ;;  %v2429_v14 = vpack.c.bf16 %v389_v12, %v388_v11  ;;  %v2862_v16 = vld [vmem:[%s2855_s6 + $0x80] sm:$0xff]  ;;  %v2865_v17 = vld [vmem:[%s2855_s6 + $0x8] sm:$0xff]  ;;  %v1658_v18 = vmul.f32 %v2858_v15, %v2858_v15  ;;  %v390_v23 = vld [vmem:[%s2839_s30 + $0xb0] sm:$0xff]  ;;  %v1660_v26 = vmul.f32 %v2874_v22, %v2874_v22  ;;  %p2673_p13 = pnand %p2672_p12, %p2816_p4 }
  0x21   : > { %2426 = vmatprep.subr.bf16.mxu0 %v2425_v8  ;;  %2454 = vmatprep.subr.bf16.mxu1 %v2425_v8  ;;  %v1659_v19 = vmul.f32 %v2865_v17, %v2865_v17  ;;  %v372_v20 = vld [vmem:[%s2839_s30 + $0x20] sm:$0xff]  ;;  %v373_v21 = vld [vmem:[%s2839_s30 + $0x28] sm:$0xff]  ;;  %v391_v24 = vld [vmem:[%s2839_s30 + $0xb8] sm:$0xff]  ;;  %v1674_v8 = vmul.f32 %v2862_v16, %v2862_v16 }
  0x22   : > { %2357 = vmatprep.mubr.f32.mxu0 %v2858_v15  ;;  %2389 = vmatprep.mubr.f32.mxu1 %v2862_v16  ;;  %v2880_v25 = vld [vmem:[%s2855_s6 + $0x18] sm:$0xff]  ;;  %v2431_v28 = vpack.c.bf16 %v373_v21, %v372_v20  ;;  %v2433_v29 = vpack.c.bf16 %v391_v24, %v390_v23  ;;  %v2887_v30 = vld [vmem:[%s2855_s6 + $0x20] sm:$0xff]  ;;  %v2890_v31 = vld [vmem:[%s2855_s6 + $0x28] sm:$0xff]  ;;  %p2674_p0 = pneg %p2673_p13 }
  0x23   : > { %1690 = vadd.xlane.f32.xlu1 %v1658_v18  ;;  %1692 = vadd.xlane.f32.xlu0 %v1659_v19  ;;  %v1661_v27 = vmul.f32 %v2880_v25, %v2880_v25  ;;  %v1662_v32 = vmul.f32 %v2887_v30, %v2887_v30  ;;  %v1663_v33 = vmul.f32 %v2890_v31, %v2890_v31  ;;  %v374_v34 = vld [vmem:[%s2839_s30 + $0x30] sm:$0xff]  ;;  %v375_v35 = vld [vmem:[%s2839_s30 + $0x38] sm:$0xff]  ;;  %v392_v37 = vld [vmem:[%s2839_s30 + $0xc0] sm:$0xff] }
  0x24   : > { %v2899_v36 = vld [vmem:[%s2855_s6 + $0x30] sm:$0xff]  ;;  %v393_v38 = vld [vmem:[%s2839_s30 + $0xc8] sm:$0xff]  ;;  %v2904_v39 = vld [vmem:[%s2855_s6 + $0x38] sm:$0xff]  ;;  %v2435_v42 = vpack.c.bf16 %v375_v35, %v374_v34 }
  0x25   : > { %v1664_v40 = vmul.f32 %v2899_v36, %v2899_v36  ;;  %v1665_v41 = vmul.f32 %v2904_v39, %v2904_v39  ;;  %v2437_v43 = vpack.c.bf16 %v393_v38, %v392_v37  ;;  %v2911_v44 = vld [vmem:[%s2855_s6 + $0x40] sm:$0xff]  ;;  %v2914_v45 = vld [vmem:[%s2855_s6 + $0x48] sm:$0xff]  ;;  %v2923_v50 = vld [vmem:[%s2855_s6 + $0x50] sm:$0xff] }
  0x26   : > { %v1666_v46 = vmul.f32 %v2911_v44, %v2911_v44  ;;  %v1667_v47 = vmul.f32 %v2914_v45, %v2914_v45  ;;  %v376_v48 = vld [vmem:[%s2839_s30 + $0x40] sm:$0xff]  ;;  %v377_v49 = vld [vmem:[%s2839_s30 + $0x48] sm:$0xff]  ;;  %v394_v51 = vld [vmem:[%s2839_s30 + $0xd0] sm:$0xff]  ;;  %v1668_v54 = vmul.f32 %v2923_v50, %v2923_v50 }
  0x27   : > { %1694 = vadd.xlane.f32.xlu1 %v1660_v26  ;;  %1696 = vadd.xlane.f32.xlu0 %v1661_v27  ;;  %v395_v52 = vld [vmem:[%s2839_s30 + $0xd8] sm:$0xff]  ;;  %v2439_v56 = vpack.c.bf16 %v377_v49, %v376_v48  ;;  %v2935_v58 = vld [vmem:[%s2855_s6 + $0x60] sm:$0xff]  ;;  %v2938_v59 = vld [vmem:[%s2855_s6 + $0x68] sm:$0xff] }
  0x28   : > { %2428 = vmatpush3.bf16.xpose.msra.mxu0 %v2427_v13  ;;  %2462 = vmatpush3.bf16.xpose.msra.mxu1 %v2427_v13  ;;  %v2928_v53 = vld [vmem:[%s2855_s6 + $0x58] sm:$0xff]  ;;  %v2441_v57 = vpack.c.bf16 %v395_v52, %v394_v51  ;;  %v1670_v60 = vmul.f32 %v2935_v58, %v2935_v58  ;;  %v1671_v61 = vmul.f32 %v2938_v59, %v2938_v59  ;;  %v378_v62 = vld [vmem:[%s2839_s30 + $0x50] sm:$0xff]  ;;  %v396_v1 = vld [vmem:[%s2839_s30 + $0xe0] sm:$0xff]  ;;  %v2751_v51 = vmov -inf  }
  0x29   : > { %2430 = vmatprep.subr.bf16.mxu0 %v2429_v14  ;;  %2455 = vmatprep.subr.bf16.mxu1 %v2429_v14  ;;  %v1669_v55 = vmul.f32 %v2928_v53, %v2928_v53  ;;  %v379_v63 = vld [vmem:[%s2839_s30 + $0x58] sm:$0xff]  ;;  %v2947_v0 = vld [vmem:[%s2855_s6 + $0x70] sm:$0xff]  ;;  %v397_v2 = vld [vmem:[%s2839_s30 + $0xe8] sm:$0xff]  ;;  %272 = vst.msk [vmem:[%s3052_s9] sm:$0xff] %vm271_vm0, %v2751_v51 }
  0x2a   : > { %v2952_v3 = vld [vmem:[%s2855_s6 + $0x78] sm:$0xff]  ;;  %v1672_v4 = vmul.f32 %v2947_v0, %v2947_v0  ;;  %v2443_v6 = vpack.c.bf16 %v379_v63, %v378_v62  ;;  %v2445_v7 = vpack.c.bf16 %v397_v2, %v396_v1  ;;  %v380_v9 = vld [vmem:[%s2839_s30 + $0x60] sm:$0xff]  ;;  %v381_v10 = vld [vmem:[%s2839_s30 + $0x68] sm:$0xff]  ;;  %273 = vst.msk [vmem:[%s3052_s9 + $0x8] sm:$0xff] %vm271_vm0, %v2751_v51 }
  0x2b   : > { %1698 = vadd.xlane.f32.xlu1 %v1662_v32  ;;  %1700 = vadd.xlane.f32.xlu0 %v1663_v33  ;;  %v1673_v5 = vmul.f32 %v2952_v3, %v2952_v3  ;;  %v398_v11 = vld [vmem:[%s2839_s30 + $0xf0] sm:$0xff]  ;;  %v399_v12 = vld [vmem:[%s2839_s30 + $0xf8] sm:$0xff]  ;;  %v2447_v13 = vpack.c.bf16 %v381_v10, %v380_v9  ;;  %v353_v21 = vld [vmem:[%s2855_s6 + $0x88] sm:$0xff]  ;;  %274 = vst.msk [vmem:[%s3052_s9 + $0x10] sm:$0xff] %vm271_vm0, %v2751_v51 }
  0x2c   : > { %v2449_v14 = vpack.c.bf16 %v399_v12, %v398_v11  ;;  %v382_v18 = vld [vmem:[%s2839_s30 + $0x70] sm:$0xff]  ;;  %v383_v19 = vld [vmem:[%s2839_s30 + $0x78] sm:$0xff]  ;;  %v361_v26 = vld [vmem:[%s2855_s6 + $0xc8] sm:$0xff]  ;;  %275 = vst.msk [vmem:[%s3052_s9 + $0x18] sm:$0xff] %vm271_vm0, %v2751_v51  ;;  %s2675_s30 = sshll.u32 %s2753_s29, 4  ;;  %s2676_s30 = int_to_ptr.vmem [resolvable:$false] %s2675_s30 }
  0x2d   : > { %v2451_v20 = vpack.c.bf16 %v383_v19, %v382_v18  ;;  %v354_v23 = vld [vmem:[%s2855_s6 + $0x90] sm:$0xff]  ;;  %v355_v24 = vld [vmem:[%s2855_s6 + $0x98] sm:$0xff]  ;;  %276 = vst.msk [vmem:[%s3052_s9 + $0x20] sm:$0xff] %vm271_vm0, %v2751_v51  ;;  %277 = vst.msk [vmem:[%s3052_s9 + $0x28] sm:$0xff] %vm271_vm0, %v2751_v51  ;;  %s2677_s4 = scalar_lea.vmem %s2676_s30, 8192  ;;  %p2678_p1 = scmp.lt.s32.totalorder %s4960_s21, %s2676_s30 }
  0x2e   : > { %v362_v27 = vld [vmem:[%s2855_s6 + $0xd0] sm:$0xff]  ;;  %v367_v32 = vld [vmem:[%s2855_s6 + $0xf8] sm:$0xff]  ;;  %278 = vst.msk [vmem:[%s3052_s9 + $0x30] sm:$0xff] %vm271_vm0, %v2751_v51  ;;  %279 = vst.msk [vmem:[%s3052_s9 + $0x38] sm:$0xff] %vm271_vm0, %v2751_v51  ;;  %p2679_p2 = scmp.lt.s32.totalorder %s2677_s4, %s2671_s28 }
  0x2f   : > { %1702 = vadd.xlane.f32.xlu1 %v1664_v40  ;;  %1704 = vadd.xlane.f32.xlu0 %v1665_v41  ;;  %280 = vst.msk [vmem:[%s3052_s9 + $0x40] sm:$0xff] %vm271_vm0, %v2751_v51  ;;  %281 = vst.msk [vmem:[%s3052_s9 + $0x48] sm:$0xff] %vm271_vm0, %v2751_v51 }
  0x30   : > { %2432 = vmatpush3.bf16.xpose.msra.mxu0 %v2431_v28  ;;  %2463 = vmatpush3.bf16.xpose.msra.mxu1 %v2431_v28  ;;  %v363_v28 = vld [vmem:[%s2855_s6 + $0xd8] sm:$0xff]  ;;  %282 = vst.msk [vmem:[%s3052_s9 + $0x50] sm:$0xff] %vm271_vm0, %v2751_v51  ;;  %283 = vst.msk [vmem:[%s3052_s9 + $0x58] sm:$0xff] %vm271_vm0, %v2751_v51  ;;  %p2680_p3 = por %p2679_p2, %p2678_p1 }
  0x31   : > { %2434 = vmatprep.subr.bf16.mxu0 %v2433_v29  ;;  %2456 = vmatprep.subr.bf16.mxu1 %v2433_v29  ;;  %v364_v29 = vld [vmem:[%s2855_s6 + $0xe0] sm:$0xff]  ;;  %284 = vst.msk [vmem:[%s3052_s9 + $0x60] sm:$0xff] %vm271_vm0, %v2751_v51  ;;  %285 = vst.msk [vmem:[%s3052_s9 + $0x68] sm:$0xff] %vm271_vm0, %v2751_v51 }
  0x32   : > { %286 = vst.msk [vmem:[%s3052_s9 + $0x70] sm:$0xff] %vm271_vm0, %v2751_v51  ;;  %287 = vst.msk [vmem:[%s3052_s9 + $0x78] sm:$0xff] %vm271_vm0, %v2751_v51  ;;  %p2681_p5 = pnand %p2680_p3, %p2674_p0 }
  0x33   : > { %1706 = vadd.xlane.f32.xlu1 %v1666_v46  ;;  %1708 = vadd.xlane.f32.xlu0 %v1667_v47  ;;  %288 = vst.msk [vmem:[%s3052_s9 + $0x80] sm:$0xff] %vm271_vm0, %v2751_v51  ;;  %289 = vst.msk [vmem:[%s3052_s9 + $0x88] sm:$0xff] %vm271_vm0, %v2751_v51 }
  0x34   : > { %290 = vst.msk [vmem:[%s3052_s9 + $0x90] sm:$0xff] %vm271_vm0, %v2751_v51  ;;  %291 = vst.msk [vmem:[%s3052_s9 + $0x98] sm:$0xff] %vm271_vm0, %v2751_v51 }
  0x35   : > { %292 = vst.msk [vmem:[%s3052_s9 + $0xa0] sm:$0xff] %vm271_vm0, %v2751_v51  ;;  %293 = vst.msk [vmem:[%s3052_s9 + $0xa8] sm:$0xff] %vm271_vm0, %v2751_v51 }
  0x36   : > { %294 = vst.msk [vmem:[%s3052_s9 + $0xb0] sm:$0xff] %vm271_vm0, %v2751_v51  ;;  %295 = vst.msk [vmem:[%s3052_s9 + $0xb8] sm:$0xff] %vm271_vm0, %v2751_v51 }
  0x37   : > { %1710 = vadd.xlane.f32.xlu1 %v1668_v54  ;;  %1712 = vadd.xlane.f32.xlu0 %v1669_v55  ;;  %296 = vst.msk [vmem:[%s3052_s9 + $0xc0] sm:$0xff] %vm271_vm0, %v2751_v51  ;;  %297 = vst.msk [vmem:[%s3052_s9 + $0xc8] sm:$0xff] %vm271_vm0, %v2751_v51 }
  0x38   : > { %2436 = vmatpush3.bf16.xpose.msra.mxu0 %v2435_v42  ;;  %2464 = vmatpush3.bf16.xpose.msra.mxu1 %v2435_v42  ;;  %298 = vst.msk [vmem:[%s3052_s9 + $0xd0] sm:$0xff] %vm271_vm0, %v2751_v51  ;;  %299 = vst.msk [vmem:[%s3052_s9 + $0xd8] sm:$0xff] %vm271_vm0, %v2751_v51 }
  0x39   : > { %2438 = vmatprep.subr.bf16.mxu0 %v2437_v43  ;;  %2457 = vmatprep.subr.bf16.mxu1 %v2437_v43  ;;  %300 = vst.msk [vmem:[%s3052_s9 + $0xe0] sm:$0xff] %vm271_vm0, %v2751_v51  ;;  %301 = vst.msk [vmem:[%s3052_s9 + $0xe8] sm:$0xff] %vm271_vm0, %v2751_v51 }
  0x3a   : > { %302 = vst.msk [vmem:[%s3052_s9 + $0xf0] sm:$0xff] %vm271_vm0, %v2751_v51  ;;  %303 = vst.msk [vmem:[%s3052_s9 + $0xf8] sm:$0xff] %vm271_vm0, %v2751_v51 }
  0x3b   : > { %1714 = vadd.xlane.f32.xlu1 %v1670_v60  ;;  %1716 = vadd.xlane.f32.xlu0 %v1671_v61 }
  0x3f   : > { %1718 = vadd.xlane.f32.xlu1 %v1672_v4  ;;  %1720 = vadd.xlane.f32.xlu0 %v1673_v5 }
  0x40   : > { %2440 = vmatpush3.bf16.xpose.msra.mxu0 %v2439_v56  ;;  %2465 = vmatpush3.bf16.xpose.msra.mxu1 %v2439_v56 }
  0x41   : > { %2442 = vmatprep.subr.bf16.mxu0 %v2441_v57  ;;  %2458 = vmatprep.subr.bf16.mxu1 %v2441_v57 }
  0x43   : > { %1722 = vadd.xlane.f32.xlu1 %v1674_v8 }
  0x48   : > { %2444 = vmatpush3.bf16.xpose.msra.mxu0 %v2443_v6  ;;  %2466 = vmatpush3.bf16.xpose.msra.mxu1 %v2443_v6 }
  0x49   : > { %2446 = vmatprep.subr.bf16.mxu0 %v2445_v7  ;;  %2459 = vmatprep.subr.bf16.mxu1 %v2445_v7 }
  0x50   : > { %2448 = vmatpush3.bf16.xpose.msra.mxu0 %v2447_v13  ;;  %2467 = vmatpush3.bf16.xpose.msra.mxu1 %v2447_v13 }
  0x51   : > { %2450 = vmatprep.subr.bf16.mxu0 %v2449_v14  ;;  %2460 = vmatprep.subr.bf16.mxu1 %v2449_v14 }
  0x58   : > { %2452 = vmatpush3.bf16.xpose.msra.mxu0 %v2451_v20  ;;  %2468 = vmatpush3.bf16.xpose.msra.mxu1 %v2451_v20 }
  0x5f   : > { %2358 = vmatmul.mubr.f32.vlgmr.msra.gmra.mrb[0].mxu0 %v2858_v15  ;;  %2390 = vmatmul.mubr.f32.vlgmr.msra.gmra.mrb[0].mxu1 %v2862_v16  ;;  %v356_v15 = vld [vmem:[%s2855_s6 + $0xa0] sm:$0xff]  ;;  %v357_v16 = vld [vmem:[%s2855_s6 + $0xa8] sm:$0xff] }
  0x60   : > { %2359 = vmatprep.mubr.f32.mxu0 %v2865_v17  ;;  %2391 = vmatprep.mubr.f32.mxu1 %v353_v21 }
  0x63   : > { %2360 = vmatmul.mubr.f32.gmra.mrb[2].mxu0 %v2865_v17  ;;  %2392 = vmatmul.mubr.f32.gmra.mrb[2].mxu1 %v353_v21  ;;  %v358_v17 = vld [vmem:[%s2855_s6 + $0xb0] sm:$0xff] }
  0x64   : > { %2361 = vmatprep.mubr.f32.mxu0 %v2874_v22  ;;  %2393 = vmatprep.mubr.f32.mxu1 %v354_v23 }
  0x67   : > { %2362 = vmatmul.mubr.f32.gmra.mrb[4].mxu0 %v2874_v22  ;;  %2394 = vmatmul.mubr.f32.gmra.mrb[4].mxu1 %v354_v23  ;;  %v359_v22 = vld [vmem:[%s2855_s6 + $0xb8] sm:$0xff] }
  0x68   : > { %2363 = vmatprep.mubr.f32.mxu0 %v2880_v25  ;;  %2395 = vmatprep.mubr.f32.mxu1 %v355_v24 }
  0x6b   : > { %2364 = vmatmul.mubr.f32.gmra.mrb[6].mxu0 %v2880_v25  ;;  %2396 = vmatmul.mubr.f32.gmra.mrb[6].mxu1 %v355_v24  ;;  %v360_v25 = vld [vmem:[%s2855_s6 + $0xc0] sm:$0xff] }
  0x6c   : > { %2365 = vmatprep.mubr.f32.mxu0 %v2887_v30  ;;  %2397 = vmatprep.mubr.f32.mxu1 %v356_v15 }
  0x6f   : > { %2366 = vmatmul.mubr.f32.gmra.mrb[8].mxu0 %v2887_v30  ;;  %2398 = vmatmul.mubr.f32.gmra.mrb[8].mxu1 %v356_v15  ;;  %v365_v30 = vld [vmem:[%s2855_s6 + $0xe8] sm:$0xff] }
  0x70   : > { %2367 = vmatprep.mubr.f32.mxu0 %v2890_v31  ;;  %2399 = vmatprep.mubr.f32.mxu1 %v357_v16 }
  0x73   : > { %2368 = vmatmul.mubr.f32.gmra.mrb[10].mxu0 %v2890_v31  ;;  %2400 = vmatmul.mubr.f32.gmra.mrb[10].mxu1 %v357_v16  ;;  %v366_v31 = vld [vmem:[%s2855_s6 + $0xf0] sm:$0xff] }
  0x74   : > { %2369 = vmatprep.mubr.f32.mxu0 %v2899_v36  ;;  %2401 = vmatprep.mubr.f32.mxu1 %v358_v17 }
  0x77   : > { %2370 = vmatmul.mubr.f32.gmra.mrb[12].mxu0 %v2899_v36  ;;  %2402 = vmatmul.mubr.f32.gmra.mrb[12].mxu1 %v358_v17 }
  0x78   : > { %2371 = vmatprep.mubr.f32.mxu0 %v2904_v39  ;;  %2403 = vmatprep.mubr.f32.mxu1 %v359_v22 }
  0x7b   : > { %2372 = vmatmul.mubr.f32.gmra.mrb[14].mxu0 %v2904_v39  ;;  %2404 = vmatmul.mubr.f32.gmra.mrb[14].mxu1 %v359_v22 }
  0x7c   : > { %2373 = vmatprep.mubr.f32.mxu0 %v2911_v44  ;;  %2405 = vmatprep.mubr.f32.mxu1 %v360_v25 }
  0x7f   : > { %2374 = vmatmul.mubr.f32.gmra.mrb[16].mxu0 %v2911_v44  ;;  %2406 = vmatmul.mubr.f32.gmra.mrb[16].mxu1 %v360_v25 }
  0x80   : > { %2375 = vmatprep.mubr.f32.mxu0 %v2914_v45  ;;  %2407 = vmatprep.mubr.f32.mxu1 %v361_v26 }
  0x83   : > { %2376 = vmatmul.mubr.f32.gmra.mrb[18].mxu0 %v2914_v45  ;;  %2408 = vmatmul.mubr.f32.gmra.mrb[18].mxu1 %v361_v26 }
  0x84   : > { %2377 = vmatprep.mubr.f32.mxu0 %v2923_v50  ;;  %2409 = vmatprep.mubr.f32.mxu1 %v362_v27 }
  0x87   : > { %2378 = vmatmul.mubr.f32.gmra.mrb[20].mxu0 %v2923_v50  ;;  %2410 = vmatmul.mubr.f32.gmra.mrb[20].mxu1 %v362_v27 }
  0x88   : > { %2379 = vmatprep.mubr.f32.mxu0 %v2928_v53  ;;  %2411 = vmatprep.mubr.f32.mxu1 %v363_v28 }
  0x8b   : > { %2380 = vmatmul.mubr.f32.gmra.mrb[22].mxu0 %v2928_v53  ;;  %2412 = vmatmul.mubr.f32.gmra.mrb[22].mxu1 %v363_v28 }
  0x8c   : > { %2381 = vmatprep.mubr.f32.mxu0 %v2935_v58  ;;  %2413 = vmatprep.mubr.f32.mxu1 %v364_v29 }
  0x8f   : > { %2382 = vmatmul.mubr.f32.gmra.mrb[24].mxu0 %v2935_v58  ;;  %2414 = vmatmul.mubr.f32.gmra.mrb[24].mxu1 %v364_v29 }
  0x90   : > { %2383 = vmatprep.mubr.f32.mxu0 %v2938_v59  ;;  %2415 = vmatprep.mubr.f32.mxu1 %v365_v30 }
  0x93   : > { %2384 = vmatmul.mubr.f32.gmra.mrb[26].mxu0 %v2938_v59  ;;  %2416 = vmatmul.mubr.f32.gmra.mrb[26].mxu1 %v365_v30 }
  0x94   : > { %2385 = vmatprep.mubr.f32.mxu0 %v2947_v0  ;;  %2417 = vmatprep.mubr.f32.mxu1 %v366_v31 }
  0x97   : > { %2386 = vmatmul.mubr.f32.gmra.mrb[28].mxu0 %v2947_v0  ;;  %2418 = vmatmul.mubr.f32.gmra.mrb[28].mxu1 %v366_v31 }
  0x98   : > { %2387 = vmatprep.mubr.f32.mxu0 %v2952_v3  ;;  %2419 = vmatprep.mubr.f32.mxu1 %v367_v32 }
  0x9b   : > { %2388 = vmatmul.mubr.f32.gmra.mrb[30].mxu0 %v2952_v3  ;;  %2420 = vmatmul.mubr.f32.gmra.mrb[30].mxu1 %v367_v32 }
 0x132   : > { %v3013_v33 = vpop.f32.mrb[0].mxu0  ;;  %v3015_v34 = vpop.f32.mrb[0].mxu1 }
 0x133   : > { %v3017_v35 = vpop.f32.mrb[1].mxu0  ;;  %v3019_v36 = vpop.f32.mrb[1].mxu1 }
 0x134   : > { %v660_v37 = vmax.f32 %v3013_v33, %v3017_v35  ;;  %v708_v38 = vmax.f32 %v3015_v34, %v3019_v36 }
 0x136   : > { %v3025_v39 = vpop.f32.mrb[2].mxu1  ;;  %661 = vmax.xlane.f32.xlu0 %v660_v37  ;;  %v3027_v40 = vpop.f32.mrb[2].mxu0 }
 0x137   : > { %v3029_v41 = vpop.f32.mrb[3].mxu0  ;;  %v3031_v42 = vpop.f32.mrb[3].mxu1 }
 0x138   : > { %v711_v43 = vmax.f32 %v3025_v39, %v3031_v42  ;;  %v663_v44 = vmax.f32 %v3027_v40, %v3029_v41 }
 0x13a   : > { %712 = vmax.xlane.f32.xlu1 %v711_v43  ;;  %709 = vmax.xlane.f32.xlu0 %v708_v38  ;;  %v3038_v45 = vpop.f32.mrb[4].mxu0  ;;  %v3040_v46 = vpop.f32.mrb[4].mxu1 }
 0x13b   : > { %v3044_v47 = vpop.f32.mrb[5].mxu0  ;;  %v3046_v48 = vpop.f32.mrb[5].mxu1 }
 0x13c   : > { %v666_v49 = vmax.f32 %v3038_v45, %v3044_v47  ;;  %v714_v50 = vmax.f32 %v3040_v46, %v3046_v48 }
 0x13e   : > { %664 = vmax.xlane.f32.xlu0 %v663_v44  ;;  %667 = vmax.xlane.f32.xlu1 %v666_v49  ;;  %v3118_v52 = vpop.f32.mrb[6].mxu0  ;;  %v3120_v53 = vpop.f32.mrb[6].mxu1 }
 0x13f   : > { %v3122_v54 = vpop.f32.mrb[7].mxu0  ;;  %v3124_v55 = vpop.f32.mrb[7].mxu1 }
 0x140   : > { %v669_v56 = vmax.f32 %v3118_v52, %v3122_v54  ;;  %v717_v57 = vmax.f32 %v3120_v53, %v3124_v55 }
 0x142   : > { %715 = vmax.xlane.f32.xlu0 %v714_v50  ;;  %670 = vmax.xlane.f32.xlu1 %v669_v56  ;;  %v3130_v58 = vpop.f32.mrb[8].mxu0  ;;  %v3132_v59 = vpop.f32.mrb[8].mxu1 }
 0x143   : > { %v3134_v60 = vpop.f32.mrb[9].mxu0  ;;  %v3136_v61 = vpop.f32.mrb[9].mxu1 }
 0x144   : > { %v672_v62 = vmax.f32 %v3130_v58, %v3134_v60  ;;  %v720_v63 = vmax.f32 %v3132_v59, %v3136_v61 }
 0x146   : > { %718 = vmax.xlane.f32.xlu1 %v717_v57  ;;  %673 = vmax.xlane.f32.xlu0 %v672_v62  ;;  %v3142_v0 = vpop.f32.mrb[10].mxu0  ;;  %v3144_v1 = vpop.f32.mrb[10].mxu1 }
 0x147   : > { %v3146_v2 = vpop.f32.mrb[11].mxu0  ;;  %v3148_v3 = vpop.f32.mrb[11].mxu1 }
 0x148   : > { %v675_v4 = vmax.f32 %v3142_v0, %v3146_v2  ;;  %v723_v5 = vmax.f32 %v3144_v1, %v3148_v3 }
 0x14a   : > { %721 = vmax.xlane.f32.xlu0 %v720_v63  ;;  %676 = vmax.xlane.f32.xlu1 %v675_v4  ;;  %v3154_v6 = vpop.f32.mrb[12].mxu0  ;;  %v3156_v7 = vpop.f32.mrb[12].mxu1 }
 0x14b   : > { %v3158_v8 = vpop.f32.mrb[13].mxu0  ;;  %v3160_v9 = vpop.f32.mrb[13].mxu1 }
 0x14c   : > { %v678_v10 = vmax.f32 %v3154_v6, %v3158_v8  ;;  %v726_v11 = vmax.f32 %v3156_v7, %v3160_v9 }
 0x14e   : > { %724 = vmax.xlane.f32.xlu1 %v723_v5  ;;  %679 = vmax.xlane.f32.xlu0 %v678_v10  ;;  %v3166_v12 = vpop.f32.mrb[14].mxu0  ;;  %v3168_v13 = vpop.f32.mrb[14].mxu1 }
 0x14f   : > { %5398 = vst [vmem:[#allocation5_spill] sm:$0xff] %v3166_v12  ;;  %v3170_v14 = vpop.f32.mrb[15].mxu0  ;;  %v3172_v18 = vpop.f32.mrb[15].mxu1 }
 0x150   : > { %5399 = vst [vmem:[#allocation6_spill] sm:$0xff] %v3170_v14  ;;  %v681_v19 = vmax.f32 %v3166_v12, %v3170_v14  ;;  %v729_v20 = vmax.f32 %v3168_v13, %v3172_v18 }
 0x152   : > { %727 = vmax.xlane.f32.xlu0 %v726_v11  ;;  %682 = vmax.xlane.f32.xlu1 %v681_v19  ;;  %v3178_v21 = vpop.f32.mrb[16].mxu0  ;;  %v3180_v23 = vpop.f32.mrb[16].mxu1 }
 0x153   : > { %5400 = vst [vmem:[#allocation7_spill] sm:$0xff] %v3178_v21  ;;  %5401 = vst [vmem:[#allocation8_spill] sm:$0xff] %v3180_v23  ;;  %v3182_v24 = vpop.f32.mrb[17].mxu0  ;;  %v3184_v15 = vpop.f32.mrb[17].mxu1 }
 0x154   : > { %5402 = vst [vmem:[#allocation9_spill] sm:$0xff] %v3182_v24  ;;  %5403 = vst [vmem:[#allocation10_spill] sm:$0xff] %v3184_v15  ;;  %v684_v16 = vmax.f32 %v3178_v21, %v3182_v24  ;;  %v732_v17 = vmax.f32 %v3180_v23, %v3184_v15 }
 0x156   : > { %730 = vmax.xlane.f32.xlu1 %v729_v20  ;;  %685 = vmax.xlane.f32.xlu0 %v684_v16  ;;  %v3190_v22 = vpop.f32.mrb[18].mxu0  ;;  %v3192_v25 = vpop.f32.mrb[18].mxu1 }
 0x157   : > { %5404 = vst [vmem:[#allocation11_spill] sm:$0xff] %v3190_v22  ;;  %5405 = vst [vmem:[#allocation12_spill] sm:$0xff] %v3192_v25  ;;  %v3194_v26 = vpop.f32.mrb[19].mxu0  ;;  %v3196_v27 = vpop.f32.mrb[19].mxu1 }
 0x158   : > { %5406 = vst [vmem:[#allocation13_spill] sm:$0xff] %v3194_v26  ;;  %5407 = vst [vmem:[#allocation14_spill] sm:$0xff] %v3196_v27  ;;  %v687_v28 = vmax.f32 %v3190_v22, %v3194_v26  ;;  %v735_v29 = vmax.f32 %v3192_v25, %v3196_v27 }
 0x15a   : > { %733 = vmax.xlane.f32.xlu0 %v732_v17  ;;  %688 = vmax.xlane.f32.xlu1 %v687_v28  ;;  %v3202_v30 = vpop.f32.mrb[20].mxu0  ;;  %v3204_v31 = vpop.f32.mrb[20].mxu1 }
 0x15b   : > { %5408 = vst [vmem:[#allocation15_spill] sm:$0xff] %v3202_v30  ;;  %5409 = vst [vmem:[#allocation16_spill] sm:$0xff] %v3204_v31  ;;  %v3206_v32 = vpop.f32.mrb[21].mxu0  ;;  %v3208_v37 = vpop.f32.mrb[21].mxu1 }
 0x15c   : > { %5410 = vst [vmem:[#allocation17_spill] sm:$0xff] %v3206_v32  ;;  %5411 = vst [vmem:[#allocation18_spill] sm:$0xff] %v3208_v37  ;;  %v690_v38 = vmax.f32 %v3202_v30, %v3206_v32  ;;  %v738_v43 = vmax.f32 %v3204_v31, %v3208_v37 }
 0x15e   : > { %736 = vmax.xlane.f32.xlu1 %v735_v29  ;;  %691 = vmax.xlane.f32.xlu0 %v690_v38  ;;  %v3214_v44 = vpop.f32.mrb[22].mxu0  ;;  %v3216_v49 = vpop.f32.mrb[22].mxu1 }
 0x15f   : > { %5412 = vst [vmem:[#allocation19_spill] sm:$0xff] %v3214_v44  ;;  %5413 = vst [vmem:[#allocation20_spill] sm:$0xff] %v3216_v49  ;;  %v3218_v50 = vpop.f32.mrb[23].mxu0  ;;  %v3220_v51 = vpop.f32.mrb[23].mxu1 }
 0x160   : > { %5414 = vst [vmem:[#allocation21_spill] sm:$0xff] %v3218_v50  ;;  %5415 = vst [vmem:[#allocation22_spill] sm:$0xff] %v3220_v51  ;;  %v693_v56 = vmax.f32 %v3214_v44, %v3218_v50  ;;  %v741_v57 = vmax.f32 %v3216_v49, %v3220_v51 }
 0x162   : > { %739 = vmax.xlane.f32.xlu0 %v738_v43  ;;  %694 = vmax.xlane.f32.xlu1 %v693_v56  ;;  %v3226_v62 = vpop.f32.mrb[24].mxu0  ;;  %v3228_v63 = vpop.f32.mrb[24].mxu1 }
 0x163   : > { %5416 = vst [vmem:[#allocation23_spill] sm:$0xff] %v3226_v62  ;;  %5417 = vst [vmem:[#allocation24_spill] sm:$0xff] %v3228_v63  ;;  %v3230_v4 = vpop.f32.mrb[25].mxu0  ;;  %v3232_v5 = vpop.f32.mrb[25].mxu1 }
 0x164   : > { %5418 = vst [vmem:[#allocation25_spill] sm:$0xff] %v3230_v4  ;;  %5419 = vst [vmem:[#allocation26_spill] sm:$0xff] %v3232_v5  ;;  %v696_v10 = vmax.f32 %v3226_v62, %v3230_v4  ;;  %v744_v11 = vmax.f32 %v3228_v63, %v3232_v5 }
 0x166   : > { %742 = vmax.xlane.f32.xlu1 %v741_v57  ;;  %697 = vmax.xlane.f32.xlu0 %v696_v10  ;;  %v3238_v19 = vpop.f32.mrb[26].mxu0  ;;  %v3240_v20 = vpop.f32.mrb[26].mxu1 }
 0x167   : > { %5420 = vst [vmem:[#allocation27_spill] sm:$0xff] %v3238_v19  ;;  %5421 = vst [vmem:[#allocation28_spill] sm:$0xff] %v3240_v20  ;;  %v3242_v16 = vpop.f32.mrb[27].mxu0  ;;  %v3244_v17 = vpop.f32.mrb[27].mxu1 }
 0x168   : > { %5422 = vst [vmem:[#allocation29_spill] sm:$0xff] %v3242_v16  ;;  %5423 = vst [vmem:[#allocation30_spill] sm:$0xff] %v3244_v17  ;;  %v699_v28 = vmax.f32 %v3238_v19, %v3242_v16  ;;  %v747_v29 = vmax.f32 %v3240_v20, %v3244_v17 }
 0x16a   : > { %745 = vmax.xlane.f32.xlu0 %v744_v11  ;;  %700 = vmax.xlane.f32.xlu1 %v699_v28  ;;  %v3250_v38 = vpop.f32.mrb[28].mxu0  ;;  %v3252_v43 = vpop.f32.mrb[28].mxu1 }
 0x16b   : > { %5424 = vst [vmem:[#allocation31_spill] sm:$0xff] %v3250_v38  ;;  %5425 = vst [vmem:[#allocation32_spill] sm:$0xff] %v3252_v43  ;;  %v3254_v56 = vpop.f32.mrb[29].mxu0  ;;  %v3256_v57 = vpop.f32.mrb[29].mxu1 }
 0x16c   : > { %5426 = vst [vmem:[#allocation33_spill] sm:$0xff] %v3254_v56  ;;  %5427 = vst [vmem:[#allocation34_spill] sm:$0xff] %v3256_v57  ;;  %v702_v10 = vmax.f32 %v3250_v38, %v3254_v56  ;;  %v750_v5 = vmax.f32 %v3252_v43, %v3256_v57  ;;  %v1691_v57 = vpop.xlane.xlu1 %1690  ;;  %v1693_v38 = vpop.xlane.xlu0 %1692 }
 0x16d   : > { %2528 = vrsqrt.f32 %v1691_v57  ;;  %vm1756_vm1 = vcmp.eq.f32.partialorder %v1691_v57, inf  ;;  %vm1763_vm2 = vcmp.eq.f32.partialorder %v1693_v38, inf  ;;  %v1759_v32 = vand.u32 2147483648, %v1691_v57 }
 0x16e   : > { %748 = vmax.xlane.f32.xlu1 %v747_v29  ;;  %703 = vmax.xlane.f32.xlu0 %v702_v10  ;;  %v3262_v63 = vpop.f32.mrb[30].mxu0  ;;  %v3264_v11 = vpop.f32.mrb[30].mxu1  ;;  %2530 = vrsqrt.f32 %v1693_v38  ;;  %vm1758_vm3 = vcmp.eq.f32.partialorder %v1691_v57, 0.0  ;;  %v1766_v51 = vand.u32 2147483648, %v1693_v38  ;;  %vm1765_vm4 = vcmp.eq.f32.partialorder %v1693_v38, 0.0 }
 0x16f   : > { %5428 = vst [vmem:[#allocation35_spill] sm:$0xff] %v3262_v63  ;;  %5429 = vst [vmem:[#allocation36_spill] sm:$0xff] %v3264_v11  ;;  %v3266_v28 = vpop.f32.mrb[31].mxu0  ;;  %v3268_v4 = vpop.f32.mrb[31].mxu1 }
 0x170   : > { %5430 = vst [vmem:[#allocation37_spill] sm:$0xff] %v3266_v28  ;;  %5431 = vst [vmem:[#allocation38_spill] sm:$0xff] %v3268_v4  ;;  %v705_v17 = vmax.f32 %v3262_v63, %v3266_v28  ;;  %v753_v20 = vmax.f32 %v3264_v11, %v3268_v4  ;;  %v3274_v29 = vpop.xlane.xlu1 %1694  ;;  %v3284_v37 = vpop.xlane.xlu0 %1696 }
 0x171   : > { %2532 = vrsqrt.f32 %v3274_v29  ;;  %vm1770_vm5 = vcmp.eq.f32.partialorder %v3274_v29, inf  ;;  %vm1772_vm6 = vcmp.eq.f32.partialorder %v3274_v29, 0.0  ;;  %v1773_v49 = vand.u32 2147483648, %v3274_v29 }
 0x172   : > { %751 = vmax.xlane.f32.xlu0 %v750_v5  ;;  %706 = vmax.xlane.f32.xlu1 %v705_v17  ;;  %2534 = vrsqrt.f32 %v3284_v37  ;;  %vm1777_vm7 = vcmp.eq.f32.partialorder %v3284_v37, inf  ;;  %vm1779_vm8 = vcmp.eq.f32.partialorder %v3284_v37, 0.0 }
 0x174   : > { %v3276_v10 = vpop.xlane.xlu1 %1698  ;;  %v3288_v5 = vpop.xlane.xlu0 %1700 }
 0x175   : > { %2536 = vrsqrt.f32 %v3276_v10  ;;  %vm1784_vm9 = vcmp.eq.f32.partialorder %v3276_v10, inf  ;;  %vm1786_vm10 = vcmp.eq.f32.partialorder %v3276_v10, 0.0  ;;  %v1787_v50 = vand.u32 2147483648, %v3276_v10 }
 0x176   : > { %754 = vmax.xlane.f32.xlu1 %v753_v20  ;;  %2538 = vrsqrt.f32 %v3288_v5  ;;  %vm1791_vm11 = vcmp.eq.f32.partialorder %v3288_v5, inf  ;;  %vm1793_vm12 = vcmp.eq.f32.partialorder %v3288_v5, 0.0 }
 0x177   : > { %v2529_v17 = vpop.eup %2528 }
 0x178   : > { %v3278_v43 = vpop.xlane.xlu1 %1702  ;;  %v3296_v11 = vpop.xlane.xlu0 %1704  ;;  %v1755_v63 = vmul.f32 %v2529_v17, %v1691_v57 }
 0x179   : > { %v2531_v28 = vpop.eup %2530  ;;  %2540 = vrsqrt.f32 %v3278_v43  ;;  %vm1798_vm13 = vcmp.eq.f32.partialorder %v3278_v43, inf  ;;  %vm1800_vm14 = vcmp.eq.f32.partialorder %v3278_v43, 0.0  ;;  %vm1805_vm15 = vcmp.eq.f32.partialorder %v3296_v11, inf }
 0x17a   : > { %v1762_v16 = vmul.f32 %v2531_v28, %v1693_v38  ;;  %2542 = vrsqrt.f32 %v3296_v11  ;;  %v1757_v22 = vsel %vm1756_vm1, %v1691_v57, %v1755_v63  ;;  %vm1807_vm1 = vcmp.eq.f32.partialorder %v3296_v11, 0.0 }
 0x17b   : > { %v2533_v31 = vpop.eup %2532  ;;  %v1760_v24 = vsel %vm1758_vm3, %v1759_v32, %v1757_v22 }
 0x17c   : > { %v3280_v56 = vpop.xlane.xlu1 %1706  ;;  %v3303_v30 = vpop.xlane.xlu0 %1708  ;;  %v1769_v28 = vmul.f32 %v2533_v31, %v3274_v29  ;;  %v1764_v15 = vsel %vm1763_vm2, %v1693_v38, %v1762_v16  ;;  %v1780_v38 = vand.u32 2147483648, %v3284_v37 }
 0x17d   : > { %2544 = vrsqrt.f32 %v3280_v56  ;;  %v2535_v26 = vpop.eup %2534  ;;  %v1767_v16 = vsel %vm1765_vm4, %v1766_v51, %v1764_v15  ;;  %vm1812_vm2 = vcmp.eq.f32.partialorder %v3280_v56, inf  ;;  %vm1814_vm3 = vcmp.eq.f32.partialorder %v3280_v56, 0.0 }
 0x17e   : > { %v1776_v63 = vmul.f32 %v2535_v26, %v3284_v37  ;;  %v1771_v57 = vsel %vm1770_vm5, %v3274_v29, %v1769_v28  ;;  %v2010_v26 = vmax.f32 %v1760_v24, 1e-12  ;;  %v2011_v15 = vmax.f32 %v1767_v16, 1e-12 }
 0x17f   : > { %v2537_v17 = vpop.eup %2536  ;;  %v1794_v28 = vand.u32 2147483648, %v3288_v5  ;;  %v1774_v44 = vsel %vm1772_vm6, %v1773_v49, %v1771_v57  ;;  %v1801_v24 = vand.u32 2147483648, %v3278_v43  ;;  %vm1819_vm4 = vcmp.eq.f32.partialorder %v3303_v30, inf }
 0x180   : > { %v3282_v62 = vpop.xlane.xlu1 %1710  ;;  %v2539_v23 = vpop.eup %2538  ;;  %v1783_v31 = vmul.f32 %v2537_v17, %v3276_v10  ;;  %v1778_v51 = vsel %vm1777_vm7, %v3284_v37, %v1776_v63  ;;  %v1808_v63 = vand.u32 2147483648, %v3296_v11  ;;  %v1815_v37 = vand.u32 2147483648, %v3280_v56 }
 0x181   : > { %v1790_v32 = vmul.f32 %v2539_v23, %v3288_v5  ;;  %v3340_v14 = vpop.xlane.xlu0 %1712  ;;  %v1781_v29 = vsel %vm1779_vm8, %v1780_v38, %v1778_v51  ;;  %vm1826_vm6 = vcmp.eq.f32.partialorder %v3282_v62, inf  ;;  %vm1821_vm8 = vcmp.eq.f32.partialorder %v3303_v30, 0.0 }
 0x182   : > { %v1785_v23 = vsel %vm1784_vm9, %v3276_v10, %v1783_v31  ;;  %vm1828_vm9 = vcmp.eq.f32.partialorder %v3282_v62, 0.0 }
 0x183   : > { %v2541_v22 = vpop.eup %2540  ;;  %v1792_v31 = vsel %vm1791_vm11, %v3288_v5, %v1790_v32  ;;  %v1788_v12 = vsel %vm1786_vm10, %v1787_v50, %v1785_v23  ;;  %v657_v5 = vlaneseq }
 0x184   : > { %v3286_v4 = vpop.xlane.xlu1 %1714  ;;  %v2543_v17 = vpop.eup %2542  ;;  %v1797_v21 = vmul.f32 %v2541_v22, %v3278_v43  ;;  %v2012_v22 = vmax.f32 %v1774_v44, 1e-12  ;;  %v2013_v44 = vmax.f32 %v1781_v29, 1e-12  ;;  %v1795_v50 = vsel %vm1793_vm12, %v1794_v28, %v1792_v31 }
 0x185   : > { %v1804_v57 = vmul.f32 %v2543_v17, %v3296_v11  ;;  %v2015_v28 = vmax.f32 %v1795_v50, 1e-12  ;;  %vm1840_vm10 = vcmp.eq.f32.partialorder %v3286_v4, inf  ;;  %vm1842_vm11 = vcmp.eq.f32.partialorder %v3286_v4, 0.0 }
 0x186   : > { %v1799_v38 = vsel %vm1798_vm13, %v3278_v43, %v1797_v21  ;;  %v1822_v43 = vand.u32 2147483648, %v3303_v30 }
 0x187   : > { %v2545_v16 = vpop.eup %2544  ;;  %v1806_v32 = vsel %vm1805_vm15, %v3296_v11, %v1804_v57 }
 0x188   : > { %v3293_v20 = vpop.xlane.xlu1 %1718  ;;  %v1811_v25 = vmul.f32 %v2545_v16, %v3280_v56  ;;  %v1809_v16 = vsel %vm1807_vm1, %v1808_v63, %v1806_v32  ;;  %v3388_v63 = vand.u32 127, %v657_v5 }
 0x18a   : > { %v1813_v51 = vsel %vm1812_vm2, %v3280_v56, %v1811_v25  ;;  %v3411_v32 = vadd.s32 128, %v3388_v63 }
 0x18b   : > { %v1816_v25 = vsel %vm1814_vm3, %v1815_v37, %v1813_v51 }
 0x18c   : > { %v3300_v19 = vpop.xlane.xlu1 %1722 }
 0x18d   : > { %2546 = vrsqrt.f32 %v3300_v19  ;;  %vm1868_vm5 = vcmp.eq.f32.partialorder %v3300_v19, inf  ;;  %v1871_v23 = vand.u32 2147483648, %v3300_v19  ;;  %vm1870_vm7 = vcmp.eq.f32.partialorder %v3300_v19, 0.0 }
 0x18e   : > { %2548 = vrsqrt.f32 %v3303_v30 }
 0x18f   : > { %2550 = vrsqrt.f32 %v3282_v62 }
 0x190   : > { %2552 = vrcp.f32 %v2010_v26  ;;  %v2014_v26 = vmax.f32 %v1788_v12, 1e-12  ;;  %v1802_v12 = vsel %vm1800_vm14, %v1801_v24, %v1799_v38  ;;  %v2018_v38 = vmax.f32 %v1816_v25, 1e-12 }
 0x191   : > { %2554 = vrcp.f32 %v2011_v15  ;;  %v3368_v15 = vpop.xlane.xlu0 %1716  ;;  %v2016_v24 = vmax.f32 %v1802_v12, 1e-12 }
 0x192   : > { %2556 = vrsqrt.f32 %v3286_v4 }
 0x193   : > { %2558 = vrcp.f32 %v2012_v22  ;;  %v1829_v22 = vand.u32 2147483648, %v3282_v62 }
 0x194   : > { %2560 = vrcp.f32 %v2013_v44 }
 0x195   : > { %2562 = vrcp.f32 %v2014_v26  ;;  %v3398_v56 = vpop.xlane.xlu0 %1720  ;;  %v3408_v26 = vld [vmem:[%s3052_s9] sm:$0xff] }
 0x196   : > { %2564 = vrcp.f32 %v2015_v28  ;;  %5432 = vst [vmem:[#allocation39_spill] sm:$0xff] %v3408_v26 }
 0x197   : > { %v2547_v49 = vpop.eup %2546  ;;  %2566 = vrsqrt.f32 %v3340_v14 }
 0x198   : > { %v2549_v27 = vpop.eup %2548  ;;  %v1867_v10 = vmul.f32 %v2547_v49, %v3300_v19  ;;  %2568 = vrsqrt.f32 %v3293_v20 }
 0x199   : > { %v2551_v17 = vpop.eup %2550  ;;  %v1818_v21 = vmul.f32 %v2549_v27, %v3303_v30  ;;  %2570 = vrcp.f32 %v2016_v24 }
 0x19a   : > { %v1869_v49 = vsel %vm1868_vm5, %v3300_v19, %v1867_v10  ;;  %v1825_v27 = vmul.f32 %v2551_v17, %v3282_v62  ;;  %v3390_v29 = vpop.eup %2552  ;;  %v2017_v19 = vmax.f32 %v1809_v16, 1e-12  ;;  %v1843_v17 = vand.u32 2147483648, %v3286_v4 }
 0x19b   : > { %v1820_v11 = vsel %vm1819_vm4, %v3303_v30, %v1818_v21  ;;  %v1872_v31 = vsel %vm1870_vm7, %v1871_v23, %v1869_v49  ;;  %v3392_v57 = vpop.eup %2554  ;;  %v3440_v49 = vld [vmem:[%s3052_s9 + $0x88] sm:$0xff]  ;;  %v3546_v30 = vld [vmem:[%s3052_s9 + $0x18] sm:$0xff] }
 0x19c   : > { %v2557_v37 = vpop.eup %2556  ;;  %v1827_v44 = vsel %vm1826_vm6, %v3282_v62, %v1825_v27  ;;  %v1823_v50 = vsel %vm1821_vm8, %v1822_v43, %v1820_v11  ;;  %v2026_v10 = vmax.f32 %v1872_v31, 1e-12  ;;  %2572 = vrcp.f32 %v2017_v19  ;;  %5434 = vst [vmem:[#allocation41_spill] sm:$0xff] %v3440_v49  ;;  %v3443_v27 = vld [vmem:[%s3052_s9 + $0x80] sm:$0xff]  ;;  %5443 = vst [vmem:[#allocation50_spill] sm:$0xff] %v3546_v30 }
 0x19d   : > { %v3416_v5 = vpop.eup %2558  ;;  %v3420_v12 = vsel %vm1828_vm9, %v1829_v22, %v1827_v44  ;;  %v1839_v51 = vmul.f32 %v2557_v37, %v3286_v4  ;;  %v2019_v28 = vmax.f32 %v1823_v50, 1e-12  ;;  %2574 = vrsqrt.f32 %v3368_v15  ;;  %5435 = vst [vmem:[#allocation42_spill] sm:$0xff] %v3443_v27 }
 0x19e   : > { %2576 = vrcp.f32 %v2018_v38  ;;  %v3432_v62 = vpop.eup %2560 }
 0x19f   : > { %2578 = vrcp.f32 %v2026_v10  ;;  %v3447_v24 = vpop.eup %2562  ;;  %v1841_v11 = vsel %vm1840_vm10, %v3286_v4, %v1839_v51 }
 0x1a0   : > { %2580 = vrsqrt.f32 %v3398_v56  ;;  %v3464_v38 = vpop.eup %2564  ;;  %v3509_v25 = vsel %vm1842_vm11, %v1843_v17, %v1841_v11 }
 0x1a1   : > { %2582 = vrcp.f32 %v2019_v28  ;;  %v2567_v50 = vpop.eup %2566  ;;  %v3484_v28 = vld [vmem:[%s3052_s9 + $0x8] sm:$0xff] }
 0x1a2   : > { %5438 = vst [vmem:[#allocation45_spill] sm:$0xff] %v3484_v28  ;;  %v3529_v17 = vmul.f32 %v2567_v50, %v3340_v14 }
 0x1c3   : > { %v3424_v23 = vpop.xlane.xlu0 %661 }
 0x1c4   : > { %5433 = vst [vmem:[#allocation40_spill] sm:$0xff] %v3424_v23  ;;  %vm1462_vm12 = vcmp.gt.f32.partialorder %v3424_v23, %v3408_v26  ;;  %vm756_vm13 = vcmp.eq.f32.partialorder %v3013_v33, %v3424_v23  ;;  %vm757_vm14 = vcmp.eq.f32.partialorder %v3017_v35, %v3424_v23 }
 0x1c5   : > { %v1494_v16 = vsel %vm1462_vm12, %v3424_v23, %v3408_v26  ;;  %v820_v43 = vsel %vm756_vm13, %v3388_v63, 256  ;;  %v821_v33 = vsel %vm757_vm14, %v3411_v32, 256 }
 0x1c6   : > { %1527 = vst.msk [vmem:[%s3052_s9] sm:$0xff] %vm271_vm0, %v1494_v16  ;;  %vm884_vm15 = vcmp.lt.s32.totalorder %v820_v43, %v821_v33  ;;  %v3487_v16 = vld [vmem:[%s3052_s9 + $0x10] sm:$0xff] }
 0x1c7   : > { %v3458_v31 = vpop.xlane.xlu1 %712  ;;  %v3460_v22 = vpop.xlane.xlu0 %709  ;;  %v3462_v37 = vsel %vm884_vm15, %v820_v43, %v821_v33  ;;  %5439 = vst [vmem:[#allocation46_spill] sm:$0xff] %v3487_v16 }
 0x1c8   : > { %5436 = vst [vmem:[#allocation43_spill] sm:$0xff] %v3458_v31  ;;  %5437 = vst [vmem:[#allocation44_spill] sm:$0xff] %v3460_v22  ;;  %vm5310_vm1 = vcmp.gt.f32.partialorder %v3458_v31, %v3440_v49  ;;  %vm5378_vm2 = vcmp.gt.f32.partialorder %v3460_v22, %v3443_v27  ;;  %v887_v44 = vshra.s32 %v3462_v37, 16  ;;  %vm788_vm3 = vcmp.eq.f32.partialorder %v3015_v34, %v3460_v22  ;;  %v3492_v43 = vpop.eup %2568 }
 0x1c9   : > { %v1511_v10 = vsel %vm5310_vm1, %v3458_v31, %v3440_v49  ;;  %v1510_v51 = vsel %vm5378_vm2, %v3460_v22, %v3443_v27  ;;  %vm789_vm4 = vcmp.eq.f32.partialorder %v3019_v36, %v3460_v22  ;;  %v852_v34 = vsel %vm788_vm3, %v3388_v63, 256  ;;  %v3505_v36 = vpop.eup %2570 }
 0x1ca   : > { %1544 = vst.msk [vmem:[%s3052_s9 + $0x88] sm:$0xff] %vm271_vm0, %v1511_v10  ;;  %1543 = vst.msk [vmem:[%s3052_s9 + $0x80] sm:$0xff] %vm271_vm0, %v1510_v51  ;;  %v3498_v33 = vcvt.s32.f32 %v887_v44  ;;  %v853_v19 = vsel %vm789_vm4, %v3411_v32, 256  ;;  %vm790_vm5 = vcmp.eq.f32.partialorder %v3025_v39, %v3458_v31  ;;  %vm791_vm6 = vcmp.eq.f32.partialorder %v3031_v42, %v3458_v31  ;;  %v3517_v35 = vpop.eup %2572 }
 0x1cb   : > { %v3511_v10 = vpop.xlane.xlu0 %664  ;;  %v3513_v44 = vpop.xlane.xlu1 %667  ;;  %vm1140_vm7 = vcmp.lt.s32.totalorder %v852_v34, %v853_v19  ;;  %v854_v51 = vsel %vm790_vm5, %v3388_v63, 256  ;;  %v855_v39 = vsel %vm791_vm6, %v3411_v32, 256  ;;  %vm1833_vm6 = vcmp.eq.f32.partialorder %v3340_v14, inf }
 0x1cc   : > { %5440 = vst [vmem:[#allocation47_spill] sm:$0xff] %v3511_v10  ;;  %5441 = vst [vmem:[#allocation48_spill] sm:$0xff] %v3513_v44  ;;  %vm5375_vm8 = vcmp.gt.f32.partialorder %v3511_v10, %v3484_v28  ;;  %vm5308_vm9 = vcmp.gt.f32.partialorder %v3513_v44, %v3487_v16  ;;  %890 = vmin.xlane.f32.xlu0 %v3498_v33  ;;  %v3524_v42 = vsel %vm1140_vm7, %v852_v34, %v853_v19  ;;  %v3526_v4 = vpop.eup %2574  ;;  %v3543_v34 = vld [vmem:[%s3052_s9 + $0x90] sm:$0xff] }
 0x1cd   : > { %vm1156_vm10 = vcmp.lt.s32.totalorder %v854_v51, %v855_v39  ;;  %v1978_v11 = vld [vmem:[%s3052_s9] sm:$0xff]  ;;  %v1495_v21 = vsel %vm5375_vm8, %v3511_v10, %v3484_v28  ;;  %v1496_v19 = vsel %vm5308_vm9, %v3513_v44, %v3487_v16  ;;  %5442 = vst [vmem:[#allocation49_spill] sm:$0xff] %v3543_v34  ;;  %v1143_v50 = vshra.s32 %v3524_v42, 16  ;;  %v3549_v49 = vpop.eup %2576 }
 0x1ce   : > { %v2043_v31 = vmul.f32 %v3390_v29, %v1978_v11  ;;  %1528 = vst.msk [vmem:[%s3052_s9 + $0x8] sm:$0xff] %vm271_vm0, %v1495_v21  ;;  %1529 = vst.msk [vmem:[%s3052_s9 + $0x10] sm:$0xff] %vm271_vm0, %v1496_v19  ;;  %v3556_v28 = vsel %vm1156_vm10, %v854_v51, %v855_v39  ;;  %vm758_vm11 = vcmp.eq.f32.partialorder %v3027_v40, %v3511_v10  ;;  %v2579_v16 = vpop.eup %2578  ;;  %vm1861_vm1 = vcmp.eq.f32.partialorder %v3398_v56, inf }
 0x1cf   : > { %5444 = vst [vmem:[#allocation51_spill] sm:$0xff] %v3556_v28  ;;  %vm759_vm13 = vcmp.eq.f32.partialorder %v3029_v41, %v3511_v10  ;;  %v3562_v27 = vpop.xlane.xlu0 %715  ;;  %v3564_v22 = vpop.xlane.xlu1 %670  ;;  %v3566_v26 = vcvt.s32.f32 %v1143_v50  ;;  %v1159_v29 = vshra.s32 %v3556_v28, 16  ;;  %v822_v21 = vsel %vm758_vm11, %v3388_v63, 256  ;;  %v3601_v50 = vld [vmem:[%s3052_s9 + $0x20] sm:$0xff] }
 0x1d0   : > { %5445 = vst [vmem:[#allocation52_spill] sm:$0xff] %v3562_v27  ;;  %5446 = vst [vmem:[#allocation53_spill] sm:$0xff] %v3564_v22  ;;  %v823_v51 = vsel %vm759_vm13, %v3411_v32, 256  ;;  %v3571_v40 = vpop.eup %2580  ;;  %vm5309_vm14 = vcmp.gt.f32.partialorder %v3562_v27, %v3543_v34  ;;  %vm5307_vm15 = vcmp.gt.f32.partialorder %v3564_v22, %v3546_v30  ;;  %vm760_vm4 = vcmp.eq.f32.partialorder %v3038_v45, %v3513_v44  ;;  %v3598_v45 = vld [vmem:[%s3052_s9 + $0x98] sm:$0xff] }
 0x1d1   : > { %2106 = vst.msk [vmem:[%s3052_s9] sm:$0xff] %vm271_vm0, %v2043_v31  ;;  %vm900_vm3 = vcmp.lt.s32.totalorder %v822_v21, %v823_v51  ;;  %v3581_v41 = vpop.eup %2582  ;;  %v1994_v39 = vld [vmem:[%s3052_s9 + $0x80] sm:$0xff]  ;;  %v1512_v31 = vsel %vm5309_vm14, %v3562_v27, %v3543_v34  ;;  %v1497_v11 = vsel %vm5307_vm15, %v3564_v22, %v3546_v30  ;;  %1146 = vmin.xlane.f32.xlu0 %v3566_v26  ;;  %v3595_v19 = vcvt.s32.f32 %v1159_v29 }
 0x1d2   : > { %5448 = vst [vmem:[#allocation55_spill] sm:$0xff] %v3598_v45  ;;  %5449 = vst [vmem:[#allocation56_spill] sm:$0xff] %v3601_v50  ;;  %v3603_v10 = vsel %vm900_vm3, %v822_v21, %v823_v51  ;;  %v2075_v23 = vmul.f32 %v2579_v16, %v1994_v39  ;;  %vm761_vm5 = vcmp.eq.f32.partialorder %v3044_v47, %v3513_v44  ;;  %v824_v29 = vsel %vm760_vm4, %v3388_v63, 256  ;;  %v3636_v39 = vld [vmem:[%s3052_s9 + $0xa0] sm:$0xff]  ;;  %v3651_v44 = vld [vmem:[%s3052_s9 + $0x28] sm:$0xff] }
 0x1d3   : > { %5447 = vst [vmem:[#allocation54_spill] sm:$0xff] %v3595_v19  ;;  %1545 = vst.msk [vmem:[%s3052_s9 + $0x90] sm:$0xff] %vm271_vm0, %v1512_v31  ;;  %v903_v34 = vshra.s32 %v3603_v10, 16  ;;  %1162 = vmin.xlane.f32.xlu1 %v3595_v19  ;;  %v3615_v21 = vpop.xlane.xlu1 %718  ;;  %v3617_v16 = vpop.xlane.xlu0 %673  ;;  %v825_v51 = vsel %vm761_vm5, %v3411_v32, 256  ;;  %vm792_vm7 = vcmp.eq.f32.partialorder %v3040_v46, %v3562_v27  ;;  %vm793_vm10 = vcmp.eq.f32.partialorder %v3046_v48, %v3562_v27 }
 0x1d4   : > { %1530 = vst.msk [vmem:[%s3052_s9 + $0x18] sm:$0xff] %vm271_vm0, %v1497_v11  ;;  %5450 = vst [vmem:[#allocation57_spill] sm:$0xff] %v3615_v21  ;;  %vm762_vm11 = vcmp.eq.f32.partialorder %v3118_v52, %v3564_v22  ;;  %vm1854_vm13 = vcmp.eq.f32.partialorder %v3293_v20, inf  ;;  %vm5306_vm3 = vcmp.gt.f32.partialorder %v3615_v21, %v3598_v45  ;;  %vm5305_vm4 = vcmp.gt.f32.partialorder %v3617_v16, %v3601_v50 }
 0x1d5   : > { %5451 = vst [vmem:[#allocation58_spill] sm:$0xff] %v3617_v16  ;;  %2122 = vst.msk [vmem:[%s3052_s9 + $0x80] sm:$0xff] %vm271_vm0, %v2075_v23  ;;  %v3633_v47 = vcvt.s32.f32 %v903_v34  ;;  %vm916_vm5 = vcmp.lt.s32.totalorder %v824_v29, %v825_v51  ;;  %v1979_v31 = vld [vmem:[%s3052_s9 + $0x8] sm:$0xff]  ;;  %v1980_v11 = vld [vmem:[%s3052_s9 + $0x10] sm:$0xff]  ;;  %v1513_v23 = vsel %vm5306_vm3, %v3615_v21, %v3598_v45  ;;  %v1498_v30 = vsel %vm5305_vm4, %v3617_v16, %v3601_v50 }
 0x1d6   : > { %5452 = vst [vmem:[#allocation59_spill] sm:$0xff] %v3636_v39  ;;  %5453 = vst [vmem:[#allocation60_spill] sm:$0xff] %v3651_v44  ;;  %v3653_v34 = vsel %vm916_vm5, %v824_v29, %v825_v51  ;;  %v856_v19 = vsel %vm792_vm7, %v3388_v63, 256  ;;  %v2045_v28 = vmul.f32 %v3392_v57, %v1979_v31  ;;  %v2047_v45 = vmul.f32 %v3416_v5, %v1980_v11  ;;  %v3712_v31 = vld [vmem:[%s3052_s9 + $0x30] sm:$0xff] }
 0x1d7   : > { %1546 = vst.msk [vmem:[%s3052_s9 + $0x98] sm:$0xff] %vm271_vm0, %v1513_v23  ;;  %1531 = vst.msk [vmem:[%s3052_s9 + $0x20] sm:$0xff] %vm271_vm0, %v1498_v30  ;;  %906 = vmin.xlane.f32.xlu0 %v3633_v47  ;;  %v919_v29 = vshra.s32 %v3653_v34, 16  ;;  %v857_v46 = vsel %vm793_vm10, %v3411_v32, 256  ;;  %v3671_v51 = vpop.xlane.xlu0 %721  ;;  %v3673_v50 = vpop.xlane.xlu1 %676  ;;  %vm794_vm5 = vcmp.eq.f32.partialorder %v3120_v53, %v3615_v21  ;;  %vm795_vm4 = vcmp.eq.f32.partialorder %v3124_v55, %v3615_v21 }
 0x1d8   : > { %5454 = vst [vmem:[#allocation61_spill] sm:$0xff] %v3671_v51  ;;  %5455 = vst [vmem:[#allocation62_spill] sm:$0xff] %v3673_v50  ;;  %vm1172_vm7 = vcmp.lt.s32.totalorder %v856_v19, %v857_v46  ;;  %vm763_vm3 = vcmp.eq.f32.partialorder %v3122_v54, %v3564_v22  ;;  %vm1835_vm15 = vcmp.eq.f32.partialorder %v3340_v14, 0.0  ;;  %vm5312_vm10 = vcmp.gt.f32.partialorder %v3671_v51, %v3636_v39  ;;  %v5510_v22 = vld [vmem:[#allocation20_spill] sm:$0xff] }
 0x1d9   : > { %2107 = vst.msk [vmem:[%s3052_s9 + $0x8] sm:$0xff] %vm271_vm0, %v2045_v28  ;;  %2108 = vst.msk [vmem:[%s3052_s9 + $0x10] sm:$0xff] %vm271_vm0, %v2047_v45  ;;  %vm5311_vm9 = vcmp.gt.f32.partialorder %v3673_v50, %v3651_v44  ;;  %v3690_v48 = vcvt.s32.f32 %v919_v29  ;;  %v3692_v57 = vsel %vm1172_vm7, %v856_v19, %v857_v46  ;;  %v1853_v30 = vmul.f32 %v3492_v43, %v3293_v20  ;;  %v3709_v19 = vld [vmem:[%s3052_s9 + $0xa8] sm:$0xff] }
 0x1da   : > { %vm1856_vm14 = vcmp.eq.f32.partialorder %v3293_v20, 0.0  ;;  %v1514_v28 = vsel %vm5312_vm10, %v3671_v51, %v3636_v39  ;;  %v1499_v45 = vsel %vm5311_vm9, %v3673_v50, %v3651_v44  ;;  %5456 = vst [vmem:[#allocation63_spill] sm:$0xff] %v3709_v19  ;;  %5457 = vst [vmem:[#allocation64_spill] sm:$0xff] %v3712_v31  ;;  %v1175_v43 = vshra.s32 %v3692_v57, 16  ;;  %v3840_v39 = vld [vmem:[%s3052_s9 + $0x40] sm:$0xff] }
 0x1db   : > { %v1981_v5 = vld [vmem:[%s3052_s9 + $0x18] sm:$0xff]  ;;  %vm1847_vm7 = vcmp.eq.f32.partialorder %v3368_v15, inf  ;;  %1547 = vst.msk [vmem:[%s3052_s9 + $0xa0] sm:$0xff] %vm271_vm0, %v1514_v28  ;;  %1532 = vst.msk [vmem:[%s3052_s9 + $0x28] sm:$0xff] %vm271_vm0, %v1499_v45  ;;  %922 = vmin.xlane.f32.xlu0 %v3690_v48  ;;  %v858_v23 = vsel %vm794_vm5, %v3388_v63, 256  ;;  %v859_v29 = vsel %vm795_vm4, %v3411_v32, 256  ;;  %v3735_v46 = vpop.xlane.xlu1 %724  ;;  %vm764_vm4 = vcmp.eq.f32.partialorder %v3130_v58, %v3617_v16 }
 0x1dc   : > { %v2049_v11 = vmul.f32 %v3432_v62, %v1981_v5  ;;  %v826_v62 = vsel %vm762_vm11, %v3388_v63, 256  ;;  %5458 = vst [vmem:[#allocation65_spill] sm:$0xff] %v3735_v46  ;;  %v3737_v5 = vpop.xlane.xlu0 %679  ;;  %v3739_v28 = vcvt.s32.f32 %v1175_v43  ;;  %vm1188_vm9 = vcmp.lt.s32.totalorder %v858_v23, %v859_v29  ;;  %5465 = vst [vmem:[#allocation72_spill] sm:$0xff] %v3840_v39 }
 0x1dd   : > { %5459 = vst [vmem:[#allocation66_spill] sm:$0xff] %v3737_v5  ;;  %v827_v53 = vsel %vm763_vm3, %v3411_v32, 256  ;;  %vm5373_vm11 = vcmp.gt.f32.partialorder %v3735_v46, %v3709_v19  ;;  %vm5315_vm5 = vcmp.gt.f32.partialorder %v3737_v5, %v3712_v31  ;;  %v3753_v52 = vsel %vm1188_vm9, %v858_v23, %v859_v29 }
 0x1de   : > { %2109 = vst.msk [vmem:[%s3052_s9 + $0x18] sm:$0xff] %vm271_vm0, %v2049_v11  ;;  %vm932_vm10 = vcmp.lt.s32.totalorder %v826_v62, %v827_v53  ;;  %v1982_v55 = vld [vmem:[%s3052_s9 + $0x20] sm:$0xff]  ;;  %v1515_v54 = vsel %vm5373_vm11, %v3735_v46, %v3709_v19  ;;  %v1500_v45 = vsel %vm5315_vm5, %v3737_v5, %v3712_v31  ;;  %v1191_v43 = vshra.s32 %v3753_v52, 16  ;;  %v3768_v11 = vld [vmem:[%s3052_s9 + $0xb0] sm:$0xff] }
 0x1df   : > { %5460 = vst [vmem:[#allocation67_spill] sm:$0xff] %v3768_v11  ;;  %v3770_v23 = vsel %vm932_vm10, %v826_v62, %v827_v53  ;;  %v1834_v29 = vsel %vm1833_vm6, %v3340_v14, %v3529_v17  ;;  %vm1849_vm9 = vcmp.eq.f32.partialorder %v3368_v15, 0.0  ;;  %vm1863_vm3 = vcmp.eq.f32.partialorder %v3398_v56, 0.0  ;;  %1548 = vst.msk [vmem:[%s3052_s9 + $0xa8] sm:$0xff] %vm271_vm0, %v1515_v54  ;;  %1178 = vmin.xlane.f32.xlu0 %v3739_v28  ;;  %v3785_v62 = vld [vmem:[%s3052_s9 + $0x38] sm:$0xff] }
 0x1e0   : > { %v2051_v19 = vmul.f32 %v3447_v24, %v1982_v55  ;;  %1533 = vst.msk [vmem:[%s3052_s9 + $0x30] sm:$0xff] %vm271_vm0, %v1500_v45  ;;  %5461 = vst [vmem:[#allocation68_spill] sm:$0xff] %v3785_v62  ;;  %v935_v53 = vshra.s32 %v3770_v23, 16  ;;  %vm765_vm6 = vcmp.eq.f32.partialorder %v3134_v60, %v3617_v16  ;;  %v1855_v17 = vsel %vm1854_vm13, %v3293_v20, %v1853_v30  ;;  %v3795_v24 = vpop.xlane.xlu0 %727  ;;  %v3797_v55 = vpop.xlane.xlu1 %682 }
 0x1e1   : > { %v3793_v31 = vcvt.s32.f32 %v1191_v43  ;;  %5462 = vst [vmem:[#allocation69_spill] sm:$0xff] %v3795_v24  ;;  %5463 = vst [vmem:[#allocation70_spill] sm:$0xff] %v3797_v55  ;;  %v828_v54 = vsel %vm764_vm4, %v3388_v63, 256  ;;  %v829_v45 = vsel %vm765_vm6, %v3411_v32, 256  ;;  %v1846_v60 = vmul.f32 %v3526_v4, %v3368_v15  ;;  %v3828_v43 = vld [vmem:[%s3052_s9 + $0xb8] sm:$0xff] }
 0x1e2   : > { %2110 = vst.msk [vmem:[%s3052_s9 + $0x20] sm:$0xff] %vm271_vm0, %v2051_v19  ;;  %vm5365_vm13 = vcmp.gt.f32.partialorder %v3795_v24, %v3768_v11  ;;  %vm798_vm10 = vcmp.eq.f32.partialorder %v3144_v1, %v3735_v46  ;;  %vm799_vm5 = vcmp.eq.f32.partialorder %v3148_v3, %v3735_v46  ;;  %v1860_v58 = vmul.f32 %v3571_v40, %v3398_v56  ;;  %v1983_v30 = vld [vmem:[%s3052_s9 + $0x28] sm:$0xff]  ;;  %v5502_v46 = vld [vmem:[#allocation21_spill] sm:$0xff] }
 0x1e3   : > { %1194 = vmin.xlane.f32.xlu1 %v3793_v31  ;;  %v1516_v4 = vsel %vm5365_vm13, %v3795_v24, %v3768_v11  ;;  %vm5359_vm4 = vcmp.gt.f32.partialorder %v3797_v55, %v3785_v62  ;;  %v3825_v19 = vcvt.s32.f32 %v935_v53  ;;  %5464 = vst [vmem:[#allocation71_spill] sm:$0xff] %v3828_v43  ;;  %v2022_v44 = vmax.f32 %v3509_v25, 1e-12 }
 0x1e4   : > { %v2053_v40 = vmul.f32 %v3464_v38, %v1983_v30  ;;  %1549 = vst.msk [vmem:[%s3052_s9 + $0xb0] sm:$0xff] %vm271_vm0, %v1516_v4  ;;  %v1501_v11 = vsel %vm5359_vm4, %v3797_v55, %v3785_v62  ;;  %vm948_vm6 = vcmp.lt.s32.totalorder %v828_v54, %v829_v45  ;;  %v5466_v53 = vand.u32 2147483648, %v3340_v14  ;;  %v3851_v25 = vpop.xlane.xlu1 %730  ;;  %v3853_v38 = vpop.xlane.xlu0 %685 }
 0x1e5   : > { %1534 = vst.msk [vmem:[%s3052_s9 + $0x38] sm:$0xff] %vm271_vm0, %v1501_v11  ;;  %938 = vmin.xlane.f32.xlu0 %v3825_v19  ;;  %5467 = vst [vmem:[#allocation73_spill] sm:$0xff] %v3851_v25  ;;  %v3855_v30 = vsel %vm948_vm6, %v828_v54, %v829_v45  ;;  %v862_v4 = vsel %vm798_vm10, %v3388_v63, 256  ;;  %v863_v14 = vsel %vm799_vm5, %v3411_v32, 256  ;;  %v5469_v11 = vand.u32 2147483648, %v3293_v20 }
 0x1e6   : > { %v3846_v16 = vsel %vm1835_vm15, %v5466_v53, %v1834_v29  ;;  %5468 = vst [vmem:[#allocation74_spill] sm:$0xff] %v3853_v38  ;;  %2111 = vst.msk [vmem:[%s3052_s9 + $0x28] sm:$0xff] %vm271_vm0, %v2053_v40  ;;  %vm5356_vm15 = vcmp.gt.f32.partialorder %v3851_v25, %v3828_v43  ;;  %vm796_vm10 = vcmp.eq.f32.partialorder %v3132_v59, %v3671_v51  ;;  %v5471_v40 = vmax.f32 %v3420_v12, 1e-12 }
 0x1e7   : > { %v3869_v29 = vsel %vm1856_vm14, %v5469_v11, %v1855_v17  ;;  %vm797_vm6 = vcmp.eq.f32.partialorder %v3136_v61, %v3671_v51  ;;  %v1848_v1 = vsel %vm1847_vm7, %v3368_v15, %v1846_v60  ;;  %v1862_v3 = vsel %vm1861_vm1, %v3398_v56, %v1860_v58  ;;  %v1984_v20 = vld [vmem:[%s3052_s9 + $0x30] sm:$0xff]  ;;  %v3903_v58 = vld [vmem:[%s3052_s9 + $0xc0] sm:$0xff] }
 0x1e8   : > { %v1517_v17 = vsel %vm5356_vm15, %v3851_v25, %v3828_v43  ;;  %vm5330_vm14 = vcmp.gt.f32.partialorder %v3853_v38, %v3840_v39  ;;  %v2055_v54 = vmul.f32 %v3505_v36, %v1984_v20  ;;  %v951_v60 = vshra.s32 %v3855_v30, 16  ;;  %5470 = vst [vmem:[#allocation75_spill] sm:$0xff] %v3903_v58  ;;  %v3911_v53 = vpop.xlane.xlu0 %733  ;;  %v3913_v11 = vpop.xlane.xlu1 %688  ;;  %v3916_v20 = vld [vmem:[%s3052_s9 + $0x48] sm:$0xff] }
 0x1e9   : > { %1550 = vst.msk [vmem:[%s3052_s9 + $0xb8] sm:$0xff] %vm271_vm0, %v1517_v17  ;;  %v1502_v45 = vsel %vm5330_vm14, %v3853_v38, %v3840_v39  ;;  %vm1220_vm1 = vcmp.lt.s32.totalorder %v862_v4, %v863_v14  ;;  %2584 = vrcp.f32 %v5471_v40  ;;  %5472 = vst [vmem:[#allocation76_spill] sm:$0xff] %v3911_v53  ;;  %v860_v17 = vsel %vm796_vm10, %v3388_v63, 256 }
 0x1ea   : > { %1535 = vst.msk [vmem:[%s3052_s9 + $0x40] sm:$0xff] %vm271_vm0, %v1502_v45  ;;  %v3909_v36 = vsel %vm1220_vm1, %v862_v4, %v863_v14  ;;  %5473 = vst [vmem:[#allocation77_spill] sm:$0xff] %v3913_v11  ;;  %v861_v12 = vsel %vm797_vm6, %v3411_v32, 256  ;;  %2586 = vrcp.f32 %v2022_v44  ;;  %v2021_v4 = vmax.f32 %v3846_v16, 1e-12 }
 0x1eb   : > { %5474 = vst [vmem:[#allocation78_spill] sm:$0xff] %v3916_v20  ;;  %2112 = vst.msk [vmem:[%s3052_s9 + $0x30] sm:$0xff] %vm271_vm0, %v2055_v54  ;;  %v3929_v14 = vcvt.s32.f32 %v951_v60  ;;  %v1223_v45 = vshra.s32 %v3909_v36, 16  ;;  %v2024_v59 = vmax.f32 %v3869_v29, 1e-12  ;;  %v5475_v40 = vand.u32 2147483648, %v3368_v15 }
 0x1ec   : > { %v5476_v39 = vand.u32 2147483648, %v3398_v56  ;;  %vm5329_vm7 = vcmp.gt.f32.partialorder %v3911_v53, %v3903_v58  ;;  %v1985_v16 = vld [vmem:[%s3052_s9 + $0x38] sm:$0xff]  ;;  %vm5321_vm5 = vcmp.gt.f32.partialorder %v3913_v11, %v3916_v20  ;;  %v3955_v56 = vld [vmem:[%s3052_s9 + $0xc8] sm:$0xff]  ;;  %v3970_v60 = vpop.xlane.xlu1 %736  ;;  %vm802_vm10 = vcmp.eq.f32.partialorder %v3168_v13, %v3851_v25 }
 0x1ed   : > { %v1851_v61 = vsel %vm1849_vm9, %v5475_v40, %v1848_v1  ;;  %954 = vmin.xlane.f32.xlu0 %v3929_v14  ;;  %v3945_v54 = vcvt.s32.f32 %v1223_v45  ;;  %v1518_v15 = vsel %vm5329_vm7, %v3911_v53, %v3903_v58  ;;  %vm1204_vm9 = vcmp.lt.s32.totalorder %v860_v17, %v861_v12  ;;  %5477 = vst [vmem:[#allocation79_spill] sm:$0xff] %v3955_v56  ;;  %v3972_v45 = vpop.xlane.xlu0 %691  ;;  %v2657_v58 = vld [vmem:[%s2855_s6 + $0xa0] sm:$0xff] }
 0x1ee   : > { %v1865_v44 = vsel %vm1863_vm3, %v5476_v39, %v1862_v3  ;;  %v3958_v39 = vld [vmem:[%s3052_s9 + $0x50] sm:$0xff]  ;;  %v2057_v29 = vmul.f32 %v3517_v35, %v1985_v16  ;;  %1551 = vst.msk [vmem:[%s3052_s9 + $0xc0] sm:$0xff] %vm271_vm0, %v1518_v15  ;;  %v1503_v1 = vsel %vm5321_vm5, %v3913_v11, %v3916_v20  ;;  %v3968_v3 = vsel %vm1204_vm9, %v860_v17, %v861_v12 }
 0x1ef   : > { %5478 = vst [vmem:[#allocation80_spill] sm:$0xff] %v3958_v39  ;;  %5479 = vst [vmem:[#allocation81_spill] sm:$0xff] %v3970_v60  ;;  %vm766_vm3 = vcmp.eq.f32.partialorder %v3142_v0, %v3673_v50  ;;  %vm803_vm6 = vcmp.eq.f32.partialorder %v3172_v18, %v3851_v25  ;;  %1226 = vmin.xlane.f32.xlu1 %v3945_v54  ;;  %v1207_v35 = vshra.s32 %v3968_v3, 16  ;;  %v2023_v17 = vmax.f32 %v1851_v61, 1e-12 }
 0x1f0   : > { %5480 = vst [vmem:[#allocation82_spill] sm:$0xff] %v3972_v45  ;;  %1536 = vst.msk [vmem:[%s3052_s9 + $0x48] sm:$0xff] %vm271_vm0, %v1503_v1  ;;  %vm767_vm1 = vcmp.eq.f32.partialorder %v3146_v2, %v3673_v50  ;;  %v2025_v12 = vmax.f32 %v1865_v44, 1e-12  ;;  %vm5326_vm9 = vcmp.gt.f32.partialorder %v3970_v60, %v3955_v56  ;;  %vm5328_vm5 = vcmp.gt.f32.partialorder %v3972_v45, %v3958_v39  ;;  %v4010_v44 = vld [vmem:[%s3052_s9 + $0xd0] sm:$0xff] }
 0x1f1   : > { %2113 = vst.msk [vmem:[%s3052_s9 + $0x38] sm:$0xff] %vm271_vm0, %v2057_v29  ;;  %v1986_v40 = vld [vmem:[%s3052_s9 + $0x40] sm:$0xff]  ;;  %v3993_v16 = vcvt.s32.f32 %v1207_v35  ;;  %v1519_v15 = vsel %vm5326_vm9, %v3970_v60, %v3955_v56  ;;  %v1504_v2 = vsel %vm5328_vm5, %v3972_v45, %v3958_v39  ;;  %v830_v61 = vsel %vm766_vm3, %v3388_v63, 256  ;;  %5481 = vst [vmem:[#allocation83_spill] sm:$0xff] %v4010_v44  ;;  %v4026_v56 = vpop.xlane.xlu0 %739  ;;  %v4028_v39 = vpop.xlane.xlu1 %694 }
 0x1f2   : > { %v2059_v29 = vmul.f32 %v3549_v49, %v1986_v40  ;;  %1552 = vst.msk [vmem:[%s3052_s9 + $0xc8] sm:$0xff] %vm271_vm0, %v1519_v15  ;;  %1537 = vst.msk [vmem:[%s3052_s9 + $0x50] sm:$0xff] %vm271_vm0, %v1504_v2  ;;  %v831_v1 = vsel %vm767_vm1, %v3411_v32, 256  ;;  %v866_v35 = vsel %vm802_vm10, %v3388_v63, 256  ;;  %v867_v0 = vsel %vm803_vm6, %v3411_v32, 256  ;;  %v4032_v49 = vld [vmem:[%s3052_s9 + $0x58] sm:$0xff] }
 0x1f3   : > { %5482 = vst [vmem:[#allocation84_spill] sm:$0xff] %v4026_v56  ;;  %5483 = vst [vmem:[#allocation85_spill] sm:$0xff] %v4028_v39  ;;  %2588 = vrcp.f32 %v2021_v4  ;;  %1210 = vmin.xlane.f32.xlu0 %v3993_v16  ;;  %vm964_vm3 = vcmp.lt.s32.totalorder %v830_v61, %v831_v1  ;;  %vm1252_vm1 = vcmp.lt.s32.totalorder %v866_v35, %v867_v0  ;;  %v2585_v40 = vpop.eup %2584 }
 0x1f4   : > { %5484 = vst [vmem:[#allocation86_spill] sm:$0xff] %v4032_v49  ;;  %2590 = vrcp.f32 %v2024_v59  ;;  %2114 = vst.msk [vmem:[%s3052_s9 + $0x40] sm:$0xff] %vm271_vm0, %v2059_v29  ;;  %v4036_v13 = vsel %vm964_vm3, %v830_v61, %v831_v1  ;;  %v4038_v18 = vsel %vm1252_vm1, %v866_v35, %v867_v0  ;;  %vm5325_vm10 = vcmp.gt.f32.partialorder %v4026_v56, %v4010_v44  ;;  %v4042_v4 = vpop.eup %2586  ;;  %v4059_v29 = vld [vmem:[%s3052_s9 + $0xd8] sm:$0xff] }
 0x1f5   : > { %5485 = vst [vmem:[#allocation87_spill] sm:$0xff] %v4038_v18  ;;  %2592 = vrcp.f32 %v2023_v17  ;;  %v967_v15 = vshra.s32 %v4036_v13, 16  ;;  %v1255_v2 = vshra.s32 %v4038_v18, 16  ;;  %v1520_v61 = vsel %vm5325_vm10, %v4026_v56, %v4010_v44  ;;  %v4056_v17 = vpop.xlane.xlu1 %742  ;;  %5487 = vst [vmem:[#allocation89_spill] sm:$0xff] %v4059_v29  ;;  %v4076_v44 = vld [vmem:[%s3052_s9 + $0x60] sm:$0xff] }
 0x1f6   : > { %2594 = vrcp.f32 %v2025_v12  ;;  %vm5327_vm6 = vcmp.gt.f32.partialorder %v4028_v39, %v4032_v49  ;;  %vm768_vm3 = vcmp.eq.f32.partialorder %v3154_v6, %v3737_v5  ;;  %5486 = vst [vmem:[#allocation88_spill] sm:$0xff] %v4056_v17  ;;  %v4061_v12 = vpop.xlane.xlu0 %697  ;;  %1553 = vst.msk [vmem:[%s3052_s9 + $0xd0] sm:$0xff] %vm271_vm0, %v1520_v61  ;;  %vm800_vm1 = vcmp.eq.f32.partialorder %v3156_v7, %v3795_v24 }
 0x1f7   : > { %v1987_v59 = vld [vmem:[%s3052_s9 + $0x48] sm:$0xff]  ;;  %5488 = vst [vmem:[#allocation90_spill] sm:$0xff] %v4061_v12  ;;  %v4064_v35 = vcvt.s32.f32 %v967_v15  ;;  %v4066_v0 = vcvt.s32.f32 %v1255_v2  ;;  %v1505_v6 = vsel %vm5327_vm6, %v4028_v39, %v4032_v49  ;;  %5490 = vst [vmem:[#allocation92_spill] sm:$0xff] %v4076_v44  ;;  %vm801_vm10 = vcmp.eq.f32.partialorder %v3160_v9, %v3795_v24  ;;  %v5491_v15 = vld [vmem:[#allocation12_spill] sm:$0xff] }
 0x1f8   : > { %v2061_v1 = vmul.f32 %v3581_v41, %v1987_v59  ;;  %1538 = vst.msk [vmem:[%s3052_s9 + $0x58] sm:$0xff] %vm271_vm0, %v1505_v6  ;;  %vm769_vm9 = vcmp.eq.f32.partialorder %v3158_v8, %v3737_v5  ;;  %v832_v41 = vsel %vm768_vm3, %v3388_v63, 256  ;;  %vm806_vm6 = vcmp.eq.f32.partialorder %v5491_v15, %v3970_v60  ;;  %v5492_v2 = vld [vmem:[#allocation14_spill] sm:$0xff] }
 0x1f9   : > { %5489 = vst [vmem:[#allocation91_spill] sm:$0xff] %v4066_v0  ;;  %vm807_vm5 = vcmp.eq.f32.partialorder %v5492_v2, %v3970_v60  ;;  %v1988_v59 = vld [vmem:[%s3052_s9 + $0x50] sm:$0xff]  ;;  %970 = vmin.xlane.f32.xlu0 %v4064_v35  ;;  %1258 = vmin.xlane.f32.xlu1 %v4066_v0  ;;  %v833_v61 = vsel %vm769_vm9, %v3411_v32, 256  ;;  %vm5343_vm3 = vcmp.gt.f32.partialorder %v4056_v17, %v4059_v29  ;;  %v4137_v9 = vpop.xlane.xlu1 %700 }
 0x1fa   : > { %2115 = vst.msk [vmem:[%s3052_s9 + $0x48] sm:$0xff] %vm271_vm0, %v2061_v1  ;;  %v2063_v8 = vmul.f32 %v2585_v40, %v1988_v59  ;;  %vm980_vm7 = vcmp.lt.s32.totalorder %v832_v41, %v833_v61  ;;  %v1521_v1 = vsel %vm5343_vm3, %v4056_v17, %v4059_v29  ;;  %vm5355_vm14 = vcmp.gt.f32.partialorder %v4061_v12, %v4076_v44  ;;  %v4132_v7 = vpop.xlane.xlu0 %745  ;;  %v4135_v29 = vld [vmem:[%s3052_s9 + $0xe0] sm:$0xff]  ;;  %v5499_v2 = vld [vmem:[#allocation7_spill] sm:$0xff] }
 0x1fb   : > { %v4106_v6 = vsel %vm980_vm7, %v832_v41, %v833_v61  ;;  %1554 = vst.msk [vmem:[%s3052_s9 + $0xd8] sm:$0xff] %vm271_vm0, %v1521_v1  ;;  %v1506_v40 = vsel %vm5355_vm14, %v4061_v12, %v4076_v44  ;;  %v864_v59 = vsel %vm800_vm1, %v3388_v63, 256  ;;  %v865_v41 = vsel %vm801_vm10, %v3411_v32, 256  ;;  %5493 = vst [vmem:[#allocation12_spill] sm:$0xff] %v4132_v7  ;;  %v2656_v44 = vld [vmem:[%s2855_s6 + $0x90] sm:$0xff] }
 0x1fc   : > { %2116 = vst.msk [vmem:[%s3052_s9 + $0x50] sm:$0xff] %vm271_vm0, %v2063_v8  ;;  %v983_v61 = vshra.s32 %v4106_v6, 16  ;;  %1539 = vst.msk [vmem:[%s3052_s9 + $0x60] sm:$0xff] %vm271_vm0, %v1506_v40  ;;  %vm1236_vm7 = vcmp.lt.s32.totalorder %v864_v59, %v865_v41  ;;  %v870_v1 = vsel %vm806_vm6, %v3388_v63, 256  ;;  %v4140_v49 = vmul.f32 %v2656_v44, %v2656_v44  ;;  %v5496_v40 = vld [vmem:[#allocation5_spill] sm:$0xff]  ;;  %v5497_v44 = vld [vmem:[#allocation6_spill] sm:$0xff] }
 0x1fd   : > { %5494 = vst [vmem:[#allocation14_spill] sm:$0xff] %v4135_v29  ;;  %5495 = vst [vmem:[#allocation93_spill] sm:$0xff] %v4137_v9  ;;  %v2589_v8 = vpop.eup %2588  ;;  %vm770_vm9 = vcmp.eq.f32.partialorder %v5496_v40, %v3797_v55  ;;  %v4144_v20 = vsel %vm1236_vm7, %v864_v59, %v865_v41  ;;  %v871_v15 = vsel %vm807_vm5, %v3411_v32, 256  ;;  %v4151_v43 = vmul.f32 %v2657_v58, %v2657_v58  ;;  %v4161_v59 = vld [vmem:[%s3052_s9 + $0x68] sm:$0xff]  ;;  %v5500_v58 = vld [vmem:[#allocation19_spill] sm:$0xff] }
 0x1fe   : > { %v4153_v25 = vpop.eup %2590  ;;  %vm771_vm10 = vcmp.eq.f32.partialorder %v5497_v44, %v3797_v55  ;;  %v4157_v62 = vcvt.s32.f32 %v983_v61  ;;  %v1239_v24 = vshra.s32 %v4144_v20, 16  ;;  %vm1284_vm6 = vcmp.lt.s32.totalorder %v870_v1, %v871_v15  ;;  %5498 = vst [vmem:[#allocation5_spill] sm:$0xff] %v4161_v59  ;;  %v4212_v44 = vpop.xlane.xlu1 %748 }
 0x1ff   : > { %v4163_v41 = vpop.eup %2592  ;;  %vm772_vm5 = vcmp.eq.f32.partialorder %v5499_v2, %v3853_v38  ;;  %vm778_vm1 = vcmp.eq.f32.partialorder %v5500_v58, %v4028_v39  ;;  %v1989_v60 = vld [vmem:[%s3052_s9 + $0x58] sm:$0xff]  ;;  %v4170_v5 = vsel %vm1284_vm6, %v870_v1, %v871_v15  ;;  %vm5347_vm7 = vcmp.gt.f32.partialorder %v4132_v7, %v4135_v29  ;;  %5505 = vst [vmem:[#allocation21_spill] sm:$0xff] %v4212_v44  ;;  %v4230_v55 = vpop.xlane.xlu0 %703 }
 0x200   : > { %5501 = vst [vmem:[#allocation6_spill] sm:$0xff] %v4170_v5  ;;  %v4174_v61 = vpop.eup %2594  ;;  %vm779_vm3 = vcmp.eq.f32.partialorder %v5502_v46, %v4028_v39  ;;  %v2065_v50 = vmul.f32 %v2589_v8, %v1989_v60  ;;  %986 = vmin.xlane.f32.xlu0 %v4157_v62  ;;  %v4179_v51 = vcvt.s32.f32 %v1239_v24  ;;  %v1287_v21 = vshra.s32 %v4170_v5, 16  ;;  %v5512_v46 = vld [vmem:[#allocation10_spill] sm:$0xff] }
 0x201   : > { %v1522_v1 = vsel %vm5347_vm7, %v4132_v7, %v4135_v29  ;;  %vm5353_vm6 = vcmp.gt.f32.partialorder %v4137_v9, %v4161_v59  ;;  %v834_v60 = vsel %vm770_vm9, %v3388_v63, 256  ;;  %v835_v24 = vsel %vm771_vm10, %v3411_v32, 256 }
 0x202   : > { %5503 = vst [vmem:[#allocation7_spill] sm:$0xff] %v4179_v51  ;;  %2117 = vst.msk [vmem:[%s3052_s9 + $0x58] sm:$0xff] %vm271_vm0, %v2065_v50  ;;  %v4199_v8 = vcvt.s32.f32 %v1287_v21  ;;  %v1507_v15 = vsel %vm5353_vm6, %v4137_v9, %v4161_v59  ;;  %vm996_vm7 = vcmp.lt.s32.totalorder %v834_v60, %v835_v24  ;;  %v842_v40 = vsel %vm778_vm1, %v3388_v63, 256  ;;  %v4215_v50 = vld [vmem:[%s3052_s9 + $0xe8] sm:$0xff]  ;;  %v5507_v21 = vld [vmem:[#allocation9_spill] sm:$0xff] }
 0x203   : > { %1555 = vst.msk [vmem:[%s3052_s9 + $0xe0] sm:$0xff] %vm271_vm0, %v1522_v1  ;;  %5506 = vst [vmem:[#allocation94_spill] sm:$0xff] %v4215_v50  ;;  %vm773_vm9 = vcmp.eq.f32.partialorder %v5507_v21, %v3853_v38  ;;  %v5508_v1 = vld [vmem:[#allocation8_spill] sm:$0xff]  ;;  %v1990_v29 = vld [vmem:[%s3052_s9 + $0x60] sm:$0xff]  ;;  %v4224_v59 = vsel %vm996_vm7, %v834_v60, %v835_v24  ;;  %v843_v58 = vsel %vm779_vm3, %v3411_v32, 256  ;;  %vm810_vm1 = vcmp.eq.f32.partialorder %v5510_v22, %v4056_v17  ;;  %v4296_v38 = vpop.xlane.xlu1 %706 }
 0x204   : > { %5504 = vst [vmem:[#allocation19_spill] sm:$0xff] %v4199_v8  ;;  %vm804_vm10 = vcmp.eq.f32.partialorder %v5508_v1, %v3911_v53  ;;  %1540 = vst.msk [vmem:[%s3052_s9 + $0x68] sm:$0xff] %vm271_vm0, %v1507_v15  ;;  %v2067_v27 = vmul.f32 %v4042_v4, %v1990_v29  ;;  %1242 = vmin.xlane.f32.xlu0 %v4179_v51  ;;  %1290 = vmin.xlane.f32.xlu1 %v4199_v8  ;;  %v999_v60 = vshra.s32 %v4224_v59, 16  ;;  %v4239_v24 = vld [vmem:[%s3052_s9 + $0x70] sm:$0xff]  ;;  %v5513_v15 = vld [vmem:[#allocation22_spill] sm:$0xff] }
 0x205   : > { %5509 = vst [vmem:[#allocation9_spill] sm:$0xff] %v4230_v55  ;;  %vm1060_vm7 = vcmp.lt.s32.totalorder %v842_v40, %v843_v58  ;;  %5511 = vst [vmem:[#allocation8_spill] sm:$0xff] %v4239_v24  ;;  %vm805_vm3 = vcmp.eq.f32.partialorder %v5512_v46, %v3911_v53  ;;  %vm811_vm6 = vcmp.eq.f32.partialorder %v5513_v15, %v4056_v17  ;;  %v5515_v4 = vld [vmem:[#allocation11_spill] sm:$0xff] }
 0x206   : > { %v4245_v39 = vsel %vm1060_vm7, %v842_v40, %v843_v58  ;;  %vm5361_vm14 = vcmp.gt.f32.partialorder %v4212_v44, %v4215_v50  ;;  %vm774_vm15 = vcmp.eq.f32.partialorder %v5515_v4, %v3913_v11  ;;  %2118 = vst.msk [vmem:[%s3052_s9 + $0x60] sm:$0xff] %vm271_vm0, %v2067_v27  ;;  %v4253_v29 = vcvt.s32.f32 %v999_v60  ;;  %v5517_v40 = vld [vmem:[#allocation13_spill] sm:$0xff]  ;;  %v5527_v15 = vld [vmem:[#allocation27_spill] sm:$0xff] }
 0x207   : > { %5514 = vst [vmem:[#allocation20_spill] sm:$0xff] %v4245_v39  ;;  %v1063_v8 = vshra.s32 %v4245_v39, 16  ;;  %v1523_v5 = vsel %vm5361_vm14, %v4212_v44, %v4215_v50  ;;  %vm775_vm7 = vcmp.eq.f32.partialorder %v5517_v40, %v3913_v11  ;;  %vm5371_vm4 = vcmp.gt.f32.partialorder %v4230_v55, %v4239_v24  ;;  %v5519_v50 = vld [vmem:[#allocation15_spill] sm:$0xff]  ;;  %5521 = vst [vmem:[#allocation13_spill] sm:$0xff] %v4296_v38  ;;  %v5522_v39 = vld [vmem:[#allocation17_spill] sm:$0xff] }
 0x208   : > { %5516 = vst [vmem:[#allocation10_spill] sm:$0xff] %v4253_v29  ;;  %1556 = vst.msk [vmem:[%s3052_s9 + $0xe8] sm:$0xff] %vm271_vm0, %v1523_v5  ;;  %v836_v27 = vsel %vm772_vm5, %v3388_v63, 256  ;;  %v837_v58 = vsel %vm773_vm9, %v3411_v32, 256  ;;  %v874_v60 = vsel %vm810_vm1, %v3388_v63, 256  ;;  %v4280_v5 = vld [vmem:[%s3052_s9 + $0xf0] sm:$0xff]  ;;  %vm776_vm14 = vcmp.eq.f32.partialorder %v5519_v50, %v3972_v45  ;;  %1002 = vmin.xlane.f32.xlu0 %v4253_v29 }
 0x209   : > { %5518 = vst [vmem:[#allocation22_spill] sm:$0xff] %v4280_v5  ;;  %v4285_v2 = vcvt.s32.f32 %v1063_v8  ;;  %v1508_v21 = vsel %vm5371_vm4, %v4230_v55, %v4239_v24  ;;  %vm1012_vm5 = vcmp.lt.s32.totalorder %v836_v27, %v837_v58  ;;  %v875_v22 = vsel %vm811_vm6, %v3411_v32, 256  ;;  %v5523_v8 = vld [vmem:[#allocation16_spill] sm:$0xff]  ;;  %v4306_v24 = vpop.xlane.xlu0 %751  ;;  %v5540_v50 = vld [vmem:[#allocation31_spill] sm:$0xff] }
 0x20a   : > { %vm777_vm9 = vcmp.eq.f32.partialorder %v5522_v39, %v3972_v45  ;;  %vm808_vm1 = vcmp.eq.f32.partialorder %v5523_v8, %v4026_v56  ;;  %1541 = vst.msk [vmem:[%s3052_s9 + $0x70] sm:$0xff] %vm271_vm0, %v1508_v21  ;;  %v4304_v0 = vsel %vm1012_vm5, %v836_v27, %v837_v58  ;;  %vm1316_vm13 = vcmp.lt.s32.totalorder %v874_v60, %v875_v22  ;;  %v4309_v29 = vld [vmem:[%s3052_s9 + $0x78] sm:$0xff]  ;;  %v5529_v27 = vld [vmem:[#allocation29_spill] sm:$0xff] }
 0x20b   : > { %5520 = vst [vmem:[#allocation11_spill] sm:$0xff] %v4285_v2  ;;  %5524 = vst [vmem:[#allocation15_spill] sm:$0xff] %v4304_v0  ;;  %vm782_vm6 = vcmp.eq.f32.partialorder %v5527_v15, %v4137_v9  ;;  %v1991_v17 = vld [vmem:[%s3052_s9 + $0x68] sm:$0xff]  ;;  %1066 = vmin.xlane.f32.xlu1 %v4285_v2  ;;  %v1015_v18 = vshra.s32 %v4304_v0, 16  ;;  %v4316_v51 = vsel %vm1316_vm13, %v874_v60, %v875_v22  ;;  %v5531_v22 = vld [vmem:[#allocation23_spill] sm:$0xff]  ;;  %v840_v4 = vsel %vm776_vm14, %v3388_v63, 256 }
 0x20c   : > { %5525 = vst [vmem:[#allocation17_spill] sm:$0xff] %v4306_v24  ;;  %5526 = vst [vmem:[#allocation16_spill] sm:$0xff] %v4309_v29  ;;  %vm5377_vm5 = vcmp.gt.f32.partialorder %v4306_v24, %v4280_v5  ;;  %vm783_vm4 = vcmp.eq.f32.partialorder %v5529_v27, %v4137_v9  ;;  %v2069_v58 = vmul.f32 %v4163_v41, %v1991_v17  ;;  %v1319_v21 = vshra.s32 %v4316_v51, 16  ;;  %v5530_v60 = vld [vmem:[#allocation18_spill] sm:$0xff]  ;;  %v4340_v17 = vld [vmem:[%s3052_s9 + $0xf8] sm:$0xff] }
 0x20d   : > { %5528 = vst [vmem:[#allocation27_spill] sm:$0xff] %v4316_v51  ;;  %v1524_v2 = vsel %vm5377_vm5, %v4306_v24, %v4280_v5  ;;  %vm809_vm13 = vcmp.eq.f32.partialorder %v5530_v60, %v4026_v56  ;;  %vm780_vm11 = vcmp.eq.f32.partialorder %v5531_v22, %v4061_v12  ;;  %v4333_v0 = vcvt.s32.f32 %v1015_v18  ;;  %5532 = vst [vmem:[#allocation29_spill] sm:$0xff] %v4340_v17  ;;  %v5537_v15 = vld [vmem:[#allocation25_spill] sm:$0xff]  ;;  %v2670_v56 = vld [vmem:[%s2855_s6 + $0xf8] sm:$0xff] }
 0x20e   : > { %1557 = vst.msk [vmem:[%s3052_s9 + $0xf0] sm:$0xff] %vm271_vm0, %v1524_v2  ;;  %vm5380_vm8 = vcmp.gt.f32.partialorder %v4296_v38, %v4309_v29  ;;  %2119 = vst.msk [vmem:[%s3052_s9 + $0x68] sm:$0xff] %vm271_vm0, %v2069_v58  ;;  %v4344_v41 = vcvt.s32.f32 %v1319_v21  ;;  %v868_v18 = vsel %vm804_vm10, %v3388_v63, 256  ;;  %v869_v2 = vsel %vm805_vm3, %v3411_v32, 256  ;;  %v5534_v58 = vld [vmem:[#allocation28_spill] sm:$0xff]  ;;  %v4372_v21 = vpop.xlane.xlu1 %754 }
 0x20f   : > { %v1509_v5 = vsel %vm5380_vm8, %v4296_v38, %v4309_v29  ;;  %vm814_vm5 = vcmp.eq.f32.partialorder %v5534_v58, %v4212_v44  ;;  %1018 = vmin.xlane.f32.xlu0 %v4333_v0  ;;  %vm1268_vm2 = vcmp.lt.s32.totalorder %v868_v18, %v869_v2  ;;  %v846_v1 = vsel %vm782_vm6, %v3388_v63, 256  ;;  %5535 = vst [vmem:[#allocation23_spill] sm:$0xff] %v4372_v21  ;;  %v5536_v29 = vld [vmem:[#allocation30_spill] sm:$0xff] }
 0x210   : > { %5533 = vst [vmem:[#allocation18_spill] sm:$0xff] %v4344_v41  ;;  %1542 = vst.msk [vmem:[%s3052_s9 + $0x78] sm:$0xff] %vm271_vm0, %v1509_v5  ;;  %v847_v46 = vsel %vm783_vm4, %v3411_v32, 256  ;;  %vm815_vm10 = vcmp.eq.f32.partialorder %v5536_v29, %v4212_v44  ;;  %1322 = vmin.xlane.f32.xlu1 %v4344_v41  ;;  %v4377_v5 = vsel %vm1268_vm2, %v868_v18, %v869_v2  ;;  %v5538_v2 = vld [vmem:[#allocation24_spill] sm:$0xff]  ;;  %v841_v29 = vsel %vm777_vm9, %v3411_v32, 256 }
 0x211   : > { %vm1092_vm3 = vcmp.lt.s32.totalorder %v846_v1, %v847_v46  ;;  %vm1493_vm6 = vcmp.gt.f32.partialorder %v4372_v21, %v4340_v17  ;;  %vm781_vm8 = vcmp.eq.f32.partialorder %v5537_v15, %v4061_v12  ;;  %v1992_v27 = vld [vmem:[%s3052_s9 + $0x70] sm:$0xff]  ;;  %v1271_v9 = vshra.s32 %v4377_v5, 16 }
 0x212   : > { %v4385_v53 = vsel %vm1092_vm3, %v846_v1, %v847_v46  ;;  %v1525_v18 = vsel %vm1493_vm6, %v4372_v21, %v4340_v17  ;;  %vm812_vm2 = vcmp.eq.f32.partialorder %v5538_v2, %v4132_v7  ;;  %v2071_v41 = vmul.f32 %v4153_v25, %v1992_v27 }
 0x213   : > { %v1095_v51 = vshra.s32 %v4385_v53, 16  ;;  %1558 = vst.msk [vmem:[%s3052_s9 + $0xf8] sm:$0xff] %vm271_vm0, %v1525_v18  ;;  %v838_v1 = vsel %vm774_vm15, %v3388_v63, 256  ;;  %v4402_v46 = vcvt.s32.f32 %v1271_v9  ;;  %v839_v17 = vsel %vm775_vm7, %v3411_v32, 256 }
 0x214   : > { %v878_v25 = vsel %vm814_vm5, %v3388_v63, 256  ;;  %v879_v27 = vsel %vm815_vm10, %v3411_v32, 256  ;;  %2120 = vst.msk [vmem:[%s3052_s9 + $0x70] sm:$0xff] %vm271_vm0, %v2071_v41  ;;  %vm1028_vm4 = vcmp.lt.s32.totalorder %v838_v1, %v839_v17  ;;  %v5539_v41 = vld [vmem:[#allocation26_spill] sm:$0xff]  ;;  %vm784_vm7 = vcmp.eq.f32.partialorder %v5540_v50, %v4230_v55 }
 0x215   : > { %v4418_v9 = vcvt.s32.f32 %v1095_v51  ;;  %vm1348_vm15 = vcmp.lt.s32.totalorder %v878_v25, %v879_v27  ;;  %1274 = vmin.xlane.f32.xlu0 %v4402_v46  ;;  %v4425_v40 = vsel %vm1028_vm4, %v838_v1, %v839_v17  ;;  %v872_v51 = vsel %vm808_vm1, %v3388_v63, 256 }
 0x216   : > { %v4427_v58 = vsel %vm1348_vm15, %v878_v25, %v879_v27  ;;  %vm813_vm14 = vcmp.eq.f32.partialorder %v5539_v41, %v4132_v7  ;;  %v1031_v18 = vshra.s32 %v4425_v40, 16  ;;  %vm1044_vm9 = vcmp.lt.s32.totalorder %v840_v4, %v841_v29 }
 0x217   : > { %v1993_v17 = vld [vmem:[%s3052_s9 + $0x78] sm:$0xff]  ;;  %1098 = vmin.xlane.f32.xlu1 %v4418_v9  ;;  %v1351_v39 = vshra.s32 %v4427_v58, 16  ;;  %v873_v8 = vsel %vm809_vm13, %v3411_v32, 256  ;;  %v844_v25 = vsel %vm780_vm11, %v3388_v63, 256  ;;  %v4458_v45 = vsel %vm1044_vm9, %v840_v4, %v841_v29  ;;  %v5543_v4 = vld [vmem:[#allocation34_spill] sm:$0xff] }
 0x218   : > { %v2073_v1 = vmul.f32 %v4174_v61, %v1993_v17  ;;  %v4454_v27 = vcvt.s32.f32 %v1031_v18  ;;  %vm1300_vm1 = vcmp.lt.s32.totalorder %v872_v51, %v873_v8  ;;  %v5541_v61 = vld [vmem:[#allocation33_spill] sm:$0xff]  ;;  %v1047_v60 = vshra.s32 %v4458_v45, 16  ;;  %v5542_v18 = vld [vmem:[#allocation32_spill] sm:$0xff] }
 0x219   : > { %v4456_v44 = vcvt.s32.f32 %v1351_v39  ;;  %vm785_vm5 = vcmp.eq.f32.partialorder %v5541_v61, %v4230_v55  ;;  %v4465_v17 = vsel %vm1300_vm1, %v872_v51, %v873_v8  ;;  %v845_v22 = vsel %vm781_vm8, %v3411_v32, 256  ;;  %v5544_v51 = vld [vmem:[#allocation35_spill] sm:$0xff]  ;;  %v5545_v8 = vld [vmem:[#allocation37_spill] sm:$0xff] }
 0x21a   : > { %2121 = vst.msk [vmem:[%s3052_s9 + $0x78] sm:$0xff] %vm271_vm0, %v2073_v1  ;;  %vm816_vm11 = vcmp.eq.f32.partialorder %v5542_v18, %v4306_v24  ;;  %vm817_vm13 = vcmp.eq.f32.partialorder %v5543_v4, %v4306_v24  ;;  %1034 = vmin.xlane.f32.xlu0 %v4454_v27  ;;  %vm1076_vm10 = vcmp.lt.s32.totalorder %v844_v25, %v845_v22  ;;  %v876_v29 = vsel %vm812_vm2, %v3388_v63, 256 }
 0x21b   : > { %1354 = vmin.xlane.f32.xlu1 %v4456_v44  ;;  %vm786_vm3 = vcmp.eq.f32.partialorder %v5544_v51, %v4296_v38  ;;  %v4483_v15 = vsel %vm1076_vm10, %v844_v25, %v845_v22  ;;  %v877_v39 = vsel %vm813_vm14, %v3411_v32, 256  ;;  %v848_v1 = vsel %vm784_vm7, %v3388_v63, 256  ;;  %v5546_v22 = vld [vmem:[#allocation36_spill] sm:$0xff]  ;;  %v2658_v51 = vld [vmem:[%s2855_s6 + $0xb0] sm:$0xff] }
 0x21c   : > { %vm787_vm8 = vcmp.eq.f32.partialorder %v5545_v8, %v4296_v38  ;;  %v4495_v2 = vcvt.s32.f32 %v1047_v60  ;;  %v1303_v12 = vshra.s32 %v4465_v17, 16  ;;  %vm1332_vm2 = vcmp.lt.s32.totalorder %v876_v29, %v877_v39  ;;  %v2668_v38 = vld [vmem:[%s2855_s6 + $0xd8] sm:$0xff] }
 0x21d   : > { %v4498_v25 = vsel %vm1332_vm2, %v876_v29, %v877_v39  ;;  %v849_v41 = vsel %vm785_vm5, %v3411_v32, 256  ;;  %v880_v50 = vsel %vm816_vm11, %v3388_v63, 256  ;;  %v881_v60 = vsel %vm817_vm13, %v3411_v32, 256  ;;  %v5547_v29 = vld [vmem:[#allocation38_spill] sm:$0xff] }
 0x21e   : > { %vm818_vm4 = vcmp.eq.f32.partialorder %v5546_v22, %v4372_v21  ;;  %vm819_vm15 = vcmp.eq.f32.partialorder %v5547_v29, %v4372_v21  ;;  %1050 = vmin.xlane.f32.xlu0 %v4495_v2  ;;  %vm1108_vm14 = vcmp.lt.s32.totalorder %v848_v1, %v849_v41  ;;  %vm1364_vm7 = vcmp.lt.s32.totalorder %v880_v50, %v881_v60  ;;  %v2664_v21 = vld [vmem:[%s2855_s6 + $0x98] sm:$0xff] }
 0x21f   : > { %1726 = vadd.xlane.f32.xlu1 %v4140_v49  ;;  %v4518_v61 = vsel %vm1108_vm14, %v848_v1, %v849_v41  ;;  %v850_v18 = vsel %vm786_vm3, %v3388_v63, 256  ;;  %v851_v4 = vsel %vm787_vm8, %v3411_v32, 256  ;;  %v4528_v39 = vcvt.s32.f32 %v1303_v12 }
 0x220   : > { %v1079_v22 = vshra.s32 %v4483_v15, 16  ;;  %v4531_v49 = vsel %vm1364_vm7, %v880_v50, %v881_v60  ;;  %vm1124_vm9 = vcmp.lt.s32.totalorder %v850_v18, %v851_v4  ;;  %v882_v1 = vsel %vm818_vm4, %v3388_v63, 256 }
 0x221   : > { %v1680_v41 = vmul.f32 %v2658_v51, %v2658_v51  ;;  %v4537_v24 = vsel %vm1124_vm9, %v850_v18, %v851_v4  ;;  %v883_v12 = vsel %vm819_vm15, %v3411_v32, 256  ;;  %v1335_v50 = vshra.s32 %v4498_v25, 16  ;;  %v2660_v32 = vld [vmem:[%s2855_s6 + $0xd0] sm:$0xff]  ;;  %v2661_v51 = vld [vmem:[%s2855_s6 + $0xe0] sm:$0xff] }
 0x222   : > { %1306 = vmin.xlane.f32.xlu0 %v4528_v39  ;;  %vm1380_vm1 = vcmp.lt.s32.totalorder %v882_v1, %v883_v12  ;;  %v4543_v8 = vcvt.s32.f32 %v1079_v22  ;;  %v1111_v4 = vshra.s32 %v4518_v61, 16  ;;  %v1684_v29 = vmul.f32 %v2660_v32, %v2660_v32 }
 0x223   : > { %1730 = vadd.xlane.f32.xlu1 %v4151_v43  ;;  %v4546_v63 = vsel %vm1380_vm1, %v882_v1, %v883_v12  ;;  %v2659_v43 = vld [vmem:[%s2855_s6 + $0xc0] sm:$0xff]  ;;  %v4550_v18 = vcvt.s32.f32 %v1335_v50  ;;  %v1367_v1 = vshra.s32 %v4531_v49, 16  ;;  %v2662_v50 = vld [vmem:[%s2855_s6 + $0x88] sm:$0xff]  ;;  %v1127_v32 = vshra.s32 %v4537_v24, 16 }
 0x224   : > { %v1682_v60 = vmul.f32 %v2659_v43, %v2659_v43  ;;  %v4555_v22 = vcvt.s32.f32 %v1111_v4  ;;  %v1675_v43 = vmul.f32 %v2662_v50, %v2662_v50  ;;  %v1685_v55 = vmul.f32 %v2668_v38, %v2668_v38 }
 0x225   : > { %v4560_v12 = vcvt.s32.f32 %v1367_v1  ;;  %v1383_v1 = vshra.s32 %v4546_v63, 16 }
 0x226   : > { %1082 = vmin.xlane.f32.xlu0 %v4543_v8 }
 0x227   : > { %1734 = vadd.xlane.f32.xlu1 %v1680_v41  ;;  %v1686_v41 = vmul.f32 %v2661_v51, %v2661_v51  ;;  %v4567_v51 = vcvt.s32.f32 %v1127_v32 }
 0x22a   : > { %1338 = vmin.xlane.f32.xlu0 %v4550_v18 }
 0x22b   : > { %1738 = vadd.xlane.f32.xlu1 %v1682_v60  ;;  %v2663_v60 = vld [vmem:[%s2855_s6 + $0xf0] sm:$0xff] }
 0x22c   : > { %v1688_v4 = vmul.f32 %v2663_v60, %v2663_v60  ;;  %v4572_v60 = vcvt.s32.f32 %v1383_v1  ;;  %v886_v1 = vand.u32 65535, %v3462_v37 }
 0x22e   : > { %1114 = vmin.xlane.f32.xlu0 %v4555_v22  ;;  %v888_v11 = vcvt.s32.f32 %v886_v1  ;;  %v918_v1 = vand.u32 65535, %v3653_v34 }
 0x22f   : > { %1742 = vadd.xlane.f32.xlu1 %v1684_v29  ;;  %v1677_v29 = vmul.f32 %v2664_v21, %v2664_v21  ;;  %v2667_v21 = vld [vmem:[%s2855_s6 + $0xc8] sm:$0xff] }
 0x230   : > { %v1683_v32 = vmul.f32 %v2667_v21, %v2667_v21 }
 0x232   : > { %1370 = vmin.xlane.f32.xlu0 %v4560_v12 }
 0x233   : > { %1746 = vadd.xlane.f32.xlu1 %v1686_v41  ;;  %v2665_v41 = vld [vmem:[%s2855_s6 + $0xa8] sm:$0xff] }
 0x234   : > { %v1679_v50 = vmul.f32 %v2665_v41, %v2665_v41  ;;  %v1689_v41 = vmul.f32 %v2670_v56, %v2670_v56  ;;  %v902_v56 = vand.u32 65535, %v3603_v10 }
 0x236   : > { %1724 = vadd.xlane.f32.xlu0 %v1675_v43  ;;  %v2666_v43 = vld [vmem:[%s2855_s6 + $0xb8] sm:$0xff] }
 0x237   : > { %1750 = vadd.xlane.f32.xlu1 %v1688_v4  ;;  %v1681_v4 = vmul.f32 %v2666_v43, %v2666_v43  ;;  %v1142_v43 = vand.u32 65535, %v3524_v42  ;;  %v904_v42 = vcvt.s32.f32 %v902_v56  ;;  %v934_v56 = vand.u32 65535, %v3770_v23 }
 0x23a   : > { %1728 = vadd.xlane.f32.xlu0 %v1677_v29  ;;  %v2669_v29 = vld [vmem:[%s2855_s6 + $0xe8] sm:$0xff] }
 0x23b   : > { %1130 = vmin.xlane.f32.xlu1 %v4567_v51  ;;  %v1687_v7 = vmul.f32 %v2669_v29, %v2669_v29 }
 0x23e   : > { %1732 = vadd.xlane.f32.xlu0 %v1679_v50 }
 0x23f   : > { %1386 = vmin.xlane.f32.xlu1 %v4572_v60 }
 0x242   : > { %1736 = vadd.xlane.f32.xlu0 %v1681_v4 }
 0x246   : > { %1740 = vadd.xlane.f32.xlu0 %v1683_v32  ;;  %v5548_v32 = vld [vmem:[#allocation51_spill] sm:$0xff] }
 0x247   : > { %v1158_v29 = vand.u32 65535, %v5548_v32  ;;  %v936_v32 = vcvt.s32.f32 %v934_v56 }
 0x24a   : > { %1744 = vadd.xlane.f32.xlu0 %v1685_v55  ;;  %v1144_v55 = vcvt.s32.f32 %v1142_v43 }
 0x24e   : > { %1748 = vadd.xlane.f32.xlu0 %v1687_v7 }
 0x252   : > { %1752 = vadd.xlane.f32.xlu0 %v1689_v41  ;;  %v1160_v41 = vcvt.s32.f32 %v1158_v29 }
 0x259   : > { %v4581_v50 = vpop.xlane.xlu0 %890 }
 0x25a   : > { %vm892_vm5 = vcmp.eq.f32.partialorder %v3498_v33, %v4581_v50 }
 0x25b   : > { %v893_v4 = vsel %vm892_vm5, %v888_v11, inf  ;;  %v5549_v11 = vld [vmem:[#allocation54_spill] sm:$0xff] }
 0x25c   : > { %894 = vmin.xlane.f32.xlu1 %v893_v4 }
 0x25e   : > { %v4586_v38 = vpop.xlane.xlu0 %1146 }
 0x25f   : > { %vm1148_vm11 = vcmp.eq.f32.partialorder %v3566_v26, %v4586_v38  ;;  %v1174_v26 = vand.u32 65535, %v3692_v57 }
 0x260   : > { %v1149_v7 = vsel %vm1148_vm11, %v1144_v55, inf  ;;  %v4591_v37 = vpop.xlane.xlu1 %1162  ;;  %v920_v55 = vcvt.s32.f32 %v918_v1  ;;  %v1222_v1 = vand.u32 65535, %v3909_v36 }
 0x261   : > { %1150 = vmin.xlane.f32.xlu0 %v1149_v7  ;;  %vm1164_vm10 = vcmp.eq.f32.partialorder %v5549_v11, %v4591_v37 }
 0x262   : > { %v1165_v43 = vsel %vm1164_vm10, %v1160_v41, inf }
 0x264   : > { %v4593_v21 = vpop.xlane.xlu0 %906 }
 0x265   : > { %vm908_vm13 = vcmp.eq.f32.partialorder %v3633_v47, %v4593_v21  ;;  %v1176_v47 = vcvt.s32.f32 %v1174_v26  ;;  %v966_v26 = vand.u32 65535, %v4036_v13  ;;  %v1224_v13 = vcvt.s32.f32 %v1222_v1 }
 0x266   : > { %v909_v33 = vsel %vm908_vm13, %v904_v42, inf }
 0x267   : > { %910 = vmin.xlane.f32.xlu1 %v909_v33 }
 0x268   : > { %v4601_v10 = vpop.xlane.xlu0 %922 }
 0x269   : > { %vm924_vm3 = vcmp.eq.f32.partialorder %v3690_v48, %v4601_v10  ;;  %v1190_v48 = vand.u32 65535, %v3753_v52  ;;  %v1206_v52 = vand.u32 65535, %v3968_v3 }
 0x26a   : > { %v925_v7 = vsel %vm924_vm3, %v920_v55, inf  ;;  %v968_v55 = vcvt.s32.f32 %v966_v26  ;;  %v5554_v26 = vld [vmem:[#allocation15_spill] sm:$0xff] }
 0x26b   : > { %1166 = vmin.xlane.f32.xlu1 %v1165_v43  ;;  %v1192_v23 = vcvt.s32.f32 %v1190_v48  ;;  %v1208_v3 = vcvt.s32.f32 %v1206_v52 }
 0x26c   : > { %v4606_v4 = vpop.xlane.xlu0 %1178 }
 0x26d   : > { %vm1180_vm8 = vcmp.eq.f32.partialorder %v3739_v28, %v4606_v4  ;;  %v950_v28 = vand.u32 65535, %v3855_v30  ;;  %v2752_v30 = vmov 0  }
 0x26e   : > { %v1181_v57 = vsel %vm1180_vm8, %v1176_v47, inf  ;;  %304 = vst.msk [vmem:[%s4627_s18] sm:$0xff] %vm271_vm0, %v2752_v30  ;;  %305 = vst.msk [vmem:[%s4627_s18 + $0x8] sm:$0xff] %vm271_vm0, %v2752_v30 }
 0x26f   : > { %1182 = vmin.xlane.f32.xlu0 %v1181_v57  ;;  %926 = vmin.xlane.f32.xlu1 %v925_v7  ;;  %306 = vst.msk [vmem:[%s4627_s18 + $0x10] sm:$0xff] %vm271_vm0, %v2752_v30  ;;  %307 = vst.msk [vmem:[%s4627_s18 + $0x18] sm:$0xff] %vm271_vm0, %v2752_v30  ;;  %v1238_v7 = vand.u32 65535, %v4144_v20  ;;  %v5550_v20 = vld [vmem:[#allocation7_spill] sm:$0xff] }
 0x270   : > { %v4611_v34 = vpop.xlane.xlu1 %1194  ;;  %308 = vst.msk [vmem:[%s4627_s18 + $0x20] sm:$0xff] %vm271_vm0, %v2752_v30  ;;  %309 = vst.msk [vmem:[%s4627_s18 + $0x28] sm:$0xff] %vm271_vm0, %v2752_v30 }
 0x271   : > { %vm1196_vm4 = vcmp.eq.f32.partialorder %v3793_v31, %v4611_v34  ;;  %v952_v31 = vcvt.s32.f32 %v950_v28  ;;  %310 = vst.msk [vmem:[%s4627_s18 + $0x30] sm:$0xff] %vm271_vm0, %v2752_v30  ;;  %311 = vst.msk [vmem:[%s4627_s18 + $0x38] sm:$0xff] %vm271_vm0, %v2752_v30 }
 0x272   : > { %v4613_v42 = vpop.xlane.xlu0 %938  ;;  %v1197_v33 = vsel %vm1196_vm4, %v1192_v23, inf  ;;  %312 = vst.msk [vmem:[%s4627_s18 + $0x40] sm:$0xff] %vm271_vm0, %v2752_v30  ;;  %313 = vst.msk [vmem:[%s4627_s18 + $0x48] sm:$0xff] %vm271_vm0, %v2752_v30 }
 0x273   : > { %vm940_vm2 = vcmp.eq.f32.partialorder %v3825_v19, %v4613_v42  ;;  %314 = vst.msk [vmem:[%s4627_s18 + $0x50] sm:$0xff] %vm271_vm0, %v2752_v30  ;;  %315 = vst.msk [vmem:[%s4627_s18 + $0x58] sm:$0xff] %vm271_vm0, %v2752_v30 }
 0x274   : > { %v941_v29 = vsel %vm940_vm2, %v936_v32, inf  ;;  %316 = vst.msk [vmem:[%s4627_s18 + $0x60] sm:$0xff] %vm271_vm0, %v2752_v30  ;;  %317 = vst.msk [vmem:[%s4627_s18 + $0x68] sm:$0xff] %vm271_vm0, %v2752_v30 }
 0x275   : > { %942 = vmin.xlane.f32.xlu1 %v941_v29  ;;  %318 = vst.msk [vmem:[%s4627_s18 + $0x70] sm:$0xff] %vm271_vm0, %v2752_v30  ;;  %319 = vst.msk [vmem:[%s4627_s18 + $0x78] sm:$0xff] %vm271_vm0, %v2752_v30  ;;  %v998_v29 = vand.u32 65535, %v4224_v59 }
 0x276   : > { %320 = vst.msk [vmem:[%s4627_s18 + $0x80] sm:$0xff] %vm271_vm0, %v2752_v30  ;;  %321 = vst.msk [vmem:[%s4627_s18 + $0x88] sm:$0xff] %vm271_vm0, %v2752_v30 }
 0x277   : > { %322 = vst.msk [vmem:[%s4627_s18 + $0x90] sm:$0xff] %vm271_vm0, %v2752_v30  ;;  %323 = vst.msk [vmem:[%s4627_s18 + $0x98] sm:$0xff] %vm271_vm0, %v2752_v30 }
 0x278   : > { %324 = vst.msk [vmem:[%s4627_s18 + $0xa0] sm:$0xff] %vm271_vm0, %v2752_v30  ;;  %325 = vst.msk [vmem:[%s4627_s18 + $0xa8] sm:$0xff] %vm271_vm0, %v2752_v30 }
 0x279   : > { %1198 = vmin.xlane.f32.xlu1 %v1197_v33  ;;  %326 = vst.msk [vmem:[%s4627_s18 + $0xb0] sm:$0xff] %vm271_vm0, %v2752_v30  ;;  %327 = vst.msk [vmem:[%s4627_s18 + $0xb8] sm:$0xff] %vm271_vm0, %v2752_v30  ;;  %v5551_v33 = vld [vmem:[#allocation87_spill] sm:$0xff] }
 0x27a   : > { %v4621_v11 = vpop.xlane.xlu0 %954  ;;  %328 = vst.msk [vmem:[%s4627_s18 + $0xc0] sm:$0xff] %vm271_vm0, %v2752_v30  ;;  %329 = vst.msk [vmem:[%s4627_s18 + $0xc8] sm:$0xff] %vm271_vm0, %v2752_v30 }
 0x27b   : > { %vm956_vm15 = vcmp.eq.f32.partialorder %v3929_v14, %v4621_v11  ;;  %330 = vst.msk [vmem:[%s4627_s18 + $0xd0] sm:$0xff] %vm271_vm0, %v2752_v30  ;;  %331 = vst.msk [vmem:[%s4627_s18 + $0xd8] sm:$0xff] %vm271_vm0, %v2752_v30 }
 0x27c   : > { %v957_v19 = vsel %vm956_vm15, %v952_v31, inf  ;;  %332 = vst.msk [vmem:[%s4627_s18 + $0xe0] sm:$0xff] %vm271_vm0, %v2752_v30  ;;  %333 = vst.msk [vmem:[%s4627_s18 + $0xe8] sm:$0xff] %vm271_vm0, %v2752_v30  ;;  %v4702_v43 = vpop.xlane.xlu1 %1226  ;;  %v1254_v31 = vand.u32 65535, %v5551_v33  ;;  %v1046_v33 = vand.u32 65535, %v4458_v45 }
 0x27d   : > { %958 = vmin.xlane.f32.xlu1 %v957_v19  ;;  %334 = vst.msk [vmem:[%s4627_s18 + $0xf0] sm:$0xff] %vm271_vm0, %v2752_v30  ;;  %335 = vst.msk [vmem:[%s4627_s18 + $0xf8] sm:$0xff] %vm271_vm0, %v2752_v30  ;;  %vm1228_vm9 = vcmp.eq.f32.partialorder %v3945_v54, %v4702_v43  ;;  %v5552_v19 = vld [vmem:[#allocation10_spill] sm:$0xff] }
 0x27e   : > { %v1229_v57 = vsel %vm1228_vm9, %v1224_v13, inf  ;;  %v1256_v1 = vcvt.s32.f32 %v1254_v31  ;;  %v1270_v13 = vand.u32 65535, %v4377_v5 }
 0x280   : > { %v4696_v14 = vpop.xlane.xlu0 %1210 }
 0x281   : > { %vm1212_vm14 = vcmp.eq.f32.partialorder %v3993_v16, %v4696_v14  ;;  %v982_v16 = vand.u32 65535, %v4106_v6  ;;  %v1240_v6 = vcvt.s32.f32 %v1238_v7 }
 0x282   : > { %v1213_v41 = vsel %vm1212_vm14, %v1208_v3, inf  ;;  %v5553_v3 = vld [vmem:[#allocation91_spill] sm:$0xff] }
 0x283   : > { %1214 = vmin.xlane.f32.xlu0 %v1213_v41  ;;  %v1014_v41 = vand.u32 65535, %v5554_v26 }
 0x286   : > { %v4704_v47 = vpop.xlane.xlu0 %970  ;;  %v4712_v36 = vpop.xlane.xlu1 %1258 }
 0x287   : > { %vm972_vm7 = vcmp.eq.f32.partialorder %v4064_v35, %v4704_v47  ;;  %v984_v35 = vcvt.s32.f32 %v982_v16  ;;  %vm1260_vm13 = vcmp.eq.f32.partialorder %v5553_v3, %v4712_v36  ;;  %v1302_v3 = vand.u32 65535, %v4465_v17 }
 0x288   : > { %v973_v56 = vsel %vm972_vm7, %v968_v55, inf  ;;  %v1078_v17 = vand.u32 65535, %v4483_v15  ;;  %v1334_v15 = vand.u32 65535, %v4498_v25 }
 0x289   : > { %974 = vmin.xlane.f32.xlu1 %v973_v56  ;;  %v1261_v56 = vsel %vm1260_vm13, %v1256_v1, inf }
 0x28d   : > { %v4714_v32 = vpop.xlane.xlu0 %986  ;;  %1230 = vmin.xlane.f32.xlu1 %v1229_v57  ;;  %v1016_v57 = vcvt.s32.f32 %v1014_v41  ;;  %v1048_v41 = vcvt.s32.f32 %v1046_v33  ;;  %v5560_v33 = vld [vmem:[#allocation18_spill] sm:$0xff] }
 0x28e   : > { %vm988_vm1 = vcmp.eq.f32.partialorder %v4157_v62, %v4714_v32  ;;  %v1000_v62 = vcvt.s32.f32 %v998_v29  ;;  %v1030_v29 = vand.u32 65535, %v4425_v40 }
 0x28f   : > { %v989_v48 = vsel %vm988_vm1, %v984_v35, inf }
 0x291   : > { %v4719_v54 = vpop.xlane.xlu0 %1242  ;;  %v4721_v28 = vpop.xlane.xlu1 %1290  ;;  %990 = vmin.xlane.f32.xlu1 %v989_v48  ;;  %v1272_v48 = vcvt.s32.f32 %v1270_v13  ;;  %v5558_v13 = vld [vmem:[#allocation11_spill] sm:$0xff] }
 0x292   : > { %vm1244_vm5 = vcmp.eq.f32.partialorder %v5550_v20, %v4719_v54 }
 0x293   : > { %v1245_v23 = vsel %vm1244_vm5, %v1240_v6, inf }
 0x294   : > { %1246 = vmin.xlane.f32.xlu0 %v1245_v23 }
 0x295   : > { %v4726_v52 = vpop.xlane.xlu0 %1002 }
 0x296   : > { %vm1004_vm11 = vcmp.eq.f32.partialorder %v5552_v19, %v4726_v52  ;;  %v5556_v19 = vld [vmem:[#allocation19_spill] sm:$0xff] }
 0x297   : > { %v1005_v30 = vsel %vm1004_vm11, %v1000_v62, inf  ;;  %v1032_v62 = vcvt.s32.f32 %v1030_v29  ;;  %vm1292_vm2 = vcmp.eq.f32.partialorder %v5556_v19, %v4721_v28 }
 0x298   : > { %v4730_v59 = vpop.xlane.xlu1 %1066  ;;  %1006 = vmin.xlane.f32.xlu1 %v1005_v30 }
 0x299   : > { %vm1068_vm15 = vcmp.eq.f32.partialorder %v5558_v13, %v4730_v59 }
 0x29c   : > { %v4735_v55 = vpop.xlane.xlu0 %1018  ;;  %1262 = vmin.xlane.f32.xlu1 %v1261_v56 }
 0x29d   : > { %vm1020_vm10 = vcmp.eq.f32.partialorder %v4333_v0, %v4735_v55  ;;  %v4739_v16 = vpop.xlane.xlu1 %1322  ;;  %v5555_v0 = vld [vmem:[#allocation6_spill] sm:$0xff] }
 0x29e   : > { %v1021_v7 = vsel %vm1020_vm10, %v1016_v57, inf  ;;  %v1286_v23 = vand.u32 65535, %v5555_v0  ;;  %v5559_v57 = vld [vmem:[#allocation27_spill] sm:$0xff]  ;;  %vm1324_vm7 = vcmp.eq.f32.partialorder %v5560_v33, %v4739_v16 }
 0x2a0   : > { %1022 = vmin.xlane.f32.xlu1 %v1021_v7  ;;  %v1288_v1 = vcvt.s32.f32 %v1286_v23  ;;  %v1318_v7 = vand.u32 65535, %v5559_v57 }
 0x2a2   : > { %v4742_v35 = vpop.xlane.xlu0 %1274 }
 0x2a3   : > { %vm1276_vm3 = vcmp.eq.f32.partialorder %v4402_v46, %v4742_v35  ;;  %v5557_v46 = vld [vmem:[#allocation20_spill] sm:$0xff] }
 0x2a4   : > { %v4747_v6 = vpop.xlane.xlu1 %1098  ;;  %v1277_v20 = vsel %vm1276_vm3, %v1272_v48, inf  ;;  %v1062_v30 = vand.u32 65535, %v5557_v46  ;;  %v1080_v46 = vcvt.s32.f32 %v1078_v17 }
 0x2a5   : > { %1278 = vmin.xlane.f32.xlu0 %v1277_v20  ;;  %v1304_v20 = vcvt.s32.f32 %v1302_v3  ;;  %vm1100_vm1 = vcmp.eq.f32.partialorder %v4418_v9, %v4747_v6 }
 0x2a6   : > { %v1064_v0 = vcvt.s32.f32 %v1062_v30  ;;  %v1320_v30 = vcvt.s32.f32 %v1318_v7 }
 0x2a7   : > { %v4751_v5 = vpop.xlane.xlu0 %1034 }
 0x2a8   : > { %v4753_v31 = vpop.xlane.xlu1 %1354  ;;  %vm1036_vm8 = vcmp.eq.f32.partialorder %v4454_v27, %v4751_v5  ;;  %v1293_v27 = vsel %vm1292_vm2, %v1288_v1, inf  ;;  %v1069_v23 = vsel %vm1068_vm15, %v1064_v0, inf  ;;  %v1325_v3 = vsel %vm1324_vm7, %v1320_v30, inf }
 0x2a9   : > { %v1037_v40 = vsel %vm1036_vm8, %v1032_v62, inf  ;;  %v1094_v62 = vand.u32 65535, %v4385_v53  ;;  %v1350_v1 = vand.u32 65535, %v4427_v58  ;;  %v1110_v53 = vand.u32 65535, %v4518_v61 }
 0x2aa   : > { %1038 = vmin.xlane.f32.xlu1 %v1037_v40  ;;  %vm1356_vm10 = vcmp.eq.f32.partialorder %v4456_v44, %v4753_v31 }
 0x2ab   : > { %v4761_v26 = vpop.xlane.xlu0 %1050  ;;  %v1096_v13 = vcvt.s32.f32 %v1094_v62  ;;  %v1352_v62 = vcvt.s32.f32 %v1350_v1 }
 0x2ac   : > { %v1727_v45 = vpop.xlane.xlu1 %1726  ;;  %vm1052_vm4 = vcmp.eq.f32.partialorder %v4495_v2, %v4761_v26 }
 0x2ad   : > { %2596 = vrsqrt.f32 %v1727_v45  ;;  %v1053_v56 = vsel %vm1052_vm4, %v1048_v41, inf  ;;  %vm1882_vm5 = vcmp.eq.f32.partialorder %v1727_v45, inf  ;;  %v1885_v57 = vand.u32 2147483648, %v1727_v45 }
 0x2ae   : > { %1054 = vmin.xlane.f32.xlu0 %v1053_v56  ;;  %1294 = vmin.xlane.f32.xlu1 %v1293_v27  ;;  %vm1884_vm13 = vcmp.eq.f32.partialorder %v1727_v45, 0.0  ;;  %v1101_v61 = vsel %vm1100_vm1, %v1096_v13, inf }
 0x2af   : > { %v4769_v48 = vpop.xlane.xlu0 %1306 }
 0x2b0   : > { %v1731_v29 = vpop.xlane.xlu1 %1730  ;;  %vm1308_vm14 = vcmp.eq.f32.partialorder %v4528_v39, %v4769_v48 }
 0x2b1   : > { %2598 = vrsqrt.f32 %v1731_v29  ;;  %v1309_v2 = vsel %vm1308_vm14, %v1304_v20, inf  ;;  %v1366_v20 = vand.u32 65535, %v4531_v49  ;;  %vm1896_vm3 = vcmp.eq.f32.partialorder %v1731_v29, inf }
 0x2b2   : > { %1310 = vmin.xlane.f32.xlu0 %v1309_v2  ;;  %1070 = vmin.xlane.f32.xlu1 %v1069_v23  ;;  %v1899_v9 = vand.u32 2147483648, %v1731_v29  ;;  %vm1898_vm2 = vcmp.eq.f32.partialorder %v1731_v29, 0.0 }
 0x2b3   : > { %v4777_v40 = vpop.xlane.xlu0 %1082 }
 0x2b4   : > { %v4779_v19 = vpop.xlane.xlu1 %1734  ;;  %vm1084_vm9 = vcmp.eq.f32.partialorder %v4543_v8, %v4777_v40  ;;  %v1336_v8 = vcvt.s32.f32 %v1334_v15  ;;  %v1357_v15 = vsel %vm1356_vm10, %v1352_v62, inf }
 0x2b5   : > { %2600 = vrsqrt.f32 %v4779_v19  ;;  %v1085_v39 = vsel %vm1084_vm9, %v1080_v46, inf  ;;  %vm1910_vm4 = vcmp.eq.f32.partialorder %v4779_v19, inf  ;;  %vm1912_vm14 = vcmp.eq.f32.partialorder %v4779_v19, 0.0 }
 0x2b6   : > { %1086 = vmin.xlane.f32.xlu0 %v1085_v39  ;;  %1326 = vmin.xlane.f32.xlu1 %v1325_v3 }
 0x2b7   : > { %v2597_v41 = vpop.eup %2596  ;;  %v4788_v56 = vpop.xlane.xlu0 %1338 }
 0x2b8   : > { %v1881_v25 = vmul.f32 %v2597_v41, %v1727_v45  ;;  %v4790_v27 = vpop.xlane.xlu1 %1738  ;;  %vm1340_vm11 = vcmp.eq.f32.partialorder %v4550_v18, %v4788_v56 }
 0x2b9   : > { %2602 = vrsqrt.f32 %v4790_v27  ;;  %v1341_v7 = vsel %vm1340_vm11, %v1336_v8, inf  ;;  %vm1924_vm7 = vcmp.eq.f32.partialorder %v4790_v27, inf  ;;  %vm1926_vm9 = vcmp.eq.f32.partialorder %v4790_v27, 0.0 }
 0x2ba   : > { %v1883_v58 = vsel %vm1882_vm5, %v1727_v45, %v1881_v25  ;;  %1342 = vmin.xlane.f32.xlu0 %v1341_v7  ;;  %1102 = vmin.xlane.f32.xlu1 %v1101_v61  ;;  %v1112_v45 = vcvt.s32.f32 %v1110_v53  ;;  %v1368_v53 = vcvt.s32.f32 %v1366_v20 }
 0x2bb   : > { %v2599_v17 = vpop.eup %2598  ;;  %v1886_v0 = vsel %vm1884_vm13, %v1885_v57, %v1883_v58  ;;  %v4801_v23 = vpop.xlane.xlu0 %1114  ;;  %v1126_v57 = vand.u32 65535, %v4537_v24 }
 0x2bc   : > { %v2028_v2 = vmax.f32 %v1886_v0, 1e-12  ;;  %v1895_v18 = vmul.f32 %v2599_v17, %v1731_v29  ;;  %v4803_v33 = vpop.xlane.xlu1 %1742  ;;  %vm1116_vm8 = vcmp.eq.f32.partialorder %v4555_v22, %v4801_v23  ;;  %v1927_v17 = vand.u32 2147483648, %v4790_v27 }
 0x2bd   : > { %2604 = vrsqrt.f32 %v4803_v33  ;;  %v1117_v39 = vsel %vm1116_vm8, %v1112_v45, inf  ;;  %vm1938_vm1 = vcmp.eq.f32.partialorder %v4803_v33, inf  ;;  %vm1940_vm5 = vcmp.eq.f32.partialorder %v4803_v33, 0.0 }
 0x2be   : > { %2606 = vrcp.f32 %v2028_v2  ;;  %v1897_v49 = vsel %vm1896_vm3, %v1731_v29, %v1895_v18  ;;  %1358 = vmin.xlane.f32.xlu1 %v1357_v15  ;;  %1118 = vmin.xlane.f32.xlu0 %v1117_v39  ;;  %v1913_v29 = vand.u32 2147483648, %v4779_v19  ;;  %v1382_v2 = vand.u32 65535, %v4546_v63  ;;  %v1996_v18 = vld [vmem:[%s3052_s9 + $0x90] sm:$0xff] }
 0x2bf   : > { %v2601_v46 = vpop.eup %2600  ;;  %v1900_v30 = vsel %vm1898_vm2, %v1899_v9, %v1897_v49  ;;  %v4812_v1 = vpop.xlane.xlu0 %1370  ;;  %v1128_v15 = vcvt.s32.f32 %v1126_v57 }
 0x2c0   : > { %v2030_v3 = vmax.f32 %v1900_v30, 1e-12  ;;  %v1909_v41 = vmul.f32 %v2601_v46, %v4779_v19  ;;  %v4814_v22 = vpop.xlane.xlu1 %1746  ;;  %vm1372_vm15 = vcmp.eq.f32.partialorder %v4560_v12, %v4812_v1  ;;  %v1384_v57 = vcvt.s32.f32 %v1382_v2 }
 0x2c1   : > { %2608 = vrsqrt.f32 %v4814_v22  ;;  %v1373_v13 = vsel %vm1372_vm15, %v1368_v53, inf  ;;  %v1998_v53 = vld [vmem:[%s3052_s9 + $0xa0] sm:$0xff]  ;;  %vm1952_vm13 = vcmp.eq.f32.partialorder %v4814_v22, inf  ;;  %vm1954_vm10 = vcmp.eq.f32.partialorder %v4814_v22, 0.0 }
 0x2c2   : > { %2610 = vrcp.f32 %v2030_v3  ;;  %v1911_v44 = vsel %vm1910_vm4, %v4779_v19, %v1909_v41  ;;  %1374 = vmin.xlane.f32.xlu0 %v1373_v13 }
 0x2c3   : > { %v2603_v25 = vpop.eup %2602  ;;  %v1914_v8 = vsel %vm1912_vm14, %v1913_v29, %v1911_v44  ;;  %v4825_v61 = vpop.xlane.xlu0 %1724 }
 0x2c4   : > { %v2032_v58 = vmax.f32 %v1914_v8, 1e-12  ;;  %v1923_v7 = vmul.f32 %v2603_v25, %v4790_v27  ;;  %v4827_v12 = vpop.xlane.xlu1 %1750  ;;  %2612 = vrsqrt.f32 %v4825_v61  ;;  %vm1875_vm3 = vcmp.eq.f32.partialorder %v4825_v61, inf }
 0x2c5   : > { %vm1877_vm2 = vcmp.eq.f32.partialorder %v4825_v61, 0.0  ;;  %vm1966_vm4 = vcmp.eq.f32.partialorder %v4827_v12, inf  ;;  %vm1968_vm15 = vcmp.eq.f32.partialorder %v4827_v12, 0.0 }
 0x2c6   : > { %2614 = vrcp.f32 %v2032_v58  ;;  %v1925_v19 = vsel %vm1924_vm7, %v4790_v27, %v1923_v7  ;;  %v1941_v27 = vand.u32 2147483648, %v4803_v33 }
 0x2c7   : > { %v2605_v24 = vpop.eup %2604  ;;  %v1928_v20 = vsel %vm1926_vm9, %v1927_v17, %v1925_v19  ;;  %2616 = vrsqrt.f32 %v4827_v12  ;;  %v4838_v9 = vpop.xlane.xlu0 %1728  ;;  %v1878_v17 = vand.u32 2147483648, %v4825_v61 }
 0x2c8   : > { %v2607_v0 = vpop.eup %2606  ;;  %v2034_v45 = vmax.f32 %v1928_v20, 1e-12  ;;  %v1937_v62 = vmul.f32 %v2605_v24, %v4803_v33  ;;  %v4840_v49 = vpop.xlane.xlu1 %1130  ;;  %2618 = vrsqrt.f32 %v4838_v9  ;;  %v2000_v24 = vld [vmem:[%s3052_s9 + $0xb0] sm:$0xff]  ;;  %vm1889_vm14 = vcmp.eq.f32.partialorder %v4838_v9, inf }
 0x2c9   : > { %v2079_v46 = vmul.f32 %v2607_v0, %v1996_v18  ;;  %vm1132_vm11 = vcmp.eq.f32.partialorder %v4567_v51, %v4840_v49  ;;  %v1955_v51 = vand.u32 2147483648, %v4814_v22  ;;  %vm1891_vm7 = vcmp.eq.f32.partialorder %v4838_v9, 0.0 }
 0x2ca   : > { %2620 = vrcp.f32 %v2034_v45  ;;  %v1939_v63 = vsel %vm1938_vm1, %v4803_v33, %v1937_v62  ;;  %v1133_v3 = vsel %vm1132_vm11, %v1128_v15, inf }
 0x2cb   : > { %v2609_v30 = vpop.eup %2608  ;;  %2124 = vst.msk [vmem:[%s3052_s9 + $0x90] sm:$0xff] %vm271_vm0, %v2079_v46  ;;  %v1942_v39 = vsel %vm1940_vm5, %v1941_v27, %v1939_v63  ;;  %1134 = vmin.xlane.f32.xlu1 %v1133_v3  ;;  %v4853_v25 = vpop.xlane.xlu0 %1732  ;;  %v1969_v27 = vand.u32 2147483648, %v4827_v12  ;;  %v1892_v63 = vand.u32 2147483648, %v4838_v9 }
 0x2cc   : > { %v2611_v41 = vpop.eup %2610  ;;  %v2036_v29 = vmax.f32 %v1942_v39, 1e-12  ;;  %v1951_v44 = vmul.f32 %v2609_v30, %v4814_v22  ;;  %v4855_v8 = vpop.xlane.xlu1 %1386  ;;  %2622 = vrsqrt.f32 %v4853_v25  ;;  %v2002_v39 = vld [vmem:[%s3052_s9 + $0xc0] sm:$0xff]  ;;  %vm1903_vm9 = vcmp.eq.f32.partialorder %v4853_v25, inf }
 0x2cd   : > { %v2083_v33 = vmul.f32 %v2611_v41, %v1998_v53  ;;  %vm1388_vm8 = vcmp.eq.f32.partialorder %v4572_v60, %v4855_v8  ;;  %vm1905_vm1 = vcmp.eq.f32.partialorder %v4853_v25, 0.0 }
 0x2ce   : > { %2624 = vrcp.f32 %v2036_v29  ;;  %v1953_v13 = vsel %vm1952_vm13, %v4814_v22, %v1951_v44  ;;  %v2613_v58 = vpop.eup %2612  ;;  %v1389_v22 = vsel %vm1388_vm8, %v1384_v57, inf }
 0x2cf   : > { %2126 = vst.msk [vmem:[%s3052_s9 + $0xa0] sm:$0xff] %vm271_vm0, %v2083_v33  ;;  %v1956_v7 = vsel %vm1954_vm10, %v1955_v51, %v1953_v13  ;;  %v1874_v0 = vmul.f32 %v2613_v58, %v4825_v61  ;;  %v4871_v2 = vpop.xlane.xlu0 %1736  ;;  %1390 = vmin.xlane.f32.xlu1 %v1389_v22 }
 0x2d0   : > { %v2615_v19 = vpop.eup %2614  ;;  %v2038_v20 = vmax.f32 %v1956_v7, 1e-12  ;;  %2626 = vrsqrt.f32 %v4871_v2  ;;  %v2004_v7 = vld [vmem:[%s3052_s9 + $0xd0] sm:$0xff]  ;;  %vm1917_vm5 = vcmp.eq.f32.partialorder %v4871_v2, inf  ;;  %vm1919_vm11 = vcmp.eq.f32.partialorder %v4871_v2, 0.0 }
 0x2d1   : > { %v2617_v18 = vpop.eup %2616  ;;  %v2087_v45 = vmul.f32 %v2615_v19, %v2000_v24  ;;  %v1876_v60 = vsel %vm1875_vm3, %v4825_v61, %v1874_v0 }
 0x2d2   : > { %2628 = vrcp.f32 %v2038_v20  ;;  %v1965_v62 = vmul.f32 %v2617_v18, %v4827_v12  ;;  %v2619_v15 = vpop.eup %2618  ;;  %v1879_v46 = vsel %vm1877_vm2, %v1878_v17, %v1876_v60  ;;  %v1920_v18 = vand.u32 2147483648, %v4871_v2  ;;  %v2006_v60 = vld [vmem:[%s3052_s9 + $0xe0] sm:$0xff] }
 0x2d3   : > { %2128 = vst.msk [vmem:[%s3052_s9 + $0xb0] sm:$0xff] %vm271_vm0, %v2087_v45  ;;  %v2027_v3 = vmax.f32 %v1879_v46, 1e-12  ;;  %v1888_v41 = vmul.f32 %v2619_v15, %v4838_v9  ;;  %v1741_v53 = vpop.xlane.xlu0 %1740 }
 0x2d4   : > { %v2621_v30 = vpop.eup %2620  ;;  %v1967_v61 = vsel %vm1966_vm4, %v4827_v12, %v1965_v62  ;;  %2630 = vrsqrt.f32 %v1741_v53  ;;  %v1906_v12 = vand.u32 2147483648, %v4853_v25  ;;  %vm1931_vm13 = vcmp.eq.f32.partialorder %v1741_v53, inf }
 0x2d5   : > { %v2091_v29 = vmul.f32 %v2621_v30, %v2002_v39  ;;  %v1970_v44 = vsel %vm1968_vm15, %v1969_v27, %v1967_v61  ;;  %2632 = vrcp.f32 %v2027_v3  ;;  %v1890_v51 = vsel %vm1889_vm14, %v4838_v9, %v1888_v41  ;;  %v1995_v61 = vld [vmem:[%s3052_s9 + $0x88] sm:$0xff] }
 0x2d6   : > { %v2040_v33 = vmax.f32 %v1970_v44, 1e-12  ;;  %v2623_v13 = vpop.eup %2622  ;;  %v1893_v57 = vsel %vm1891_vm7, %v1892_v63, %v1890_v51  ;;  %v1934_v39 = vand.u32 2147483648, %v1741_v53  ;;  %vm1933_vm10 = vcmp.eq.f32.partialorder %v1741_v53, 0.0 }
 0x2d7   : > { %2130 = vst.msk [vmem:[%s3052_s9 + $0xc0] sm:$0xff] %vm271_vm0, %v2091_v29  ;;  %v2029_v17 = vmax.f32 %v1893_v57, 1e-12  ;;  %v1902_v19 = vmul.f32 %v2623_v13, %v4853_v25  ;;  %v1745_v24 = vpop.xlane.xlu0 %1744  ;;  %v2008_v13 = vld [vmem:[%s3052_s9 + $0xf0] sm:$0xff] }
 0x2d8   : > { %v2625_v58 = vpop.eup %2624  ;;  %2634 = vrcp.f32 %v2040_v33  ;;  %vm1945_vm3 = vcmp.eq.f32.partialorder %v1745_v24, inf  ;;  %vm1947_vm8 = vcmp.eq.f32.partialorder %v1745_v24, 0.0 }
 0x2d9   : > { %v2095_v9 = vmul.f32 %v2625_v58, %v2004_v7  ;;  %2636 = vrsqrt.f32 %v1745_v24  ;;  %v1904_v20 = vsel %vm1903_vm9, %v4853_v25, %v1902_v19  ;;  %v1948_v7 = vand.u32 2147483648, %v1745_v24  ;;  %v1997_v19 = vld [vmem:[%s3052_s9 + $0x98] sm:$0xff] }
 0x2da   : > { %2638 = vrcp.f32 %v2029_v17  ;;  %v2627_v0 = vpop.eup %2626  ;;  %v1907_v22 = vsel %vm1905_vm1, %v1906_v12, %v1904_v20 }
 0x2db   : > { %2132 = vst.msk [vmem:[%s3052_s9 + $0xd0] sm:$0xff] %vm271_vm0, %v2095_v9  ;;  %v2031_v62 = vmax.f32 %v1907_v22, 1e-12  ;;  %v1916_v15 = vmul.f32 %v2627_v0, %v4871_v2  ;;  %v1749_v46 = vpop.xlane.xlu0 %1748 }
 0x2dc   : > { %v2629_v45 = vpop.eup %2628  ;;  %2640 = vrsqrt.f32 %v1749_v46  ;;  %vm1959_vm2 = vcmp.eq.f32.partialorder %v1749_v46, inf  ;;  %vm1961_vm4 = vcmp.eq.f32.partialorder %v1749_v46, 0.0 }
 0x2dd   : > { %v2099_v27 = vmul.f32 %v2629_v45, %v2006_v60  ;;  %2642 = vrcp.f32 %v2031_v62  ;;  %v1918_v25 = vsel %vm1917_vm5, %v4871_v2, %v1916_v15  ;;  %v1962_v45 = vand.u32 2147483648, %v1749_v46  ;;  %v1999_v62 = vld [vmem:[%s3052_s9 + $0xa8] sm:$0xff] }
 0x2de   : > { %v2631_v63 = vpop.eup %2630  ;;  %v1921_v30 = vsel %vm1919_vm11, %v1920_v18, %v1918_v25 }
 0x2df   : > { %2134 = vst.msk [vmem:[%s3052_s9 + $0xe0] sm:$0xff] %vm271_vm0, %v2099_v27  ;;  %v2633_v3 = vpop.eup %2632  ;;  %v2033_v41 = vmax.f32 %v1921_v30, 1e-12  ;;  %v1930_v29 = vmul.f32 %v2631_v63, %v1741_v53  ;;  %v1753_v44 = vpop.xlane.xlu0 %1752 }
 0x2e0   : > { %v2077_v33 = vmul.f32 %v2633_v3, %v1995_v61  ;;  %2644 = vrsqrt.f32 %v1753_v44  ;;  %vm1973_vm15 = vcmp.eq.f32.partialorder %v1753_v44, inf  ;;  %v1976_v3 = vand.u32 2147483648, %v1753_v44 }
 0x2e1   : > { %2646 = vrcp.f32 %v2033_v41  ;;  %v1932_v2 = vsel %vm1931_vm13, %v1741_v53, %v1930_v29  ;;  %v2001_v41 = vld [vmem:[%s3052_s9 + $0xb8] sm:$0xff]  ;;  %vm1975_vm14 = vcmp.eq.f32.partialorder %v1753_v44, 0.0 }
 0x2e2   : > { %v2635_v51 = vpop.eup %2634  ;;  %2123 = vst.msk [vmem:[%s3052_s9 + $0x88] sm:$0xff] %vm271_vm0, %v2077_v33  ;;  %v1935_v58 = vsel %vm1933_vm10, %v1934_v39, %v1932_v2 }
 0x2e3   : > { %v2637_v57 = vpop.eup %2636  ;;  %v2103_v12 = vmul.f32 %v2635_v51, %v2008_v13  ;;  %v2035_v9 = vmax.f32 %v1935_v58, 1e-12  ;;  %v1153_v58 = vcvt.f32.s32 %v4586_v38  ;;  %v2005_v38 = vld [vmem:[%s3052_s9 + $0xd8] sm:$0xff] }
 0x2e4   : > { %v2639_v17 = vpop.eup %2638  ;;  %v1944_v20 = vmul.f32 %v2637_v57, %v1745_v24 }
 0x2e5   : > { %2136 = vst.msk [vmem:[%s3052_s9 + $0xf0] sm:$0xff] %vm271_vm0, %v2103_v12  ;;  %v2081_v0 = vmul.f32 %v2639_v17, %v1997_v19  ;;  %2648 = vrcp.f32 %v2035_v9  ;;  %v1559_v19 = vld [vmem:[%s4627_s18] sm:$0xff] }
 0x2e6   : > { %v1946_v22 = vsel %vm1945_vm3, %v1745_v24, %v1944_v20  ;;  %v2641_v53 = vpop.eup %2640  ;;  %v897_v24 = vcvt.f32.s32 %v4581_v50 }
 0x2e7   : > { %2125 = vst.msk [vmem:[%s3052_s9 + $0x98] sm:$0xff] %vm271_vm0, %v2081_v0  ;;  %v1949_v18 = vsel %vm1947_vm8, %v1948_v7, %v1946_v22  ;;  %v2643_v60 = vpop.eup %2642  ;;  %v1958_v27 = vmul.f32 %v2641_v53, %v1749_v46  ;;  %v2003_v7 = vld [vmem:[%s3052_s9 + $0xc8] sm:$0xff] }
 0x2e8   : > { %v2037_v15 = vmax.f32 %v1949_v18, 1e-12  ;;  %v2085_v25 = vmul.f32 %v2643_v60, %v1999_v62  ;;  %v898_v2 = vshll.u32 %v897_v24, 16  ;;  %v913_v62 = vcvt.f32.s32 %v4593_v21  ;;  %v2007_v24 = vld [vmem:[%s3052_s9 + $0xe8] sm:$0xff] }
 0x2e9   : > { %v1960_v63 = vsel %vm1959_vm2, %v1749_v46, %v1958_v27  ;;  %v895_v13 = vpop.xlane.xlu1 %894  ;;  %v1575_v27 = vld [vmem:[%s4627_s18 + $0x80] sm:$0xff] }
 0x2ea   : > { %2650 = vrcp.f32 %v2037_v15  ;;  %v2645_v30 = vpop.eup %2644  ;;  %2127 = vst.msk [vmem:[%s3052_s9 + $0xa8] sm:$0xff] %vm271_vm0, %v2085_v25  ;;  %v1963_v39 = vsel %vm1961_vm4, %v1962_v45, %v1960_v63  ;;  %v896_v57 = vcvt.f32.s32 %v895_v13  ;;  %v1154_v45 = vshll.u32 %v1153_v58, 16 }
 0x2eb   : > { %v2647_v61 = vpop.eup %2646  ;;  %v2039_v29 = vmax.f32 %v1963_v39, 1e-12  ;;  %v1972_v33 = vmul.f32 %v2645_v30, %v1753_v44  ;;  %v1169_v30 = vcvt.f32.s32 %v4591_v37  ;;  %v5563_v39 = vld [vmem:[#allocation44_spill] sm:$0xff] }
 0x2ec   : > { %v2089_v51 = vmul.f32 %v2647_v61, %v2001_v41  ;;  %v899_v20 = vadd.s32 %v898_v2, %v896_v57  ;;  %v929_v2 = vcvt.f32.s32 %v4601_v10 }
 0x2ed   : > { %2652 = vrcp.f32 %v2039_v29  ;;  %v1974_v46 = vsel %vm1973_vm15, %v1753_v44, %v1972_v33  ;;  %v914_v29 = vshll.u32 %v913_v62, 16  ;;  %v1170_v13 = vshll.u32 %v1169_v30, 16 }
 0x2ee   : > { %2129 = vst.msk [vmem:[%s3052_s9 + $0xb8] sm:$0xff] %vm271_vm0, %v2089_v51  ;;  %v1977_v50 = vsel %vm1975_vm14, %v1976_v3, %v1974_v46  ;;  %v1591_v22 = vsel %vm1462_vm12, %v899_v20, %v1559_v19  ;;  %v1151_v53 = vpop.xlane.xlu0 %1150  ;;  %v5564_v3 = vld [vmem:[#allocation42_spill] sm:$0xff]  ;;  %v930_v44 = vshll.u32 %v929_v2, 16 }
 0x2ef   : > { %v2649_v12 = vpop.eup %2648  ;;  %v2041_v17 = vmax.f32 %v1977_v50, 1e-12  ;;  %1623 = vst.msk [vmem:[%s4627_s18] sm:$0xff] %vm271_vm0, %v1591_v22  ;;  %v1152_v60 = vcvt.f32.s32 %v1151_v53  ;;  %vm5565_vm12 = vcmp.gt.f32.partialorder %v5563_v39, %v5564_v3  ;;  %v1560_v51 = vld [vmem:[%s4627_s18 + $0x8] sm:$0xff]  ;;  %v2009_v50 = vld [vmem:[%s3052_s9 + $0xf8] sm:$0xff] }
 0x2f0   : > { %v2093_v9 = vmul.f32 %v2649_v12, %v2003_v7  ;;  %v1185_v12 = vcvt.f32.s32 %v4606_v4  ;;  %v5566_v7 = vld [vmem:[#allocation47_spill] sm:$0xff] }
 0x2f1   : > { %2654 = vrcp.f32 %v2041_v17  ;;  %v1155_v25 = vadd.s32 %v1154_v45, %v1152_v60  ;;  %v5567_v17 = vld [vmem:[#allocation45_spill] sm:$0xff] }
 0x2f2   : > { %2131 = vst.msk [vmem:[%s3052_s9 + $0xc8] sm:$0xff] %vm271_vm0, %v2093_v9  ;;  %vm5568_vm7 = vcmp.gt.f32.partialorder %v5566_v7, %v5567_v17  ;;  %v1576_v9 = vld [vmem:[%s4627_s18 + $0x88] sm:$0xff] }
 0x2f3   : > { %v1607_v61 = vsel %vm5565_vm12, %v1155_v25, %v1575_v27 }
 0x2f4   : > { %v2651_v18 = vpop.eup %2650  ;;  %v911_v41 = vpop.xlane.xlu1 %910  ;;  %1639 = vst.msk [vmem:[%s4627_s18 + $0x80] sm:$0xff] %vm271_vm0, %v1607_v61 }
 0x2f5   : > { %v2097_v15 = vmul.f32 %v2651_v18, %v2005_v38  ;;  %v912_v21 = vcvt.f32.s32 %v911_v41 }
 0x2f7   : > { %2133 = vst.msk [vmem:[%s3052_s9 + $0xd8] sm:$0xff] %vm271_vm0, %v2097_v15  ;;  %v2653_v63 = vpop.eup %2652  ;;  %v915_v37 = vadd.s32 %v914_v29, %v912_v21 }
 0x2f8   : > { %v2101_v33 = vmul.f32 %v2653_v63, %v2007_v24  ;;  %v1167_v57 = vpop.xlane.xlu1 %1166 }
 0x2f9   : > { %v1592_v10 = vsel %vm5568_vm7, %v915_v37, %v1560_v51  ;;  %v1168_v19 = vcvt.f32.s32 %v1167_v57 }
 0x2fa   : > { %2135 = vst.msk [vmem:[%s3052_s9 + $0xe8] sm:$0xff] %vm271_vm0, %v2101_v33  ;;  %1624 = vst.msk [vmem:[%s4627_s18 + $0x8] sm:$0xff] %vm271_vm0, %v1592_v10 }
 0x2fb   : > { %v2655_v46 = vpop.eup %2654  ;;  %v1171_v20 = vadd.s32 %v1170_v13, %v1168_v19 }
 0x2fc   : > { %v2105_v58 = vmul.f32 %v2655_v46, %v2009_v50  ;;  %v1183_v0 = vpop.xlane.xlu0 %1182  ;;  %v927_v22 = vpop.xlane.xlu1 %926 }
 0x2fe   : > { %2137 = vst.msk [vmem:[%s3052_s9 + $0xf8] sm:$0xff] %vm271_vm0, %v2105_v58 }
 0x2ff   : > { %2684 = shalt.err (!%p2681_p5)
}
 0x300   : > { %s2685_s5 = scalar_lea.hbm %s4958_s27, 4096  ;;  %s2689_s8 = scalar_lea.hbm %s5220_s2, 8192 }
 0x301   : > { %p2686_p6 = scmp.ne.s32.totalorder %s4958_s27, %s2685_s5  ;;  %p2690_p10 = scmp.lt.u32.totalorder %s4958_s27, %s5220_s2 }
 0x302   : > { %p2691_p11 = scmp.lt.u32.totalorder %s2689_s8, %s2685_s5  ;;  %p2693_p13 = scmp.lt.u32.totalorder %s2685_s5, %s4958_s27 }
 0x303   : > { %p2687_p7 = pnand %p2686_p6, %p2816_p4 }
 0x304   : > { %p2692_p12 = por %p2691_p11, %p2690_p10 }
 0x305   : > { %p2688_p9 = pneg %p2687_p7 }
 0x306   : > { %p2694_p0 = por %p2693_p13, %p2692_p12 }
 0x308   : > { %p2695_p1 = pnand %p2694_p0, %p2688_p9 }
 0x30a   : > { %2698 = shalt.err (!%p2695_p1)
}
 0x30b   : > { %s2754_s11 = smov 128   ;;  %s2755_s19 = smov 8   ;;  %v1186_v4 = vshll.u32 %v1185_v12, 16  ;;  %v5569_v53 = vld [vmem:[#allocation43_spill] sm:$0xff]  ;;  %v5570_v18 = vld [vmem:[#allocation41_spill] sm:$0xff]  ;;  %v1184_v38 = vcvt.f32.s32 %v1183_v0  ;;  %v928_v60 = vcvt.f32.s32 %v927_v22  ;;  %v945_v62 = vcvt.f32.s32 %v4613_v42  ;;  %v5572_v30 = vld [vmem:[#allocation52_spill] sm:$0xff]  ;;  %v943_v29 = vpop.xlane.xlu1 %942 }
 0x30c   : > { %2469 = dma.vmem_to_hbm [thread:$0]  (%p2816_p4), %s4960_s21, 4096, %s4958_s27, %s4973_s15, %s2754_s11, %s2754_s11, %s2755_s19   ;;  %vm5571_vm9 = vcmp.gt.f32.partialorder %v5569_v53, %v5570_v18  ;;  %v5573_v24 = vld [vmem:[#allocation49_spill] sm:$0xff]  ;;  %v5575_v3 = vld [vmem:[#allocation48_spill] sm:$0xff]  ;;  %v5576_v61 = vld [vmem:[#allocation46_spill] sm:$0xff]  ;;  %v1201_v33 = vcvt.f32.s32 %v4611_v34  ;;  %v944_v21 = vcvt.f32.s32 %v943_v29  ;;  %v961_v2 = vcvt.f32.s32 %v4621_v11 }
 0x30d   : > { %v1608_v45 = vsel %vm5571_vm9, %v1171_v20, %v1576_v9  ;;  %v1577_v15 = vld [vmem:[%s4627_s18 + $0x90] sm:$0xff]  ;;  %v1187_v25 = vadd.s32 %v1186_v4, %v1184_v38  ;;  %v931_v63 = vadd.s32 %v930_v44, %v928_v60  ;;  %vm5574_vm1 = vcmp.gt.f32.partialorder %v5572_v30, %v5573_v24  ;;  %v1562_v51 = vld [vmem:[%s4627_s18 + $0x18] sm:$0xff]  ;;  %v5578_v50 = vld [vmem:[#allocation53_spill] sm:$0xff] }
 0x30e   : > { %1640 = vst.msk [vmem:[%s4627_s18 + $0x88] sm:$0xff] %vm271_vm0, %v1608_v45  ;;  %v1561_v27 = vld [vmem:[%s4627_s18 + $0x10] sm:$0xff]  ;;  %vm5577_vm5 = vcmp.gt.f32.partialorder %v5575_v3, %v5576_v61  ;;  %v946_v42 = vshll.u32 %v945_v62, 16  ;;  %v1202_v13 = vshll.u32 %v1201_v33, 16  ;;  %v5579_v57 = vld [vmem:[#allocation50_spill] sm:$0xff]  ;;  %v1578_v34 = vld [vmem:[%s4627_s18 + $0x98] sm:$0xff]  ;;  %v1217_v11 = vcvt.f32.s32 %v4696_v14 }
 0x30f   : > { %v1609_v39 = vsel %vm5574_vm1, %v1187_v25, %v1577_v15  ;;  %v1593_v41 = vsel %vm5577_vm5, %v931_v63, %v1561_v27  ;;  %v1199_v46 = vpop.xlane.xlu1 %1198  ;;  %vm5580_vm11 = vcmp.gt.f32.partialorder %v5578_v50, %v5579_v57  ;;  %v962_v10 = vshll.u32 %v961_v2, 16  ;;  %v5581_v19 = vld [vmem:[#allocation57_spill] sm:$0xff]  ;;  %v5582_v9 = vld [vmem:[#allocation55_spill] sm:$0xff]  ;;  %v5584_v53 = vld [vmem:[#allocation58_spill] sm:$0xff] }
 0x310   : > { %1641 = vst.msk [vmem:[%s4627_s18 + $0x90] sm:$0xff] %vm271_vm0, %v1609_v39  ;;  %1625 = vst.msk [vmem:[%s4627_s18 + $0x10] sm:$0xff] %vm271_vm0, %v1593_v41  ;;  %v947_v37 = vadd.s32 %v946_v42, %v944_v21  ;;  %v1200_v58 = vcvt.f32.s32 %v1199_v46  ;;  %vm5583_vm13 = vcmp.gt.f32.partialorder %v5581_v19, %v5582_v9  ;;  %v1563_v0 = vld [vmem:[%s4627_s18 + $0x20] sm:$0xff]  ;;  %v1215_v4 = vpop.xlane.xlu0 %1214  ;;  %v5585_v18 = vld [vmem:[#allocation56_spill] sm:$0xff]  ;;  %v1218_v38 = vshll.u32 %v1217_v11, 16 }
 0x311   : > { %vm5586_vm10 = vcmp.gt.f32.partialorder %v5584_v53, %v5585_v18  ;;  %v1216_v60 = vcvt.f32.s32 %v1215_v4  ;;  %v1579_v62 = vld [vmem:[%s4627_s18 + $0xa0] sm:$0xff]  ;;  %v977_v15 = vcvt.f32.s32 %v4704_v47  ;;  %v5588_v25 = vld [vmem:[#allocation59_spill] sm:$0xff]  ;;  %v1233_v24 = vcvt.f32.s32 %v4702_v43  ;;  %v1564_v61 = vld [vmem:[%s4627_s18 + $0x28] sm:$0xff] }
 0x312   : > { %v1594_v12 = vsel %vm5580_vm11, %v947_v37, %v1562_v51  ;;  %v1203_v7 = vadd.s32 %v1202_v13, %v1200_v58  ;;  %v5587_v27 = vld [vmem:[#allocation61_spill] sm:$0xff]  ;;  %v993_v47 = vcvt.f32.s32 %v4714_v32  ;;  %v5590_v42 = vld [vmem:[#allocation62_spill] sm:$0xff]  ;;  %v5591_v21 = vld [vmem:[#allocation60_spill] sm:$0xff]  ;;  %v1249_v13 = vcvt.f32.s32 %v4719_v54 }
 0x313   : > { %1626 = vst.msk [vmem:[%s4627_s18 + $0x18] sm:$0xff] %vm271_vm0, %v1594_v12  ;;  %v959_v17 = vpop.xlane.xlu1 %958  ;;  %v1219_v14 = vadd.s32 %v1218_v38, %v1216_v60  ;;  %vm5589_vm3 = vcmp.gt.f32.partialorder %v5587_v27, %v5588_v25  ;;  %v978_v39 = vshll.u32 %v977_v15, 16  ;;  %v1234_v33 = vshll.u32 %v1233_v24, 16  ;;  %v1580_v46 = vld [vmem:[%s4627_s18 + $0xa8] sm:$0xff]  ;;  %v5593_v57 = vld [vmem:[#allocation65_spill] sm:$0xff]  ;;  %v5594_v12 = vld [vmem:[#allocation63_spill] sm:$0xff] }
 0x314   : > { %v1610_v20 = vsel %vm5583_vm13, %v1203_v7, %v1578_v34  ;;  %v960_v44 = vcvt.f32.s32 %v959_v17  ;;  %vm5592_vm8 = vcmp.gt.f32.partialorder %v5590_v42, %v5591_v21  ;;  %v994_v50 = vshll.u32 %v993_v47, 16  ;;  %v1565_v34 = vld [vmem:[%s4627_s18 + $0x30] sm:$0xff]  ;;  %v5596_v54 = vld [vmem:[#allocation66_spill] sm:$0xff]  ;;  %v5599_v18 = vld [vmem:[#allocation69_spill] sm:$0xff] }
 0x315   : > { %1642 = vst.msk [vmem:[%s4627_s18 + $0x98] sm:$0xff] %vm271_vm0, %v1610_v20  ;;  %v1611_v63 = vsel %vm5589_vm3, %v1219_v14, %v1579_v62  ;;  %vm5595_vm2 = vcmp.gt.f32.partialorder %v5593_v57, %v5594_v12  ;;  %v1009_v19 = vcvt.f32.s32 %v4726_v52  ;;  %v1581_v20 = vld [vmem:[%s4627_s18 + $0xb0] sm:$0xff]  ;;  %v1265_v4 = vcvt.f32.s32 %v4712_v36  ;;  %v1566_v60 = vld [vmem:[%s4627_s18 + $0x38] sm:$0xff]  ;;  %v5602_v25 = vld [vmem:[#allocation70_spill] sm:$0xff] }
 0x316   : > { %v963_v22 = vadd.s32 %v962_v10, %v960_v44  ;;  %1643 = vst.msk [vmem:[%s4627_s18 + $0xa0] sm:$0xff] %vm271_vm0, %v1611_v63  ;;  %v1250_v10 = vshll.u32 %v1249_v13, 16  ;;  %v5597_v44 = vld [vmem:[#allocation64_spill] sm:$0xff]  ;;  %v1025_v27 = vcvt.f32.s32 %v4735_v55  ;;  %v1567_v42 = vld [vmem:[%s4627_s18 + $0x40] sm:$0xff]  ;;  %v1297_v12 = vcvt.f32.s32 %v4721_v28 }
 0x317   : > { %v975_v30 = vpop.xlane.xlu1 %974  ;;  %vm5598_vm4 = vcmp.gt.f32.partialorder %v5596_v54, %v5597_v44  ;;  %v1010_v53 = vshll.u32 %v1009_v19, 16  ;;  %v1266_v14 = vshll.u32 %v1265_v4, 16  ;;  %v5603_v63 = vld [vmem:[#allocation68_spill] sm:$0xff]  ;;  %v1568_v19 = vld [vmem:[%s4627_s18 + $0x48] sm:$0xff]  ;;  %v1073_v54 = vcvt.f32.s32 %v4730_v59 }
 0x318   : > { %v1595_v45 = vsel %vm5586_vm10, %v963_v22, %v1563_v0  ;;  %v976_v3 = vcvt.f32.s32 %v975_v30  ;;  %vm5604_vm14 = vcmp.gt.f32.partialorder %v5602_v25, %v5603_v63  ;;  %v1582_v24 = vld [vmem:[%s4627_s18 + $0xb8] sm:$0xff]  ;;  %v1313_v28 = vcvt.f32.s32 %v4769_v48  ;;  %v5615_v4 = vld [vmem:[#allocation78_spill] sm:$0xff] }
 0x319   : > { %1627 = vst.msk [vmem:[%s4627_s18 + $0x20] sm:$0xff] %vm271_vm0, %v1595_v45  ;;  %v5600_v45 = vld [vmem:[#allocation67_spill] sm:$0xff]  ;;  %v5609_v13 = vld [vmem:[#allocation72_spill] sm:$0xff]  ;;  %v1074_v48 = vshll.u32 %v1073_v54, 16  ;;  %v5617_v25 = vld [vmem:[#allocation82_spill] sm:$0xff] }
 0x31a   : > { %v979_v41 = vadd.s32 %v978_v39, %v976_v3  ;;  %vm5601_vm15 = vcmp.gt.f32.partialorder %v5599_v18, %v5600_v45  ;;  %v1569_v45 = vld [vmem:[%s4627_s18 + $0x50] sm:$0xff]  ;;  %v5618_v63 = vld [vmem:[#allocation80_spill] sm:$0xff]  ;;  %v5633_v54 = vld [vmem:[#allocation89_spill] sm:$0xff] }
 0x31b   : > { %v1231_v29 = vpop.xlane.xlu1 %1230  ;;  %vm5619_vm5 = vcmp.gt.f32.partialorder %v5617_v25, %v5618_v63  ;;  %v1588_v25 = vld [vmem:[%s4627_s18 + $0xe8] sm:$0xff]  ;;  %v1573_v63 = vld [vmem:[%s4627_s18 + $0x70] sm:$0xff] }
 0x31c   : > { %v1596_v51 = vsel %vm5592_vm8, %v979_v41, %v1564_v61  ;;  %v1232_v37 = vcvt.f32.s32 %v1231_v29  ;;  %v1026_v61 = vshll.u32 %v1025_v27, 16  ;;  %v1281_v41 = vcvt.f32.s32 %v4742_v35  ;;  %v5605_v29 = vld [vmem:[#allocation73_spill] sm:$0xff] }
 0x31d   : > { %1628 = vst.msk [vmem:[%s4627_s18 + $0x28] sm:$0xff] %vm271_vm0, %v1596_v51  ;;  %v1041_v35 = vcvt.f32.s32 %v4751_v5 }
 0x31e   : > { %v1235_v43 = vadd.s32 %v1234_v33, %v1232_v37  ;;  %v5606_v33 = vld [vmem:[#allocation71_spill] sm:$0xff]  ;;  %v1282_v37 = vshll.u32 %v1281_v41, 16 }
 0x31f   : > { %v991_v2 = vpop.xlane.xlu1 %990  ;;  %vm5607_vm12 = vcmp.gt.f32.partialorder %v5605_v29, %v5606_v33 }
 0x320   : > { %v1612_v58 = vsel %vm5595_vm2, %v1235_v43, %v1580_v46  ;;  %v992_v32 = vcvt.f32.s32 %v991_v2  ;;  %v5608_v43 = vld [vmem:[#allocation74_spill] sm:$0xff] }
 0x321   : > { %1644 = vst.msk [vmem:[%s4627_s18 + $0xa8] sm:$0xff] %vm271_vm0, %v1612_v58  ;;  %v1247_v7 = vpop.xlane.xlu0 %1246  ;;  %vm5610_vm7 = vcmp.gt.f32.partialorder %v5608_v43, %v5609_v13  ;;  %v5611_v58 = vld [vmem:[#allocation76_spill] sm:$0xff]  ;;  %v5626_v13 = vld [vmem:[#allocation85_spill] sm:$0xff] }
 0x322   : > { %v995_v17 = vadd.s32 %v994_v50, %v992_v32  ;;  %v1248_v9 = vcvt.f32.s32 %v1247_v7  ;;  %v1583_v50 = vld [vmem:[%s4627_s18 + $0xc0] sm:$0xff]  ;;  %v5612_v32 = vld [vmem:[#allocation75_spill] sm:$0xff] }
 0x323   : > { %vm5613_vm9 = vcmp.gt.f32.partialorder %v5611_v58, %v5612_v32 }
 0x324   : > { %v1597_v11 = vsel %vm5598_vm4, %v995_v17, %v1565_v34  ;;  %v1251_v0 = vadd.s32 %v1250_v10, %v1248_v9  ;;  %v1042_v17 = vshll.u32 %v1041_v35, 16  ;;  %v1057_v10 = vcvt.f32.s32 %v4761_v26 }
 0x325   : > { %1629 = vst.msk [vmem:[%s4627_s18 + $0x30] sm:$0xff] %vm271_vm0, %v1597_v11  ;;  %v1007_v22 = vpop.xlane.xlu1 %1006 }
 0x326   : > { %v1613_v38 = vsel %vm5601_vm15, %v1251_v0, %v1581_v20  ;;  %v1008_v52 = vcvt.f32.s32 %v1007_v22  ;;  %v1298_v20 = vshll.u32 %v1297_v12, 16  ;;  %v1058_v0 = vshll.u32 %v1057_v10, 16  ;;  %v5614_v22 = vld [vmem:[#allocation77_spill] sm:$0xff] }
 0x327   : > { %1645 = vst.msk [vmem:[%s4627_s18 + $0xb0] sm:$0xff] %vm271_vm0, %v1613_v38  ;;  %vm5616_vm1 = vcmp.gt.f32.partialorder %v5614_v22, %v5615_v4  ;;  %v1584_v38 = vld [vmem:[%s4627_s18 + $0xc8] sm:$0xff] }
 0x328   : > { %v1011_v62 = vadd.s32 %v1010_v53, %v1008_v52  ;;  %v1572_v22 = vld [vmem:[%s4627_s18 + $0x68] sm:$0xff] }
 0x329   : > { %v1263_v15 = vpop.xlane.xlu1 %1262 }
 0x32a   : > { %v1598_v36 = vsel %vm5604_vm14, %v1011_v62, %v1566_v60  ;;  %v1264_v30 = vcvt.f32.s32 %v1263_v15  ;;  %v1329_v60 = vcvt.f32.s32 %v4739_v16  ;;  %v1314_v62 = vshll.u32 %v1313_v28, 16  ;;  %v1585_v16 = vld [vmem:[%s4627_s18 + $0xd0] sm:$0xff] }
 0x32b   : > { %1630 = vst.msk [vmem:[%s4627_s18 + $0x38] sm:$0xff] %vm271_vm0, %v1598_v36  ;;  %v1089_v15 = vcvt.f32.s32 %v4777_v40  ;;  %v1570_v40 = vld [vmem:[%s4627_s18 + $0x58] sm:$0xff] }
 0x32c   : > { %v1267_v39 = vadd.s32 %v1266_v14, %v1264_v30  ;;  %v5620_v30 = vld [vmem:[#allocation81_spill] sm:$0xff]  ;;  %v1330_v33 = vshll.u32 %v1329_v60, 16 }
 0x32d   : > { %v1023_v3 = vpop.xlane.xlu1 %1022 }
 0x32e   : > { %v1614_v47 = vsel %vm5607_vm12, %v1267_v39, %v1582_v24  ;;  %v1024_v55 = vcvt.f32.s32 %v1023_v3  ;;  %v5621_v24 = vld [vmem:[#allocation79_spill] sm:$0xff] }
 0x32f   : > { %1646 = vst.msk [vmem:[%s4627_s18 + $0xb8] sm:$0xff] %vm271_vm0, %v1614_v47  ;;  %vm5622_vm11 = vcmp.gt.f32.partialorder %v5620_v30, %v5621_v24  ;;  %v1105_v47 = vcvt.f32.s32 %v4747_v6  ;;  %v1571_v6 = vld [vmem:[%s4627_s18 + $0x60] sm:$0xff] }
 0x330   : > { %v1027_v21 = vadd.s32 %v1026_v61, %v1024_v55  ;;  %v1090_v55 = vshll.u32 %v1089_v15, 16  ;;  %v5641_v24 = vld [vmem:[#allocation21_spill] sm:$0xff] }
 0x331   : > { %v1106_v32 = vshll.u32 %v1105_v47, 16 }
 0x332   : > { %v1279_v51 = vpop.xlane.xlu0 %1278  ;;  %v1599_v2 = vsel %vm5610_vm7, %v1027_v21, %v1567_v42  ;;  %v1345_v42 = vcvt.f32.s32 %v4788_v56  ;;  %v1586_v56 = vld [vmem:[%s4627_s18 + $0xd8] sm:$0xff] }
 0x333   : > { %v1280_v46 = vcvt.f32.s32 %v1279_v51  ;;  %1631 = vst.msk [vmem:[%s4627_s18 + $0x40] sm:$0xff] %vm271_vm0, %v1599_v2  ;;  %v5627_v2 = vld [vmem:[#allocation86_spill] sm:$0xff] }
 0x334   : > { %vm5628_vm10 = vcmp.gt.f32.partialorder %v5626_v13, %v5627_v2  ;;  %v1393_v13 = vcvt.f32.s32 %v4855_v8  ;;  %v1574_v2 = vld [vmem:[%s4627_s18 + $0x78] sm:$0xff] }
 0x335   : > { %v1283_v57 = vadd.s32 %v1282_v37, %v1280_v46  ;;  %v5623_v37 = vld [vmem:[#allocation84_spill] sm:$0xff]  ;;  %v5624_v46 = vld [vmem:[#allocation83_spill] sm:$0xff] }
 0x336   : > { %vm5625_vm13 = vcmp.gt.f32.partialorder %v5623_v37, %v5624_v46 }
 0x337   : > { %v1615_v34 = vsel %vm5613_vm9, %v1283_v57, %v1583_v50  ;;  %v1039_v7 = vpop.xlane.xlu1 %1038 }
 0x338   : > { %1647 = vst.msk [vmem:[%s4627_s18 + $0xc0] sm:$0xff] %vm271_vm0, %v1615_v34  ;;  %v1040_v5 = vcvt.f32.s32 %v1039_v7  ;;  %v1361_v34 = vcvt.f32.s32 %v4753_v31  ;;  %v1346_v7 = vshll.u32 %v1345_v42, 16  ;;  %v1587_v31 = vld [vmem:[%s4627_s18 + $0xe0] sm:$0xff] }
 0x339   : > { %v5647_v42 = vld [vmem:[#allocation17_spill] sm:$0xff] }
 0x33a   : > { %v1043_v9 = vadd.s32 %v1042_v17, %v1040_v5  ;;  %v5629_v5 = vld [vmem:[#allocation90_spill] sm:$0xff] }
 0x33b   : > { %v1055_v44 = vpop.xlane.xlu0 %1054  ;;  %v1295_v11 = vpop.xlane.xlu1 %1294 }
 0x33c   : > { %v1600_v53 = vsel %vm5616_vm1, %v1043_v9, %v1568_v19  ;;  %v1056_v18 = vcvt.f32.s32 %v1055_v44  ;;  %v1296_v26 = vcvt.f32.s32 %v1295_v11  ;;  %v5630_v19 = vld [vmem:[#allocation92_spill] sm:$0xff] }
 0x33d   : > { %1632 = vst.msk [vmem:[%s4627_s18 + $0x48] sm:$0xff] %vm271_vm0, %v1600_v53  ;;  %vm5631_vm3 = vcmp.gt.f32.partialorder %v5629_v5, %v5630_v19 }
 0x33e   : > { %v1059_v59 = vadd.s32 %v1058_v0, %v1056_v18  ;;  %v1299_v52 = vadd.s32 %v1298_v20, %v1296_v26  ;;  %v5632_v20 = vld [vmem:[#allocation88_spill] sm:$0xff]  ;;  %v1121_v0 = vcvt.f32.s32 %v4801_v23  ;;  %v1362_v26 = vshll.u32 %v1361_v34, 16 }
 0x33f   : > { %v1311_v14 = vpop.xlane.xlu0 %1310  ;;  %v1071_v27 = vpop.xlane.xlu1 %1070  ;;  %vm5634_vm8 = vcmp.gt.f32.partialorder %v5632_v20, %v5633_v54 }
 0x340   : > { %v1601_v36 = vsel %vm5619_vm5, %v1059_v59, %v1569_v45  ;;  %v1616_v39 = vsel %vm5622_vm11, %v1299_v52, %v1584_v38  ;;  %v1312_v3 = vcvt.f32.s32 %v1311_v14  ;;  %v1072_v61 = vcvt.f32.s32 %v1071_v27  ;;  %v5635_v45 = vld [vmem:[#allocation12_spill] sm:$0xff]  ;;  %v5636_v38 = vld [vmem:[#allocation14_spill] sm:$0xff]  ;;  %v5638_v52 = vld [vmem:[#allocation93_spill] sm:$0xff] }
 0x341   : > { %1633 = vst.msk [vmem:[%s4627_s18 + $0x50] sm:$0xff] %vm271_vm0, %v1601_v36  ;;  %1648 = vst.msk [vmem:[%s4627_s18 + $0xc8] sm:$0xff] %vm271_vm0, %v1616_v39  ;;  %vm5637_vm2 = vcmp.gt.f32.partialorder %v5635_v45, %v5636_v38  ;;  %v1122_v15 = vshll.u32 %v1121_v0, 16  ;;  %v1377_v14 = vcvt.f32.s32 %v4812_v1  ;;  %v5642_v39 = vld [vmem:[#allocation94_spill] sm:$0xff] }
 0x342   : > { %v1315_v41 = vadd.s32 %v1314_v62, %v1312_v3  ;;  %v1075_v29 = vadd.s32 %v1074_v48, %v1072_v61  ;;  %v5639_v48 = vld [vmem:[#allocation5_spill] sm:$0xff]  ;;  %vm5643_vm15 = vcmp.gt.f32.partialorder %v5641_v24, %v5642_v39 }
 0x343   : > { %v1087_v21 = vpop.xlane.xlu0 %1086  ;;  %v1327_v51 = vpop.xlane.xlu1 %1326  ;;  %vm5640_vm4 = vcmp.gt.f32.partialorder %v5638_v52, %v5639_v48 }
 0x344   : > { %v1617_v43 = vsel %vm5625_vm13, %v1315_v41, %v1585_v16  ;;  %v1602_v35 = vsel %vm5628_vm10, %v1075_v29, %v1570_v40  ;;  %v1088_v50 = vcvt.f32.s32 %v1087_v21  ;;  %v1328_v57 = vcvt.f32.s32 %v1327_v51  ;;  %v5644_v40 = vld [vmem:[#allocation9_spill] sm:$0xff]  ;;  %v5645_v41 = vld [vmem:[#allocation8_spill] sm:$0xff]  ;;  %v5648_v21 = vld [vmem:[#allocation22_spill] sm:$0xff] }
 0x345   : > { %1649 = vst.msk [vmem:[%s4627_s18 + $0xd0] sm:$0xff] %vm271_vm0, %v1617_v43  ;;  %1634 = vst.msk [vmem:[%s4627_s18 + $0x58] sm:$0xff] %vm271_vm0, %v1602_v35  ;;  %v1378_v16 = vshll.u32 %v1377_v14, 16  ;;  %vm5646_vm14 = vcmp.gt.f32.partialorder %v5644_v40, %v5645_v41  ;;  %vm5649_vm12 = vcmp.gt.f32.partialorder %v5647_v42, %v5648_v21 }
 0x346   : > { %v1091_v12 = vadd.s32 %v1090_v55, %v1088_v50  ;;  %v1331_v58 = vadd.s32 %v1330_v33, %v1328_v57  ;;  %v1589_v33 = vld [vmem:[%s4627_s18 + $0xf0] sm:$0xff]  ;;  %v1137_v55 = vcvt.f32.s32 %v4840_v49  ;;  %v5650_v50 = vld [vmem:[#allocation13_spill] sm:$0xff]  ;;  %v5651_v57 = vld [vmem:[#allocation16_spill] sm:$0xff]  ;;  %v1394_v49 = vshll.u32 %v1393_v13, 16 }
 0x347   : > { %v1343_v17 = vpop.xlane.xlu0 %1342  ;;  %v1103_v10 = vpop.xlane.xlu1 %1102  ;;  %vm5652_vm7 = vcmp.gt.f32.partialorder %v5650_v50, %v5651_v57 }
 0x348   : > { %v1603_v9 = vsel %vm5631_vm3, %v1091_v12, %v1571_v6  ;;  %v1618_v28 = vsel %vm5634_vm8, %v1331_v58, %v1586_v56  ;;  %v1344_v44 = vcvt.f32.s32 %v1343_v17  ;;  %v1104_v11 = vcvt.f32.s32 %v1103_v10  ;;  %v1590_v58 = vld [vmem:[%s4627_s18 + $0xf8] sm:$0xff] }
 0x349   : > { %1635 = vst.msk [vmem:[%s4627_s18 + $0x60] sm:$0xff] %vm271_vm0, %v1603_v9  ;;  %1650 = vst.msk [vmem:[%s4627_s18 + $0xd8] sm:$0xff] %vm271_vm0, %v1618_v28  ;;  %v1138_v46 = vshll.u32 %v1137_v55, 16 }
 0x34a   : > { %v1347_v4 = vadd.s32 %v1346_v7, %v1344_v44  ;;  %v1107_v53 = vadd.s32 %v1106_v32, %v1104_v11 }
 0x34b   : > { %v1359_v18 = vpop.xlane.xlu1 %1358  ;;  %v1119_v60 = vpop.xlane.xlu0 %1118 }
 0x34c   : > { %v1619_v59 = vsel %vm5637_vm2, %v1347_v4, %v1587_v31  ;;  %v1604_v23 = vsel %vm5640_vm4, %v1107_v53, %v1572_v22  ;;  %v1360_v62 = vcvt.f32.s32 %v1359_v18  ;;  %v1120_v27 = vcvt.f32.s32 %v1119_v60 }
 0x34d   : > { %1651 = vst.msk [vmem:[%s4627_s18 + $0xe0] sm:$0xff] %vm271_vm0, %v1619_v59  ;;  %1636 = vst.msk [vmem:[%s4627_s18 + $0x68] sm:$0xff] %vm271_vm0, %v1604_v23 }
 0x34e   : > { %v1363_v36 = vadd.s32 %v1362_v26, %v1360_v62  ;;  %v1123_v30 = vadd.s32 %v1122_v15, %v1120_v27 }
 0x34f   : > { %v1375_v61 = vpop.xlane.xlu0 %1374 }
 0x350   : > { %v1620_v3 = vsel %vm5643_vm15, %v1363_v36, %v1588_v25  ;;  %v1605_v1 = vsel %vm5646_vm14, %v1123_v30, %v1573_v63  ;;  %v1376_v29 = vcvt.f32.s32 %v1375_v61 }
 0x351   : > { %1652 = vst.msk [vmem:[%s4627_s18 + $0xe8] sm:$0xff] %vm271_vm0, %v1620_v3  ;;  %1637 = vst.msk [vmem:[%s4627_s18 + $0x70] sm:$0xff] %vm271_vm0, %v1605_v1 }
 0x352   : > { %v1379_v47 = vadd.s32 %v1378_v16, %v1376_v29 }
 0x354   : > { %v1621_v51 = vsel %vm5649_vm12, %v1379_v47, %v1589_v33 }
 0x355   : > { %1653 = vst.msk [vmem:[%s4627_s18 + $0xf0] sm:$0xff] %vm271_vm0, %v1621_v51 }
 0x358   : > { %v1135_v37 = vpop.xlane.xlu1 %1134 }
 0x359   : > { %v1136_v43 = vcvt.f32.s32 %v1135_v37 }
 0x35b   : > { %v1139_v35 = vadd.s32 %v1138_v46, %v1136_v43 }
 0x35c   : > { %v1391_v56 = vpop.xlane.xlu1 %1390 }
 0x35d   : > { %v1606_v6 = vsel %vm5652_vm7, %v1139_v35, %v1574_v2  ;;  %v1392_v12 = vcvt.f32.s32 %v1391_v56 }
 0x35e   : > { %1638 = vst.msk [vmem:[%s4627_s18 + $0x78] sm:$0xff] %vm271_vm0, %v1606_v6 }
 0x35f   : > { %v1395_v32 = vadd.s32 %v1394_v49, %v1392_v12 }
 0x361   : > { %v1622_v17 = vsel %vm1493_vm6, %v1395_v32, %v1590_v58 }
 0x362   : > { %1654 = vst.msk [vmem:[%s4627_s18 + $0xf8] sm:$0xff] %vm271_vm0, %v1622_v17 }
 0x363 PF: > { %p2475_p4 = scmp.ge.s32.totalorder %s2749_s17, 2  ;;  %s2182_s22 = sand.u32 1, %s2729_s12  }
 0x364   : > { %s2183_s21 = scalar_lea.sflag [#allocation3], %s2182_s22 }
 0x365   : > { %p2472_p2 = pnand %p2475_p4, %p2823_p8 }
 0x367   : > { %2724 = dma.done.wait (!%p2472_p2), %s2183_s21, 4096  }
 0x368   : > { %2726 = vsyncadd (!%p2472_p2), %s2183_s21, 4294963200  ;;  %s17_s17 = sadd.s32 1, %s2749_s17   ;;  %s5655_s12 = smov %s2733_s13 }
 0x369   : > { %p14_p3 = scmp.ge.s32.totalorder %s17_s17, 4   ;;  %s5656_s13 = smov %s2737_s14 }
 0x36a   : > { %s5657_s14 = smov %s2829_s25  ;;  %s5658_s15 = smov %s2745_s16 }
 0x36b   : > { %s5659_s16 = smov %s5661_s20  ;;  %16 = sbr.rel (!%p14_p3) target bundleno = 4 (0x4), region = 86 }
 0x372   :  { %2200 = vsyncpa [#allocation3], 1 }
 0x373   :  { %2202 = vsyncpa [#allocation3 + $0x1], 1 }

// kernel: squeeze.385
= control target key start
LH: loop header
LB: loop body
LE: loop exit
PB: predicated region body
PF: predicated region fallthrough
CT: control target
= control target key end

     0   :  { %s149_s0 = inlined_call_operand.vmem [shape: f32[2,256], index: 0, kind: input, shape index: {}]   ;;  %s150_s1 = inlined_call_operand.hbm [shape: f32[2,1,16,16], index: 1, kind: output, shape index: {}]  }
   0x1   :  { %v71_v0 = vld [vmem:[%s149_s0 + $0x2] sm:$0x3]  ;;  %v9_v1 = vld [vmem:[%s149_s0] sm:$0x3] }
   0x2   :  { %8 = vst [vmem:[#allocation2 + $0x8] sm:$0x3] %v71_v0  ;;  %10 = vst [vmem:[#allocation2] sm:$0x3] %v9_v1 }
   0x3   :  { %2 = vsyncpa [#allocation1], 0  ;;  %vm12_vm0 = vcmask 130048   ;;  %s104_s0 = smov 112   ;;  %s105_s10 = smov 80  }
   0x4   :  { %s106_s11 = smov 96   ;;  %s107_s12 = smov 64  }
   0x5   :  { %s108_s13 = smov 48   ;;  %s109_s14 = smov 32  }
   0x6   :  { %s110_s15 = smov 16   ;;  %s111_s16 = smov [#allocation0]  }
   0x7   :  { %s65_s17 = sshll.u32 %s111_s16, 4  ;;  %s66_s17 = int_to_ptr.vmem [resolvable:$true] %s65_s17 }
   0x8   :  { %s80_s18 = scalar_lea.vmem %s66_s17, 512  ;;  %p85_p1 = scmp.lt.s32.totalorder %s66_s17, %s66_s17 }
   0x9   :  { %v19_v2 = vld.sshfl [vmem:[#allocation2] sm:$0xff pattern:$0x99999180]   ;;  %p81_p0 = scmp.ne.s32.totalorder %s66_s17, %s80_s18  ;;  %p86_p2 = scmp.lt.s32.totalorder %s80_s18, %s80_s18 }
   0xa   :  { %v11_v3 = vld [vmem:[#allocation2] sm:$0x3]   ;;  %20 = vrot.lane.b32.xlu0 %v19_v2, %s104_s0  ;;  %32 = vrot.lane.b32.xlu1 %v19_v2, %s105_s10  ;;  %v15_v4 = vld [vmem:[#allocation2 + $0x8] sm:$0x3]  }
   0xb   :  { %13 = vst.msk [vmem:[#allocation0] ss:$16 sm:$0x3] %vm12_vm0, %v11_v3   ;;  %18 = vst.msk [vmem:[#allocation0 + $0x8] ss:$16 sm:$0x3] %vm12_vm0, %v15_v4   ;;  %p87_p3 = por %p86_p2, %p85_p1 }
   0xd   :  { %p88_p4 = pnand %p87_p3, %p81_p0 }
   0xe   :  { %26 = vrot.lane.b32.xlu0 %v19_v2, %s106_s11  ;;  %38 = vrot.lane.b32.xlu1 %v19_v2, %s107_s12 }
  0x12   :  { %44 = vrot.lane.b32.xlu0 %v19_v2, %s108_s13  ;;  %50 = vrot.lane.b32.xlu1 %v19_v2, %s109_s14 }
  0x16   :  { %56 = vrot.lane.b32.xlu0 %v19_v2, %s110_s15 }
  0x7c   :  { %v21_v5 = vpop.permute.xlu0 %20   ;;  %v33_v6 = vpop.permute.xlu1 %32  }
  0x7d   :  { %24 = vst.msk [vmem:[#allocation0 + $0x1] ss:$8 sm:$0xf] %vm12_vm0, %v21_v5   ;;  %36 = vst.msk [vmem:[#allocation0 + $0x3] ss:$8 sm:$0xf] %vm12_vm0, %v33_v6  }
  0x80   :  { %v27_v7 = vpop.permute.xlu0 %26   ;;  %v39_v8 = vpop.permute.xlu1 %38  }
  0x81   :  { %30 = vst.msk [vmem:[#allocation0 + $0x2] ss:$8 sm:$0xf] %vm12_vm0, %v27_v7   ;;  %42 = vst.msk [vmem:[#allocation0 + $0x4] ss:$8 sm:$0xf] %vm12_vm0, %v39_v8  }
  0x84   :  { %v45_v9 = vpop.permute.xlu0 %44   ;;  %v51_v10 = vpop.permute.xlu1 %50  }
  0x85   :  { %48 = vst.msk [vmem:[#allocation0 + $0x5] ss:$8 sm:$0xf] %vm12_vm0, %v45_v9   ;;  %54 = vst.msk [vmem:[#allocation0 + $0x6] ss:$8 sm:$0xf] %vm12_vm0, %v51_v10  }
  0x88   :  { %v57_v11 = vpop.permute.xlu0 %56  }
  0x89   :  { %60 = vst.msk [vmem:[#allocation0 + $0x7] ss:$8 sm:$0xf] %vm12_vm0, %v57_v11  }
  0x8a   :  { %91 = shalt.err (!%p88_p4)
}
  0x8b   :  { %s92_s21 = scalar_lea.hbm %s150_s1, 512 }
  0x8c   :  { %p93_p5 = scmp.ne.s32.totalorder %s150_s1, %s92_s21  ;;  %p96_p6 = scmp.lt.u32.totalorder %s92_s21, %s150_s1 }
  0x8e   :  { %p98_p7 = pnand %p96_p6, %p93_p5 }
  0x90   :  { %101 = shalt.err (!%p98_p7)
}
  0x91   :  { %68 = dma.vmem_to_hbm [thread:$0]  %s66_s17, 512, %s150_s1, [#allocation1]  }
  0x92   :  { %102 = dma.done.wait [#allocation1], 512  }
  0x93   :  { %103 = vsyncadd [#allocation1], 4294966784 }
  0x94   :  { %70 = vsyncpa [#allocation1], 1 }

</bundles_post_ra>
